<compile_context>
chip_gen: v6e
topology: v6e:2x2x1
jax: 0.10.0
libtpu: 0.0.40
codegen_flags: <defaults>
</compile_context>

<pallas_src>
import functools

import jax
import jax.numpy as jnp
from jax.experimental import pallas as pl
from jax.experimental.pallas import tpu as pltpu

_MIB = 1024 * 1024


@functools.lru_cache(maxsize=1)
def _vmem_capacity_bytes():
    """Physical VMEM per TensorCore; conservative fallback if the query fails."""
    try:
        return int(pltpu.get_tpu_info().vmem_capacity_bytes)
    except Exception:
        return 64 * _MIB  # v7x per-core size == safest assumption


# ---------------------------------------------------------------------------
# Kernel 1: one-shot weight normalization, tiled over independent weight rows.
#   w_row = g_row * v_row * rsqrt(sum(v_row^2))        (rsqrt -> EUP slot, no divide)
# The output block is written pre-transposed ((in, out) layout) in the matmul
# operand dtype, so the forward kernel does plain lane-dense (B,K)@(K,N) matmuls.
# ---------------------------------------------------------------------------
def _weightnorm_kernel(v_ref, g_ref, wt_ref):
    v = v_ref[...].astype(jnp.float32)                               # (tile_n, K)
    # Row norms: last-dim (lane-axis) reduction -> cheap XLU path.
    # NOTE: plain sum-of-squares; extreme weight magnitudes would want a scaled norm.
    inv = jax.lax.rsqrt(jnp.sum(v * v, axis=-1, keepdims=True))      # (tile_n, 1)
    w = v * (g_ref[...] * inv)                                       # (tile_n, K) f32
    # Fold the (out,in) -> (in,out) transpose into the kernel (one-shot XLU work)
    # so the wrapper never runs a standalone f32 transpose pass over HBM.
    wt_ref[...] = w.T.astype(wt_ref.dtype)                           # (K, tile_n)


def _pick_weightnorm_tile(n_rows, n_cols):
    # Output block is (K, tile) -> tile must be a multiple of 128 (lane dim) unless
    # it covers all rows.  Keep per-step blocks modest so the prep kernel never
    # blows the scoped VMEM limit for large weights.
    budget = 8 * _MIB
    for t in (1024, 512, 256, 128):
        if t <= n_rows and n_rows % t == 0 and 12 * t * n_cols <= budget:
            return t
    return n_rows


def _normalize_weight(v, g, compute_dtype):
    """Returns g * v / ||v||_row, pre-transposed to (in, out) in compute_dtype."""
    n, k = v.shape
    t = _pick_weightnorm_tile(n, k)
    return pl.pallas_call(
        _weightnorm_kernel,
        out_shape=jax.ShapeDtypeStruct((k, n), compute_dtype),
        grid=(pl.cdiv(n, t),),
        in_specs=[
            pl.BlockSpec((t, k), lambda i: (i, 0)),     # v rows
            pl.BlockSpec((t, 1), lambda i: (i, 0)),     # g
        ],
        out_specs=pl.BlockSpec((k, t), lambda i: (0, i)),   # transposed columns
        compiler_params=pltpu.CompilerParams(dimension_semantics=("parallel",)),
    )(v, g.reshape(n, 1).astype(jnp.float32))


# ---------------------------------------------------------------------------
# Kernel 2: batch-tiled forward.  Weights/biases are VMEM-resident; x / hidden /
# out tiles stream through the pipeline.  hidden is stored in compute_dtype and
# the decoder matmul reads it back from the ref (no live f32 intermediate).
# ---------------------------------------------------------------------------
def _forward_kernel(x_ref, w1t_ref, b1_ref, w2t_ref, b2_ref, hidden_ref, out_ref):
    cd = w1t_ref.dtype                        # matmul operand dtype (bf16 or f32)

    # encoder: (TB, I) @ (I, H) + b1, f32 accumulation
    h = jax.lax.dot_general(
        x_ref[...].astype(cd), w1t_ref[...],              # no-op cast if x already bf16
        dimension_numbers=(((1,), (0,)), ((), ())),
        preferred_element_type=jnp.float32,
    ) + b1_ref[...]
    hidden_ref[...] = h.astype(hidden_ref.dtype)

    # decoder: (TB, H) @ (H, O) + b2, f32 accumulation; LHS comes from the stored tile.
    out = jax.lax.dot_general(
        hidden_ref[...], w2t_ref[...],
        dimension_numbers=(((1,), (0,)), ((), ())),
        preferred_element_type=jnp.float32,
    ) + b2_ref[...]
    out_ref[...] = out.astype(out_ref.dtype)


def _forward_vmem_bytes(tile_b, I, H, O, x_nb, cd_nb, out_nb, single_buffer):
    wbuf = 1 if single_buffer else 2
    return (2 * tile_b * I * x_nb                    # streamed x (double-buffered)
            + wbuf * (I * H + H * O) * cd_nb         # resident weights
            + wbuf * (H + O) * 4                     # biases (f32)
            + 2 * tile_b * H * cd_nb                 # hidden tiles (compute dtype)
            + 2 * tile_b * O * out_nb)               # out tiles


def _pick_tile_b(B, cap, fits):
    """Largest batch tile (multiple of 8, <= cap, within VMEM budget) dividing B."""
    for t in (2048, 1024, 512, 256, 128, 64, 32, 16, 8):
        if t <= cap and t <= B and B % t == 0 and fits(t):
            return t
    return B


@functools.partial(jax.jit, static_argnames=("compute_dtype", "tile_b",
                                              "vmem_limit", "single_buffer"))
def _forward_impl(x, v1, g1, b1, v2, g2, b2, *,
                  compute_dtype, tile_b, vmem_limit, single_buffer):
    B, I = x.shape
    H = v1.shape[0]
    O = v2.shape[0]

    # One-time weight-norm kernels (tiled, transposed + cast in-kernel).
    w1t = _normalize_weight(v1, g1, compute_dtype)        # (I, H)
    w2t = _normalize_weight(v2, g2, compute_dtype)        # (H, O)
    b1r = b1.reshape(1, H).astype(jnp.float32)
    b2r = b2.reshape(1, O).astype(jnp.float32)

    # Constant-index operands stay VMEM-resident; single-buffer them to halve
    # their VMEM footprint (Pallas double-buffers every input by default).
    resident = {"pipeline_mode": pl.Buffered(buffer_count=1)} if single_buffer else {}

    hidden, out = pl.pallas_call(
        _forward_kernel,
        out_shape=(jax.ShapeDtypeStruct((B, H), compute_dtype),   # bf16 hidden writeback
                   jax.ShapeDtypeStruct((B, O), x.dtype)),
        grid=(pl.cdiv(B, tile_b),),
        in_specs=[
            pl.BlockSpec((tile_b, I), lambda i: (i, 0)),              # x: streamed
            pl.BlockSpec((I, H), lambda i: (0, 0), **resident),       # W1^T: resident
            pl.BlockSpec((1, H), lambda i: (0, 0), **resident),       # b1
            pl.BlockSpec((H, O), lambda i: (0, 0), **resident),       # W2^T: resident
            pl.BlockSpec((1, O), lambda i: (0, 0), **resident),       # b2
        ],
        out_specs=(
            pl.BlockSpec((tile_b, H), lambda i: (i, 0)),              # hidden
            pl.BlockSpec((tile_b, O), lambda i: (i, 0)),              # out
        ),
        compiler_params=pltpu.CompilerParams(
            dimension_semantics=("parallel",),          # shard batch across TCs (v7x)
            vmem_limit_bytes=vmem_limit,
        ),
    )(x, w1t, b1r, w2t, b2r)
    # TODO(synk): if the weights themselves exceed the VMEM budget (per-core on v7x),
    # add a K grid axis with a VMEM accumulator (pl.when init/finalize) instead of
    # keeping the weights resident.
    return hidden, out


def netnormweights_forward(x, v1, g1, b1, v2, g2, b2, *,
                           compute_dtype=jnp.bfloat16, tile_b=None):
    """Returns (hidden, out); `hidden` mirrors representations['hidden'] in PyTorch."""
    B, I = x.shape
    H = v1.shape[0]
    O = v2.shape[0]

    capacity = _vmem_capacity_bytes()
    # Generation-aware ceilings: ~40 MiB of v7x's 64 MiB/TC, ~80 MiB of v5e/v6e's 128 MiB.
    vmem_ceiling = min(96 * _MIB, capacity * 5 // 8)
    tile_cap = 1024 if capacity >= 96 * _MIB else 512     # big tiles on v5e/v6e only

    x_nb = jnp.dtype(x.dtype).itemsize
    cd_nb = jnp.dtype(compute_dtype).itemsize
    out_nb = x_nb
    budget = vmem_ceiling - 4 * _MIB
    fits = lambda t: _forward_vmem_bytes(t, I, H, O, x_nb, cd_nb, out_nb, True) <= budget
    if tile_b is None:
        tile_b = _pick_tile_b(B, tile_cap, fits)

    # vmem limit = real footprint (double-buffer worst case) + slack, clamped per-gen.
    footprint = _forward_vmem_bytes(tile_b, I, H, O, x_nb, cd_nb, out_nb, False)
    vmem_limit = int(min(vmem_ceiling, max(32 * _MIB, footprint * 5 // 4 + 2 * _MIB)))

    kwargs = dict(compute_dtype=compute_dtype, tile_b=int(tile_b), vmem_limit=vmem_limit)
    try:
        return _forward_impl(x, v1, g1, b1, v2, g2, b2, single_buffer=True, **kwargs)
    except Exception:
        # jax versions without BlockSpec(pipeline_mode=...): resident weights stay
        # double-buffered (costs VMEM only, not correctness).
        return _forward_impl(x, v1, g1, b1, v2, g2, b2, single_buffer=False, **kwargs)


def _reference(x, v1, g1, b1, v2, g2, b2):
    w1 = g1 * v1 / jnp.linalg.norm(v1, axis=1, keepdims=True)
    hidden = x @ w1.T + b1.reshape(1, -1)
    w2 = g2 * v2 / jnp.linalg.norm(v2, axis=1, keepdims=True)
    out = hidden @ w2.T + b2.reshape(1, -1)
    return hidden, out


if __name__ == "__main__":
    # Small, lane-aligned shapes (features multiples of 128, batch multiple of 8).
    # H=256 fills the 256-wide v6e/v7x MXU; I=O=128 kept small for the demo.
    B, INPUT, HIDDEN, OUTPUT = 256, 128, 256, 128

    key = jax.random.PRNGKey(0)
    k1, k2, k3, k4 = jax.random.split(key, 4)

    x = jax.random.normal(k1, (B, INPUT), dtype=jnp.float32)

    # encoder params (weight_norm init: g = per-row norm of v); bias (H,) like nn.Linear
    v1 = jax.random.normal(k2, (HIDDEN, INPUT), dtype=jnp.float32) * 0.1
    g1 = jnp.linalg.norm(v1, axis=1, keepdims=True)        # (HIDDEN, 1)
    b1 = jnp.full((HIDDEN,), 0.01, dtype=jnp.float32)

    # decoder params
    v2 = jax.random.normal(k3, (OUTPUT, HIDDEN), dtype=jnp.float32) * 0.1
    g2 = jnp.linalg.norm(v2, axis=1, keepdims=True)        # (OUTPUT, 1)
    b2 = (jax.random.uniform(k4, (OUTPUT,), dtype=jnp.float32) - 0.5) * 0.1

    ref_hidden, ref_out = _reference(x, v1, g1, b1, v2, g2, b2)

    # 1) f32 operands: tight correctness check (tile_b auto-picked -> single grid step).
    hidden32, out32 = netnormweights_forward(
        x, v1, g1, b1, v2, g2, b2, compute_dtype=jnp.float32)
    jax.block_until_ready(out32)
    assert jnp.allclose(hidden32, ref_hidden, atol=1e-4, rtol=1e-4), "f32 hidden mismatch"
    assert jnp.allclose(out32, ref_out, atol=1e-4, rtol=1e-4), "f32 output mismatch"

    # 2) bf16 operands + f32 accumulation (fast MXU path, bf16 hidden writeback).
    hidden16, out16 = netnormweights_forward(
        x, v1, g1, b1, v2, g2, b2, compute_dtype=jnp.bfloat16)
    jax.block_until_ready(out16)
    assert jnp.allclose(hidden16.astype(jnp.float32), ref_hidden,
                        atol=5e-2, rtol=5e-2), "bf16 hidden mismatch"
    assert jnp.allclose(out16, ref_out, atol=5e-2, rtol=5e-2), "bf16 output mismatch"

    print("KERNEL_OK")
</pallas_src>

<mosaic_0001>
module attributes {stable_mosaic.version = 11 : i64} {
  func.func @_weightnorm_kernel(%arg0: i32, %arg1: memref<256x128xf32, #tpu.memory_space<vmem>>, %arg2: memref<256x1xf32, #tpu.memory_space<vmem>>, %arg3: memref<128x256xf32, #tpu.memory_space<vmem>>) attributes {dimension_semantics = [#tpu.dimension_semantics<parallel>], iteration_bounds = array<i64: 1>, scalar_prefetch = 0 : i64, scratch_operands = 0 : i64, tpu.core_type = #tpu.core_type<tc>, window_params = [{transform_indices = @transform_0, window_bounds = array<i64: 256, 128>}, {transform_indices = @transform_1, window_bounds = array<i64: 256, 1>}, {transform_indices = @transform_2, window_bounds = array<i64: 128, 256>}]} {
    %c0 = arith.constant 0 : index
    %c0_0 = arith.constant 0 : index
    %0 = vector.load %arg1[%c0, %c0_0] : memref<256x128xf32, #tpu.memory_space<vmem>>, vector<256x128xf32>
    %1 = arith.mulf %0, %0 : vector<256x128xf32>
    %cst = arith.constant dense<0.000000e+00> : vector<256xf32>
    %2 = vector.multi_reduction <add>, %1, %cst [1] : vector<256x128xf32> to vector<256xf32>
    %3 = vector.shape_cast %2 : vector<256xf32> to vector<256x1xf32>
    %4 = math.rsqrt %3 : vector<256x1xf32>
    %c0_1 = arith.constant 0 : index
    %c0_2 = arith.constant 0 : index
    %5 = vector.load %arg2[%c0_1, %c0_2] : memref<256x1xf32, #tpu.memory_space<vmem>>, vector<256x1xf32>
    %6 = arith.mulf %5, %4 : vector<256x1xf32>
    %7 = vector.broadcast %6 : vector<256x1xf32> to vector<256x128xf32>
    %8 = arith.mulf %0, %7 : vector<256x128xf32>
    %9 = tpu.transpose %8, [1, 0] : vector<256x128xf32> -> vector<128x256xf32>
    %c0_3 = arith.constant 0 : index
    %c0_4 = arith.constant 0 : index
    %10 = vector.load %arg3[%c0_3, %c0_4] : memref<128x256xf32, #tpu.memory_space<vmem>>, vector<128x256xf32>
    tpu.vector_store %arg3[%c0_3, %c0_4], %9 {strides = array<i32>} : memref<128x256xf32, #tpu.memory_space<vmem>>, vector<128x256xf32>,
    return
  }
  func.func @transform_0(%arg0: i32) -> (i32, i32) {
    %c0_i32 = arith.constant 0 : i32
    %c0_i32_0 = arith.constant 0 : i32
    return %arg0, %c0_i32 : i32, i32
  }
  func.func @transform_1(%arg0: i32) -> (i32, i32) {
    %c0_i32 = arith.constant 0 : i32
    %c0_i32_0 = arith.constant 0 : i32
    return %arg0, %c0_i32 : i32, i32
  }
  func.func @transform_2(%arg0: i32) -> (i32, i32) {
    %c0_i32 = arith.constant 0 : i32
    %c0_i32_0 = arith.constant 0 : i32
    return %c0_i32, %arg0 : i32, i32
  }
}

module attributes {stable_mosaic.version = 11 : i64} {
  func.func @_weightnorm_kernel(%arg0: i32, %arg1: memref<128x256xf32, #tpu.memory_space<vmem>>, %arg2: memref<128x1xf32, #tpu.memory_space<vmem>>, %arg3: memref<256x128xf32, #tpu.memory_space<vmem>>) attributes {dimension_semantics = [#tpu.dimension_semantics<parallel>], iteration_bounds = array<i64: 1>, scalar_prefetch = 0 : i64, scratch_operands = 0 : i64, tpu.core_type = #tpu.core_type<tc>, window_params = [{transform_indices = @transform_0, window_bounds = array<i64: 128, 256>}, {transform_indices = @transform_1, window_bounds = array<i64: 128, 1>}, {transform_indices = @transform_2, window_bounds = array<i64: 256, 128>}]} {
    %c0 = arith.constant 0 : index
    %c0_0 = arith.constant 0 : index
    %0 = vector.load %arg1[%c0, %c0_0] : memref<128x256xf32, #tpu.memory_space<vmem>>, vector<128x256xf32>
    %1 = arith.mulf %0, %0 : vector<128x256xf32>
    %cst = arith.constant dense<0.000000e+00> : vector<128xf32>
    %2 = vector.multi_reduction <add>, %1, %cst [1] : vector<128x256xf32> to vector<128xf32>
    %3 = vector.shape_cast %2 : vector<128xf32> to vector<128x1xf32>
    %4 = math.rsqrt %3 : vector<128x1xf32>
    %c0_1 = arith.constant 0 : index
    %c0_2 = arith.constant 0 : index
    %5 = vector.load %arg2[%c0_1, %c0_2] : memref<128x1xf32, #tpu.memory_space<vmem>>, vector<128x1xf32>
    %6 = arith.mulf %5, %4 : vector<128x1xf32>
    %7 = vector.broadcast %6 : vector<128x1xf32> to vector<128x256xf32>
    %8 = arith.mulf %0, %7 : vector<128x256xf32>
    %9 = tpu.transpose %8, [1, 0] : vector<128x256xf32> -> vector<256x128xf32>
    %c0_3 = arith.constant 0 : index
    %c0_4 = arith.constant 0 : index
    %10 = vector.load %arg3[%c0_3, %c0_4] : memref<256x128xf32, #tpu.memory_space<vmem>>, vector<256x128xf32>
    tpu.vector_store %arg3[%c0_3, %c0_4], %9 {strides = array<i32>} : memref<256x128xf32, #tpu.memory_space<vmem>>, vector<256x128xf32>,
    return
  }
  func.func @transform_0(%arg0: i32) -> (i32, i32) {
    %c0_i32 = arith.constant 0 : i32
    %c0_i32_0 = arith.constant 0 : i32
    return %arg0, %c0_i32 : i32, i32
  }
  func.func @transform_1(%arg0: i32) -> (i32, i32) {
    %c0_i32 = arith.constant 0 : i32
    %c0_i32_0 = arith.constant 0 : i32
    return %arg0, %c0_i32 : i32, i32
  }
  func.func @transform_2(%arg0: i32) -> (i32, i32) {
    %c0_i32 = arith.constant 0 : i32
    %c0_i32_0 = arith.constant 0 : i32
    return %c0_i32, %arg0 : i32, i32
  }
}

module attributes {stable_mosaic.version = 11 : i64} {
  func.func @_forward_kernel(%arg0: i32, %arg1: memref<256x128xf32, #tpu.memory_space<vmem>>, %arg2: memref<128x256xf32, #tpu.memory_space<vmem>>, %arg3: memref<1x256xf32, #tpu.memory_space<vmem>>, %arg4: memref<256x128xf32, #tpu.memory_space<vmem>>, %arg5: memref<1x128xf32, #tpu.memory_space<vmem>>, %arg6: memref<256x256xf32, #tpu.memory_space<vmem>>, %arg7: memref<256x128xf32, #tpu.memory_space<vmem>>) attributes {dimension_semantics = [#tpu.dimension_semantics<parallel>], iteration_bounds = array<i64: 1>, scalar_prefetch = 0 : i64, scratch_operands = 0 : i64, tpu.core_type = #tpu.core_type<tc>, window_params = [{transform_indices = @transform_0, window_bounds = array<i64: 256, 128>}, {pipeline_mode = #tpu.pipeline_mode<synchronous>, transform_indices = @transform_1, window_bounds = array<i64: 128, 256>}, {pipeline_mode = #tpu.pipeline_mode<synchronous>, transform_indices = @transform_2, window_bounds = array<i64: 1, 256>}, {pipeline_mode = #tpu.pipeline_mode<synchronous>, transform_indices = @transform_3, window_bounds = array<i64: 256, 128>}, {pipeline_mode = #tpu.pipeline_mode<synchronous>, transform_indices = @transform_4, window_bounds = array<i64: 1, 128>}, {transform_indices = @transform_5, window_bounds = array<i64: 256, 256>}, {transform_indices = @transform_6, window_bounds = array<i64: 256, 128>}]} {
    %c0 = arith.constant 0 : index
    %c0_0 = arith.constant 0 : index
    %0 = vector.load %arg1[%c0, %c0_0] : memref<256x128xf32, #tpu.memory_space<vmem>>, vector<256x128xf32>
    %c0_1 = arith.constant 0 : index
    %c0_2 = arith.constant 0 : index
    %1 = vector.load %arg2[%c0_1, %c0_2] : memref<128x256xf32, #tpu.memory_space<vmem>>, vector<128x256xf32>
    %cst = arith.constant dense<0.000000e+00> : vector<256x256xf32>
    %2 = tpu.matmul %0, %1, %cst {dimension_numbers = #tpu.dot_dimension_numbers<[1], [0], [0], [1], [0, 0, 1, 1], [], []>} : vector<256x128xf32>, vector<128x256xf32>, vector<256x256xf32> -> vector<256x256xf32>
    %c0_3 = arith.constant 0 : index
    %c0_4 = arith.constant 0 : index
    %3 = vector.load %arg3[%c0_3, %c0_4] : memref<1x256xf32, #tpu.memory_space<vmem>>, vector<1x256xf32>
    %4 = vector.broadcast %3 : vector<1x256xf32> to vector<256x256xf32>
    %5 = arith.addf %2, %4 : vector<256x256xf32>
    %c0_5 = arith.constant 0 : index
    %c0_6 = arith.constant 0 : index
    %6 = vector.load %arg6[%c0_5, %c0_6] : memref<256x256xf32, #tpu.memory_space<vmem>>, vector<256x256xf32>
    tpu.vector_store %arg6[%c0_5, %c0_6], %5 {strides = array<i32>} : memref<256x256xf32, #tpu.memory_space<vmem>>, vector<256x256xf32>,
    %c0_7 = arith.constant 0 : index
    %c0_8 = arith.constant 0 : index
    %7 = vector.load %arg6[%c0_7, %c0_8] : memref<256x256xf32, #tpu.memory_space<vmem>>, vector<256x256xf32>
    %c0_9 = arith.constant 0 : index
    %c0_10 = arith.constant 0 : index
    %8 = vector.load %arg4[%c0_9, %c0_10] : memref<256x128xf32, #tpu.memory_space<vmem>>, vector<256x128xf32>
    %cst_11 = arith.constant dense<0.000000e+00> : vector<256x128xf32>
    %9 = tpu.matmul %7, %8, %cst_11 {dimension_numbers = #tpu.dot_dimension_numbers<[1], [0], [0], [1], [0, 0, 1, 1], [], []>} : vector<256x256xf32>, vector<256x128xf32>, vector<256x128xf32> -> vector<256x128xf32>
    %c0_12 = arith.constant 0 : index
    %c0_13 = arith.constant 0 : index
    %10 = vector.load %arg5[%c0_12, %c0_13] : memref<1x128xf32, #tpu.memory_space<vmem>>, vector<1x128xf32>
    %11 = vector.broadcast %10 : vector<1x128xf32> to vector<256x128xf32>
    %12 = arith.addf %9, %11 : vector<256x128xf32>
    %c0_14 = arith.constant 0 : index
    %c0_15 = arith.constant 0 : index
    %13 = vector.load %arg7[%c0_14, %c0_15] : memref<256x128xf32, #tpu.memory_space<vmem>>, vector<256x128xf32>
    tpu.vector_store %arg7[%c0_14, %c0_15], %12 {strides = array<i32>} : memref<256x128xf32, #tpu.memory_space<vmem>>, vector<256x128xf32>,
    return
  }
  func.func @transform_0(%arg0: i32) -> (i32, i32) {
    %c0_i32 = arith.constant 0 : i32
    %c0_i32_0 = arith.constant 0 : i32
    return %arg0, %c0_i32 : i32, i32
  }
  func.func @transform_1(%arg0: i32) -> (i32, i32) {
    %c0_i32 = arith.constant 0 : i32
    %c0_i32_0 = arith.constant 0 : i32
    %c0_i32_1 = arith.constant 0 : i32
    return %c0_i32, %c0_i32_0 : i32, i32
  }
  func.func @transform_2(%arg0: i32) -> (i32, i32) {
    %c0_i32 = arith.constant 0 : i32
    %c0_i32_0 = arith.constant 0 : i32
    %c0_i32_1 = arith.constant 0 : i32
    return %c0_i32, %c0_i32_0 : i32, i32
  }
  func.func @transform_3(%arg0: i32) -> (i32, i32) {
    %c0_i32 = arith.constant 0 : i32
    %c0_i32_0 = arith.constant 0 : i32
    %c0_i32_1 = arith.constant 0 : i32
    return %c0_i32, %c0_i32_0 : i32, i32
  }
  func.func @transform_4(%arg0: i32) -> (i32, i32) {
    %c0_i32 = arith.constant 0 : i32
    %c0_i32_0 = arith.constant 0 : i32
    %c0_i32_1 = arith.constant 0 : i32
    return %c0_i32, %c0_i32_0 : i32, i32
  }
  func.func @transform_5(%arg0: i32) -> (i32, i32) {
    %c0_i32 = arith.constant 0 : i32
    %c0_i32_0 = arith.constant 0 : i32
    return %arg0, %c0_i32 : i32, i32
  }
  func.func @transform_6(%arg0: i32) -> (i32, i32) {
    %c0_i32 = arith.constant 0 : i32
    %c0_i32_0 = arith.constant 0 : i32
    return %arg0, %c0_i32 : i32, i32
  }
}

module attributes {stable_mosaic.version = 11 : i64} {
  func.func @_weightnorm_kernel(%arg0: i32, %arg1: memref<128x256xf32, #tpu.memory_space<vmem>>, %arg2: memref<128x1xf32, #tpu.memory_space<vmem>>, %arg3: memref<256x128xf32, #tpu.memory_space<vmem>>) attributes {dimension_semantics = [#tpu.dimension_semantics<parallel>], iteration_bounds = array<i64: 1>, scalar_prefetch = 0 : i64, scratch_operands = 0 : i64, tpu.core_type = #tpu.core_type<tc>, window_params = [{transform_indices = @transform_0, window_bounds = array<i64: 128, 256>}, {transform_indices = @transform_1, window_bounds = array<i64: 128, 1>}, {transform_indices = @transform_2, window_bounds = array<i64: 256, 128>}]} {
    %c0 = arith.constant 0 : index
    %c0_0 = arith.constant 0 : index
    %0 = vector.load %arg1[%c0, %c0_0] : memref<128x256xf32, #tpu.memory_space<vmem>>, vector<128x256xf32>
    %1 = arith.mulf %0, %0 : vector<128x256xf32>
    %cst = arith.constant dense<0.000000e+00> : vector<128xf32>
    %2 = vector.multi_reduction <add>, %1, %cst [1] : vector<128x256xf32> to vector<128xf32>
    %3 = vector.shape_cast %2 : vector<128xf32> to vector<128x1xf32>
    %4 = math.rsqrt %3 : vector<128x1xf32>
    %c0_1 = arith.constant 0 : index
    %c0_2 = arith.constant 0 : index
    %5 = vector.load %arg2[%c0_1, %c0_2] : memref<128x1xf32, #tpu.memory_space<vmem>>, vector<128x1xf32>
    %6 = arith.mulf %5, %4 : vector<128x1xf32>
    %7 = vector.broadcast %6 : vector<128x1xf32> to vector<128x256xf32>
    %8 = arith.mulf %0, %7 : vector<128x256xf32>
    %9 = tpu.transpose %8, [1, 0] : vector<128x256xf32> -> vector<256x128xf32>
    %c0_3 = arith.constant 0 : index
    %c0_4 = arith.constant 0 : index
    %10 = vector.load %arg3[%c0_3, %c0_4] : memref<256x128xf32, #tpu.memory_space<vmem>>, vector<256x128xf32>
    tpu.vector_store %arg3[%c0_3, %c0_4], %9 {strides = array<i32>} : memref<256x128xf32, #tpu.memory_space<vmem>>, vector<256x128xf32>,
    return
  }
  func.func @transform_0(%arg0: i32) -> (i32, i32) {
    %c0_i32 = arith.constant 0 : i32
    %c0_i32_0 = arith.constant 0 : i32
    return %arg0, %c0_i32 : i32, i32
  }
  func.func @transform_1(%arg0: i32) -> (i32, i32) {
    %c0_i32 = arith.constant 0 : i32
    %c0_i32_0 = arith.constant 0 : i32
    return %arg0, %c0_i32 : i32, i32
  }
  func.func @transform_2(%arg0: i32) -> (i32, i32) {
    %c0_i32 = arith.constant 0 : i32
    %c0_i32_0 = arith.constant 0 : i32
    return %c0_i32, %arg0 : i32, i32
  }
}

module attributes {stable_mosaic.version = 11 : i64} {
  func.func @_forward_kernel(%arg0: i32, %arg1: memref<256x128xf32, #tpu.memory_space<vmem>>, %arg2: memref<128x256xf32, #tpu.memory_space<vmem>>, %arg3: memref<1x256xf32, #tpu.memory_space<vmem>>, %arg4: memref<256x128xf32, #tpu.memory_space<vmem>>, %arg5: memref<1x128xf32, #tpu.memory_space<vmem>>, %arg6: memref<256x256xf32, #tpu.memory_space<vmem>>, %arg7: memref<256x128xf32, #tpu.memory_space<vmem>>) attributes {dimension_semantics = [#tpu.dimension_semantics<parallel>], iteration_bounds = array<i64: 1>, scalar_prefetch = 0 : i64, scratch_operands = 0 : i64, tpu.core_type = #tpu.core_type<tc>, window_params = [{transform_indices = @transform_0, window_bounds = array<i64: 256, 128>}, {pipeline_mode = #tpu.pipeline_mode<synchronous>, transform_indices = @transform_1, window_bounds = array<i64: 128, 256>}, {pipeline_mode = #tpu.pipeline_mode<synchronous>, transform_indices = @transform_2, window_bounds = array<i64: 1, 256>}, {pipeline_mode = #tpu.pipeline_mode<synchronous>, transform_indices = @transform_3, window_bounds = array<i64: 256, 128>}, {pipeline_mode = #tpu.pipeline_mode<synchronous>, transform_indices = @transform_4, window_bounds = array<i64: 1, 128>}, {transform_indices = @transform_5, window_bounds = array<i64: 256, 256>}, {transform_indices = @transform_6, window_bounds = array<i64: 256, 128>}]} {
    %c0 = arith.constant 0 : index
    %c0_0 = arith.constant 0 : index
    %0 = vector.load %arg1[%c0, %c0_0] : memref<256x128xf32, #tpu.memory_space<vmem>>, vector<256x128xf32>
    %c0_1 = arith.constant 0 : index
    %c0_2 = arith.constant 0 : index
    %1 = vector.load %arg2[%c0_1, %c0_2] : memref<128x256xf32, #tpu.memory_space<vmem>>, vector<128x256xf32>
    %cst = arith.constant dense<0.000000e+00> : vector<256x256xf32>
    %2 = tpu.matmul %0, %1, %cst {dimension_numbers = #tpu.dot_dimension_numbers<[1], [0], [0], [1], [0, 0, 1, 1], [], []>} : vector<256x128xf32>, vector<128x256xf32>, vector<256x256xf32> -> vector<256x256xf32>
    %c0_3 = arith.constant 0 : index
    %c0_4 = arith.constant 0 : index
    %3 = vector.load %arg3[%c0_3, %c0_4] : memref<1x256xf32, #tpu.memory_space<vmem>>, vector<1x256xf32>
    %4 = vector.broadcast %3 : vector<1x256xf32> to vector<256x256xf32>
    %5 = arith.addf %2, %4 : vector<256x256xf32>
    %c0_5 = arith.constant 0 : index
    %c0_6 = arith.constant 0 : index
    %6 = vector.load %arg6[%c0_5, %c0_6] : memref<256x256xf32, #tpu.memory_space<vmem>>, vector<256x256xf32>
    tpu.vector_store %arg6[%c0_5, %c0_6], %5 {strides = array<i32>} : memref<256x256xf32, #tpu.memory_space<vmem>>, vector<256x256xf32>,
    %c0_7 = arith.constant 0 : index
    %c0_8 = arith.constant 0 : index
    %7 = vector.load %arg6[%c0_7, %c0_8] : memref<256x256xf32, #tpu.memory_space<vmem>>, vector<256x256xf32>
    %c0_9 = arith.constant 0 : index
    %c0_10 = arith.constant 0 : index
    %8 = vector.load %arg4[%c0_9, %c0_10] : memref<256x128xf32, #tpu.memory_space<vmem>>, vector<256x128xf32>
    %cst_11 = arith.constant dense<0.000000e+00> : vector<256x128xf32>
    %9 = tpu.matmul %7, %8, %cst_11 {dimension_numbers = #tpu.dot_dimension_numbers<[1], [0], [0], [1], [0, 0, 1, 1], [], []>} : vector<256x256xf32>, vector<256x128xf32>, vector<256x128xf32> -> vector<256x128xf32>
    %c0_12 = arith.constant 0 : index
    %c0_13 = arith.constant 0 : index
    %10 = vector.load %arg5[%c0_12, %c0_13] : memref<1x128xf32, #tpu.memory_space<vmem>>, vector<1x128xf32>
    %11 = vector.broadcast %10 : vector<1x128xf32> to vector<256x128xf32>
    %12 = arith.addf %9, %11 : vector<256x128xf32>
    %c0_14 = arith.constant 0 : index
    %c0_15 = arith.constant 0 : index
    %13 = vector.load %arg7[%c0_14, %c0_15] : memref<256x128xf32, #tpu.memory_space<vmem>>, vector<256x128xf32>
    tpu.vector_store %arg7[%c0_14, %c0_15], %12 {strides = array<i32>} : memref<256x128xf32, #tpu.memory_space<vmem>>, vector<256x128xf32>,
    return
  }
  func.func @transform_0(%arg0: i32) -> (i32, i32) {
    %c0_i32 = arith.constant 0 : i32
    %c0_i32_0 = arith.constant 0 : i32
    return %arg0, %c0_i32 : i32, i32
  }
  func.func @transform_1(%arg0: i32) -> (i32, i32) {
    %c0_i32 = arith.constant 0 : i32
    %c0_i32_0 = arith.constant 0 : i32
    %c0_i32_1 = arith.constant 0 : i32
    return %c0_i32, %c0_i32_0 : i32, i32
  }
  func.func @transform_2(%arg0: i32) -> (i32, i32) {
    %c0_i32 = arith.constant 0 : i32
    %c0_i32_0 = arith.constant 0 : i32
    %c0_i32_1 = arith.constant 0 : i32
    return %c0_i32, %c0_i32_0 : i32, i32
  }
  func.func @transform_3(%arg0: i32) -> (i32, i32) {
    %c0_i32 = arith.constant 0 : i32
    %c0_i32_0 = arith.constant 0 : i32
    %c0_i32_1 = arith.constant 0 : i32
    return %c0_i32, %c0_i32_0 : i32, i32
  }
  func.func @transform_4(%arg0: i32) -> (i32, i32) {
    %c0_i32 = arith.constant 0 : i32
    %c0_i32_0 = arith.constant 0 : i32
    %c0_i32_1 = arith.constant 0 : i32
    return %c0_i32, %c0_i32_0 : i32, i32
  }
  func.func @transform_5(%arg0: i32) -> (i32, i32) {
    %c0_i32 = arith.constant 0 : i32
    %c0_i32_0 = arith.constant 0 : i32
    return %arg0, %c0_i32 : i32, i32
  }
  func.func @transform_6(%arg0: i32) -> (i32, i32) {
    %c0_i32 = arith.constant 0 : i32
    %c0_i32_0 = arith.constant 0 : i32
    return %arg0, %c0_i32 : i32, i32
  }
}

module attributes {stable_mosaic.version = 11 : i64} {
  func.func @_weightnorm_kernel(%arg0: i32, %arg1: memref<256x128xf32, #tpu.memory_space<vmem>>, %arg2: memref<256x1xf32, #tpu.memory_space<vmem>>, %arg3: memref<128x256xf32, #tpu.memory_space<vmem>>) attributes {dimension_semantics = [#tpu.dimension_semantics<parallel>], iteration_bounds = array<i64: 1>, scalar_prefetch = 0 : i64, scratch_operands = 0 : i64, tpu.core_type = #tpu.core_type<tc>, window_params = [{transform_indices = @transform_0, window_bounds = array<i64: 256, 128>}, {transform_indices = @transform_1, window_bounds = array<i64: 256, 1>}, {transform_indices = @transform_2, window_bounds = array<i64: 128, 256>}]} {
    %c0 = arith.constant 0 : index
    %c0_0 = arith.constant 0 : index
    %0 = vector.load %arg1[%c0, %c0_0] : memref<256x128xf32, #tpu.memory_space<vmem>>, vector<256x128xf32>
    %1 = arith.mulf %0, %0 : vector<256x128xf32>
    %cst = arith.constant dense<0.000000e+00> : vector<256xf32>
    %2 = vector.multi_reduction <add>, %1, %cst [1] : vector<256x128xf32> to vector<256xf32>
    %3 = vector.shape_cast %2 : vector<256xf32> to vector<256x1xf32>
    %4 = math.rsqrt %3 : vector<256x1xf32>
    %c0_1 = arith.constant 0 : index
    %c0_2 = arith.constant 0 : index
    %5 = vector.load %arg2[%c0_1, %c0_2] : memref<256x1xf32, #tpu.memory_space<vmem>>, vector<256x1xf32>
    %6 = arith.mulf %5, %4 : vector<256x1xf32>
    %7 = vector.broadcast %6 : vector<256x1xf32> to vector<256x128xf32>
    %8 = arith.mulf %0, %7 : vector<256x128xf32>
    %9 = tpu.transpose %8, [1, 0] : vector<256x128xf32> -> vector<128x256xf32>
    %c0_3 = arith.constant 0 : index
    %c0_4 = arith.constant 0 : index
    %10 = vector.load %arg3[%c0_3, %c0_4] : memref<128x256xf32, #tpu.memory_space<vmem>>, vector<128x256xf32>
    tpu.vector_store %arg3[%c0_3, %c0_4], %9 {strides = array<i32>} : memref<128x256xf32, #tpu.memory_space<vmem>>, vector<128x256xf32>,
    return
  }
  func.func @transform_0(%arg0: i32) -> (i32, i32) {
    %c0_i32 = arith.constant 0 : i32
    %c0_i32_0 = arith.constant 0 : i32
    return %arg0, %c0_i32 : i32, i32
  }
  func.func @transform_1(%arg0: i32) -> (i32, i32) {
    %c0_i32 = arith.constant 0 : i32
    %c0_i32_0 = arith.constant 0 : i32
    return %arg0, %c0_i32 : i32, i32
  }
  func.func @transform_2(%arg0: i32) -> (i32, i32) {
    %c0_i32 = arith.constant 0 : i32
    %c0_i32_0 = arith.constant 0 : i32
    return %c0_i32, %arg0 : i32, i32
  }
}

</mosaic_0001>

<bundles_post_ra>
// kernel: _forward_impl.3
= control target key start
LH: loop header
LB: loop body
LE: loop exit
PB: predicated region body
PF: predicated region fallthrough
CT: control target
= control target key end

     0   :  { %v594_v34 = vmov 0   ;;  %s1070_s0 = inlined_call_operand.vmem [shape: f32[256,128], index: 0, kind: input, shape index: {}]   ;;  %s1071_s1 = inlined_call_operand.vmem [shape: f32[256,1], index: 1, kind: input, shape index: {}]   ;;  %s1072_s2 = inlined_call_operand.vmem [shape: f32[128,256], index: 2, kind: output, shape index: {}]  }
   0x1   :  { %v613_v0 = vld [vmem:[%s1070_s0 + $0x10] sm:$0xff]  ;;  %v618_v1 = vld [vmem:[%s1070_s0] sm:$0xff]  ;;  %v623_v2 = vld [vmem:[%s1070_s0 + $0x18] sm:$0xff]  ;;  %528 = vset.pattern.permute.xlu0 %v594_v34  ;;  %529 = vset.pattern.permute.xlu1 %v594_v34 }
   0x2   :  { %v45_v3 = vmul.f32 %v613_v0, %v613_v0  ;;  %v43_v4 = vmul.f32 %v618_v1, %v618_v1  ;;  %v632_v5 = vld [vmem:[%s1070_s0 + $0x8] sm:$0xff]  ;;  %v46_v6 = vmul.f32 %v623_v2, %v623_v2  ;;  %v646_v9 = vld [vmem:[%s1070_s0 + $0x20] sm:$0xff]  ;;  %v655_v12 = vld [vmem:[%s1070_s0 + $0x38] sm:$0xff] }
   0x3   :  { %v44_v7 = vmul.f32 %v632_v5, %v632_v5  ;;  %v641_v8 = vld [vmem:[%s1070_s0 + $0x28] sm:$0xff]  ;;  %v47_v11 = vmul.f32 %v646_v9, %v646_v9  ;;  %v660_v13 = vld [vmem:[%s1070_s0 + $0x30] sm:$0xff]  ;;  %v50_v14 = vmul.f32 %v655_v12, %v655_v12  ;;  %v674_v17 = vld [vmem:[%s1070_s0 + $0x40] sm:$0xff] }
   0x4   :  { %79 = vadd.xlane.f32.xlu1 %v45_v3  ;;  %75 = vadd.xlane.f32.xlu0 %v43_v4  ;;  %v48_v10 = vmul.f32 %v641_v8, %v641_v8  ;;  %v49_v15 = vmul.f32 %v660_v13, %v660_v13  ;;  %v669_v16 = vld [vmem:[%s1070_s0 + $0x48] sm:$0xff]  ;;  %v51_v19 = vmul.f32 %v674_v17, %v674_v17  ;;  %v683_v20 = vld [vmem:[%s1070_s0 + $0x58] sm:$0xff]  ;;  %v688_v21 = vld [vmem:[%s1070_s0 + $0x50] sm:$0xff] }
   0x5   :  { %v52_v18 = vmul.f32 %v669_v16, %v669_v16  ;;  %v54_v22 = vmul.f32 %v683_v20, %v683_v20  ;;  %v53_v23 = vmul.f32 %v688_v21, %v688_v21  ;;  %v697_v24 = vld [vmem:[%s1070_s0 + $0x68] sm:$0xff]  ;;  %v702_v25 = vld [vmem:[%s1070_s0 + $0x60] sm:$0xff]  ;;  %v711_v28 = vld [vmem:[%s1070_s0 + $0x78] sm:$0xff] }
   0x6   :  { %v56_v26 = vmul.f32 %v697_v24, %v697_v24  ;;  %v55_v27 = vmul.f32 %v702_v25, %v702_v25  ;;  %v716_v29 = vld [vmem:[%s1070_s0 + $0x70] sm:$0xff]  ;;  %v58_v30 = vmul.f32 %v711_v28, %v711_v28  ;;  %v725_v32 = vld [vmem:[%s1070_s0 + $0x88] sm:$0xff]  ;;  %v730_v33 = vld [vmem:[%s1070_s0 + $0x80] sm:$0xff] }
   0x7   :  { %v57_v31 = vmul.f32 %v716_v29, %v716_v29  ;;  %v60_v35 = vmul.f32 %v725_v32, %v725_v32  ;;  %v59_v36 = vmul.f32 %v730_v33, %v730_v33  ;;  %v739_v37 = vld [vmem:[%s1070_s0 + $0x98] sm:$0xff]  ;;  %v744_v38 = vld [vmem:[%s1070_s0 + $0x90] sm:$0xff]  ;;  %v753_v41 = vld [vmem:[%s1070_s0 + $0xa8] sm:$0xff] }
   0x8   :  { %81 = vadd.xlane.f32.xlu1 %v46_v6  ;;  %77 = vadd.xlane.f32.xlu0 %v44_v7  ;;  %v62_v39 = vmul.f32 %v739_v37, %v739_v37  ;;  %v61_v40 = vmul.f32 %v744_v38, %v744_v38  ;;  %v758_v42 = vld [vmem:[%s1070_s0 + $0xa0] sm:$0xff]  ;;  %v64_v43 = vmul.f32 %v753_v41, %v753_v41  ;;  %v767_v45 = vld [vmem:[%s1070_s0 + $0xb8] sm:$0xff]  ;;  %v772_v46 = vld [vmem:[%s1070_s0 + $0xb0] sm:$0xff] }
   0x9   :  { %v63_v44 = vmul.f32 %v758_v42, %v758_v42  ;;  %v66_v47 = vmul.f32 %v767_v45, %v767_v45  ;;  %v65_v48 = vmul.f32 %v772_v46, %v772_v46  ;;  %v781_v49 = vld [vmem:[%s1070_s0 + $0xc8] sm:$0xff]  ;;  %v786_v50 = vld [vmem:[%s1070_s0 + $0xc0] sm:$0xff]  ;;  %v795_v53 = vld [vmem:[%s1070_s0 + $0xd8] sm:$0xff] }
   0xa   :  { %v68_v51 = vmul.f32 %v781_v49, %v781_v49  ;;  %v67_v52 = vmul.f32 %v786_v50, %v786_v50  ;;  %v800_v54 = vld [vmem:[%s1070_s0 + $0xd0] sm:$0xff]  ;;  %v70_v55 = vmul.f32 %v795_v53, %v795_v53  ;;  %v809_v57 = vld [vmem:[%s1070_s0 + $0xe0] sm:$0xff]  ;;  %v814_v58 = vld [vmem:[%s1070_s0 + $0xe8] sm:$0xff] }
   0xb   :  { %v69_v56 = vmul.f32 %v800_v54, %v800_v54  ;;  %v71_v59 = vmul.f32 %v809_v57, %v809_v57  ;;  %v72_v60 = vmul.f32 %v814_v58, %v814_v58  ;;  %v823_v61 = vld [vmem:[%s1070_s0 + $0xf0] sm:$0xff]  ;;  %v828_v62 = vld [vmem:[%s1070_s0 + $0xf8] sm:$0xff] }
   0xc   :  { %85 = vadd.xlane.f32.xlu1 %v48_v10  ;;  %83 = vadd.xlane.f32.xlu0 %v47_v11  ;;  %v73_v63 = vmul.f32 %v823_v61, %v823_v61  ;;  %v74_v3 = vmul.f32 %v828_v62, %v828_v62 }
  0x10   :  { %89 = vadd.xlane.f32.xlu1 %v50_v14  ;;  %87 = vadd.xlane.f32.xlu0 %v49_v15 }
  0x14   :  { %93 = vadd.xlane.f32.xlu1 %v52_v18  ;;  %91 = vadd.xlane.f32.xlu0 %v51_v19  ;;  %v171_v19 = vld [vmem:[%s1071_s1] sm:$0xff] }
  0x18   :  { %97 = vadd.xlane.f32.xlu1 %v54_v22  ;;  %95 = vadd.xlane.f32.xlu0 %v53_v23 }
  0x1c   :  { %101 = vadd.xlane.f32.xlu1 %v56_v26  ;;  %99 = vadd.xlane.f32.xlu0 %v55_v27 }
  0x20   :  { %105 = vadd.xlane.f32.xlu1 %v58_v30  ;;  %103 = vadd.xlane.f32.xlu0 %v57_v31  ;;  %v172_v30 = vld [vmem:[%s1071_s1 + $0x8] sm:$0xff] }
  0x24   :  { %109 = vadd.xlane.f32.xlu1 %v60_v35  ;;  %107 = vadd.xlane.f32.xlu0 %v59_v36  ;;  %v173_v35 = vld [vmem:[%s1071_s1 + $0x10] sm:$0xff] }
  0x28   :  { %113 = vadd.xlane.f32.xlu1 %v62_v39  ;;  %111 = vadd.xlane.f32.xlu0 %v61_v40 }
  0x2c   :  { %117 = vadd.xlane.f32.xlu1 %v64_v43  ;;  %115 = vadd.xlane.f32.xlu0 %v63_v44 }
  0x30   :  { %121 = vadd.xlane.f32.xlu1 %v66_v47  ;;  %119 = vadd.xlane.f32.xlu0 %v65_v48  ;;  %v174_v47 = vld [vmem:[%s1071_s1 + $0x18] sm:$0xff] }
  0x34   :  { %125 = vadd.xlane.f32.xlu1 %v68_v51  ;;  %123 = vadd.xlane.f32.xlu0 %v67_v52 }
  0x38   :  { %129 = vadd.xlane.f32.xlu1 %v70_v55  ;;  %127 = vadd.xlane.f32.xlu0 %v69_v56  ;;  %v175_v56 = vld [vmem:[%s1071_s1 + $0x20] sm:$0xff] }
  0x3c   :  { %131 = vadd.xlane.f32.xlu0 %v71_v59  ;;  %133 = vadd.xlane.f32.xlu1 %v72_v60 }
  0x40   :  { %135 = vadd.xlane.f32.xlu0 %v73_v63  ;;  %137 = vadd.xlane.f32.xlu1 %v74_v3  ;;  %v180_v63 = vld [vmem:[%s1071_s1 + $0x48] sm:$0xff] }
  0x8d   :  { %v80_v4 = vpop.xlane.xlu1 %79  ;;  %v76_v6 = vpop.xlane.xlu0 %75 }
  0x8e   :  { %530 = vrsqrt.f32 %v76_v6 }
  0x8f   :  { %532 = vrsqrt.f32 %v80_v4 }
  0x91   :  { %v82_v7 = vpop.xlane.xlu1 %81  ;;  %v78_v10 = vpop.xlane.xlu0 %77 }
  0x92   :  { %534 = vrsqrt.f32 %v78_v10 }
  0x93   :  { %536 = vrsqrt.f32 %v82_v7  ;;  %v176_v7 = vld [vmem:[%s1071_s1 + $0x28] sm:$0xff] }
  0x95   :  { %v86_v11 = vpop.xlane.xlu1 %85  ;;  %v84_v14 = vpop.xlane.xlu0 %83 }
  0x96   :  { %538 = vrsqrt.f32 %v84_v14 }
  0x99   :  { %v90_v15 = vpop.xlane.xlu1 %89  ;;  %v88_v18 = vpop.xlane.xlu0 %87 }
  0x9b   :  { %v531_v22 = vpop.eup %530 }
  0x9c   :  { %v203_v27 = vmul.f32 %v531_v22, %v171_v19  ;;  %v533_v31 = vpop.eup %532 }
  0x9d   :  { %v94_v23 = vpop.xlane.xlu1 %93  ;;  %v92_v26 = vpop.xlane.xlu0 %91  ;;  %v205_v43 = vmul.f32 %v533_v31, %v173_v35 }
  0x9e   :  { %540 = vrsqrt.f32 %v94_v23  ;;  %237 = vperm.xlu0 %528, %v203_v27  }
  0x9f   :  { %542 = vrsqrt.f32 %v86_v11  ;;  %v535_v34 = vpop.eup %534 }
  0xa0   :  { %v204_v40 = vmul.f32 %v535_v34, %v172_v30  ;;  %v537_v44 = vpop.eup %536 }
  0xa1   :  { %v98_v36 = vpop.xlane.xlu1 %97  ;;  %v96_v39 = vpop.xlane.xlu0 %95  ;;  %v206_v52 = vmul.f32 %v537_v44, %v174_v47  ;;  %v188_v47 = vld [vmem:[%s1071_s1 + $0x88] sm:$0xff] }
  0xa2   :  { %544 = vrsqrt.f32 %v98_v36  ;;  %242 = vperm.xlu1 %529, %v204_v40  }
  0xa3   :  { %546 = vrsqrt.f32 %v88_v18  ;;  %v539_v55 = vpop.eup %538 }
  0xa4   :  { %548 = vrsqrt.f32 %v90_v15  ;;  %v207_v4 = vmul.f32 %v539_v55, %v175_v56  ;;  %v182_v15 = vld [vmem:[%s1071_s1 + $0x58] sm:$0xff]  ;;  %v179_v55 = vld [vmem:[%s1071_s1 + $0x40] sm:$0xff] }
  0xa5   :  { %v846_v48 = vpop.xlane.xlu1 %101  ;;  %v848_v51 = vpop.xlane.xlu0 %99  ;;  %550 = vrsqrt.f32 %v92_v26  ;;  %v177_v26 = vld [vmem:[%s1071_s1 + $0x30] sm:$0xff] }
  0xa6   :  { %247 = vperm.xlu1 %529, %v205_v43  }
  0xa9   :  { %v853_v59 = vpop.xlane.xlu1 %105  ;;  %v855_v60 = vpop.xlane.xlu0 %103 }
  0xaa   :  { %252 = vperm.xlu1 %529, %v206_v52  }
  0xab   :  { %v541_v3 = vpop.eup %540 }
  0xac   :  { %v543_v6 = vpop.eup %542  ;;  %v212_v10 = vmul.f32 %v541_v3, %v180_v63 }
  0xad   :  { %v110_v11 = vpop.xlane.xlu1 %109  ;;  %v108_v14 = vpop.xlane.xlu0 %107  ;;  %v208_v19 = vmul.f32 %v543_v6, %v176_v7  ;;  %v190_v7 = vld [vmem:[%s1071_s1 + $0x98] sm:$0xff] }
  0xae   :  { %552 = vrsqrt.f32 %v110_v11  ;;  %282 = vperm.xlu0 %528, %v212_v10   ;;  %257 = vperm.xlu1 %529, %v207_v4   ;;  %v181_v11 = vld [vmem:[%s1071_s1 + $0x50] sm:$0xff] }
  0xaf   :  { %v545_v18 = vpop.eup %544  ;;  %554 = vrsqrt.f32 %v96_v39  ;;  %v178_v39 = vld [vmem:[%s1071_s1 + $0x38] sm:$0xff] }
  0xb0   :  { %v214_v22 = vmul.f32 %v545_v18, %v182_v15  ;;  %v547_v30 = vpop.eup %546 }
  0xb1   :  { %v114_v23 = vpop.xlane.xlu1 %113  ;;  %v112_v27 = vpop.xlane.xlu0 %111  ;;  %v209_v35 = vmul.f32 %v547_v30, %v177_v26  ;;  %v192_v30 = vld [vmem:[%s1071_s1 + $0xa8] sm:$0xff] }
  0xb2   :  { %556 = vrsqrt.f32 %v114_v23  ;;  %292 = vperm.xlu0 %528, %v214_v22   ;;  %262 = vperm.xlu1 %529, %v208_v19   ;;  %v549_v36 = vpop.eup %548  ;;  %v187_v19 = vld [vmem:[%s1071_s1 + $0x80] sm:$0xff] }
  0xb3   :  { %558 = vrsqrt.f32 %v108_v14  ;;  %v210_v44 = vmul.f32 %v549_v36, %v178_v39  ;;  %v551_v52 = vpop.eup %550  ;;  %v189_v36 = vld [vmem:[%s1071_s1 + $0x90] sm:$0xff] }
  0xb4   :  { %v211_v6 = vmul.f32 %v551_v52, %v179_v55 }
  0xb5   :  { %v118_v31 = vpop.xlane.xlu1 %117  ;;  %v116_v34 = vpop.xlane.xlu0 %115 }
  0xb6   :  { %560 = vrsqrt.f32 %v118_v31  ;;  %267 = vperm.xlu1 %529, %v209_v35  }
  0xb7   :  { %562 = vrsqrt.f32 %v112_v27 }
  0xb9   :  { %v122_v40 = vpop.xlane.xlu1 %121  ;;  %v120_v43 = vpop.xlane.xlu0 %119 }
  0xba   :  { %564 = vrsqrt.f32 %v122_v40  ;;  %272 = vperm.xlu1 %529, %v210_v44  }
  0xbb   :  { %v553_v56 = vpop.eup %552  ;;  %566 = vrsqrt.f32 %v116_v34 }
  0xbc   :  { %v220_v63 = vmul.f32 %v553_v56, %v188_v47  ;;  %v555_v10 = vpop.eup %554  ;;  %v191_v56 = vld [vmem:[%s1071_s1 + $0xa0] sm:$0xff] }
  0xbd   :  { %v126_v3 = vpop.xlane.xlu1 %125  ;;  %v124_v4 = vpop.xlane.xlu0 %123  ;;  %v213_v27 = vmul.f32 %v555_v10, %v181_v11 }
  0xbe   :  { %568 = vrsqrt.f32 %v126_v3  ;;  %322 = vperm.xlu0 %528, %v220_v63   ;;  %277 = vperm.xlu1 %529, %v211_v6   ;;  %v196_v3 = vld [vmem:[%s1071_s1 + $0xc8] sm:$0xff] }
  0xbf   :  { %v557_v14 = vpop.eup %556  ;;  %570 = vrsqrt.f32 %v120_v43  ;;  %v194_v43 = vld [vmem:[%s1071_s1 + $0xb8] sm:$0xff] }
  0xc0   :  { %v559_v15 = vpop.eup %558  ;;  %v222_v18 = vmul.f32 %v557_v14, %v190_v7  ;;  %v193_v14 = vld [vmem:[%s1071_s1 + $0xb0] sm:$0xff] }
  0xc1   :  { %v130_v22 = vpop.xlane.xlu1 %129  ;;  %v128_v23 = vpop.xlane.xlu0 %127  ;;  %v219_v31 = vmul.f32 %v559_v15, %v187_v19  ;;  %v198_v15 = vld [vmem:[%s1071_s1 + $0xd8] sm:$0xff] }
  0xc2   :  { %572 = vrsqrt.f32 %v130_v22  ;;  %332 = vperm.xlu0 %528, %v222_v18   ;;  %287 = vperm.xlu1 %529, %v213_v27   ;;  %v195_v27 = vld [vmem:[%s1071_s1 + $0xc0] sm:$0xff] }
  0xc3   :  { %v561_v26 = vpop.eup %560  ;;  %574 = vrsqrt.f32 %v124_v4 }
  0xc4   :  { %v563_v34 = vpop.eup %562  ;;  %v224_v35 = vmul.f32 %v561_v26, %v192_v30  ;;  %576 = vrsqrt.f32 %v128_v23 }
  0xc5   :  { %v132_v39 = vpop.xlane.xlu0 %131  ;;  %v134_v40 = vpop.xlane.xlu1 %133  ;;  %v221_v47 = vmul.f32 %v563_v34, %v189_v36  ;;  %v200_v34 = vld [vmem:[%s1071_s1 + $0xe8] sm:$0xff] }
  0xc6   :  { %578 = vrsqrt.f32 %v132_v39  ;;  %342 = vperm.xlu0 %528, %v224_v35   ;;  %317 = vperm.xlu1 %529, %v219_v31   ;;  %v197_v39 = vld [vmem:[%s1071_s1 + $0xd0] sm:$0xff] }
  0xc7   :  { %v565_v44 = vpop.eup %564  ;;  %580 = vrsqrt.f32 %v134_v40 }
  0xc8   :  { %v567_v52 = vpop.eup %566  ;;  %v226_v55 = vmul.f32 %v565_v44, %v194_v43  ;;  %v201_v44 = vld [vmem:[%s1071_s1 + $0xf0] sm:$0xff] }
  0xc9   :  { %v136_v63 = vpop.xlane.xlu0 %135  ;;  %v223_v6 = vmul.f32 %v567_v52, %v191_v56  ;;  %v138_v7 = vpop.xlane.xlu1 %137  ;;  %v183_v52 = vld [vmem:[%s1071_s1 + $0x60] sm:$0xff] }
  0xca   :  { %352 = vperm.xlu0 %528, %v226_v55   ;;  %582 = vrsqrt.f32 %v136_v63  ;;  %327 = vperm.xlu1 %529, %v221_v47  }
  0xcb   :  { %v569_v4 = vpop.eup %568  ;;  %584 = vrsqrt.f32 %v848_v51  ;;  %v199_v51 = vld [vmem:[%s1071_s1 + $0xe0] sm:$0xff] }
  0xcc   :  { %v571_v10 = vpop.eup %570  ;;  %v228_v11 = vmul.f32 %v569_v4, %v196_v3  ;;  %586 = vrsqrt.f32 %v138_v7 }
  0xcd   :  { %v225_v19 = vmul.f32 %v571_v10, %v193_v14  ;;  %588 = vrsqrt.f32 %v846_v48  ;;  %v185_v10 = vld [vmem:[%s1071_s1 + $0x70] sm:$0xff] }
  0xce   :  { %362 = vperm.xlu0 %528, %v228_v11   ;;  %337 = vperm.xlu1 %529, %v223_v6   ;;  %590 = vrsqrt.f32 %v855_v60  ;;  %v202_v60 = vld [vmem:[%s1071_s1 + $0xf8] sm:$0xff] }
  0xcf   :  { %v573_v18 = vpop.eup %572  ;;  %592 = vrsqrt.f32 %v853_v59  ;;  %v184_v59 = vld [vmem:[%s1071_s1 + $0x68] sm:$0xff] }
  0xd0   :  { %v575_v22 = vpop.eup %574  ;;  %v230_v23 = vmul.f32 %v573_v18, %v198_v15  ;;  %v186_v15 = vld [vmem:[%s1071_s1 + $0x78] sm:$0xff] }
  0xd1   :  { %v577_v30 = vpop.eup %576  ;;  %v227_v31 = vmul.f32 %v575_v22, %v195_v27 }
  0xd2   :  { %372 = vperm.xlu0 %528, %v230_v23   ;;  %347 = vperm.xlu1 %529, %v225_v19   ;;  %v229_v43 = vmul.f32 %v577_v30, %v197_v39 }
  0xd3   :  { %v579_v26 = vpop.eup %578 }
  0xd4   :  { %v581_v35 = vpop.eup %580  ;;  %v231_v36 = vmul.f32 %v579_v26, %v199_v51 }
  0xd5   :  { %v232_v48 = vmul.f32 %v581_v35, %v200_v34 }
  0xd6   :  { %377 = vperm.xlu0 %528, %v231_v36   ;;  %357 = vperm.xlu1 %529, %v227_v31  }
  0xd7   :  { %v583_v40 = vpop.eup %582 }
  0xd8   :  { %v585_v47 = vpop.eup %584  ;;  %v233_v55 = vmul.f32 %v583_v40, %v201_v44 }
  0xd9   :  { %v587_v56 = vpop.eup %586  ;;  %v215_v63 = vmul.f32 %v585_v47, %v183_v52 }
  0xda   :  { %382 = vperm.xlu0 %528, %v232_v48   ;;  %367 = vperm.xlu1 %529, %v229_v43   ;;  %v589_v3 = vpop.eup %588  ;;  %v234_v4 = vmul.f32 %v587_v56, %v202_v60 }
  0xdb   :  { %v216_v6 = vmul.f32 %v589_v3, %v184_v59  ;;  %v591_v7 = vpop.eup %590 }
  0xdc   :  { %v217_v11 = vmul.f32 %v591_v7, %v185_v10  ;;  %v593_v14 = vpop.eup %592 }
  0xdd   :  { %v218_v18 = vmul.f32 %v593_v14, %v186_v15 }
  0xde   :  { %387 = vperm.xlu0 %528, %v233_v55   ;;  %297 = vperm.xlu1 %529, %v215_v63  }
  0xe2   :  { %392 = vperm.xlu0 %528, %v234_v4   ;;  %302 = vperm.xlu1 %529, %v216_v6  }
  0xe6   :  { %307 = vperm.xlu1 %529, %v217_v11  }
  0xea   :  { %312 = vperm.xlu1 %529, %v218_v18  }
 0x119   :  { %v238_v19 = vpop.permute.xlu0 %237 }
 0x11a   :  { %v395_v22 = vmul.f32 %v238_v19, %v618_v1 }
 0x11c   :  { %427 = vxpose.xlu1.b32.start [1/16] %v395_v22, 128 }
 0x11d   :  { %v243_v23 = vpop.permute.xlu1 %242 }
 0x11e   :  { %v396_v27 = vmul.f32 %v243_v23, %v632_v5 }
 0x120   :  { %428 = vxpose.xlu1.b32.cont [2/16] %v396_v27, 128 }
 0x121   :  { %v248_v51 = vpop.permute.xlu1 %247 }
 0x122   :  { %v397_v30 = vmul.f32 %v248_v51, %v613_v0 }
 0x124   :  { %429 = vxpose.xlu1.b32.cont [3/16] %v397_v30, 128 }
 0x125   :  { %v253_v26 = vpop.permute.xlu1 %252 }
 0x126   :  { %v398_v31 = vmul.f32 %v253_v26, %v623_v2 }
 0x128   :  { %430 = vxpose.xlu1.b32.cont [4/16] %v398_v31, 128 }
 0x129   :  { %v258_v34 = vpop.permute.xlu1 %257  ;;  %v283_v40 = vpop.permute.xlu0 %282 }
 0x12a   :  { %v399_v35 = vmul.f32 %v258_v34, %v646_v9  ;;  %v404_v47 = vmul.f32 %v283_v40, %v669_v16 }
 0x12c   :  { %431 = vxpose.xlu1.b32.cont [5/16] %v399_v35, 128 }
 0x12d   :  { %v263_v36 = vpop.permute.xlu1 %262  ;;  %v293_v44 = vpop.permute.xlu0 %292 }
 0x12e   :  { %v400_v1 = vmul.f32 %v263_v36, %v641_v8  ;;  %v406_v56 = vmul.f32 %v293_v44, %v683_v20 }
 0x130   :  { %432 = vxpose.xlu1.b32.cont [6/16] %v400_v1, 128 }
 0x131   :  { %v268_v39 = vpop.permute.xlu1 %267 }
 0x132   :  { %v401_v5 = vmul.f32 %v268_v39, %v660_v13 }
 0x134   :  { %433 = vxpose.xlu1.b32.cont [7/16] %v401_v5, 128 }
 0x135   :  { %v273_v48 = vpop.permute.xlu1 %272 }
 0x136   :  { %v402_v0 = vmul.f32 %v273_v48, %v655_v12 }
 0x138   :  { %434 = vxpose.xlu1.b32.cont [8/16] %v402_v0, 128 }
 0x139   :  { %v278_v43 = vpop.permute.xlu1 %277  ;;  %v323_v55 = vpop.permute.xlu0 %322 }
 0x13a   :  { %v403_v2 = vmul.f32 %v278_v43, %v674_v17  ;;  %v412_v60 = vmul.f32 %v323_v55, %v725_v32 }
 0x13c   :  { %435 = vxpose.xlu1.b32.cont [9/16] %v403_v2, 128 }
 0x13d   :  { %v288_v9 = vpop.permute.xlu1 %287  ;;  %v333_v16 = vpop.permute.xlu0 %332 }
 0x13e   :  { %v405_v52 = vmul.f32 %v288_v9, %v688_v21  ;;  %v414_v21 = vmul.f32 %v333_v16, %v739_v37 }
 0x140   :  { %436 = vxpose.xlu1.b32.cont [10/16] %v404_v47, 128 }
 0x141   :  { %v318_v8 = vpop.permute.xlu1 %317 }
 0x142   :  { %v411_v13 = vmul.f32 %v318_v8, %v730_v33  ;;  %v343_v33 = vpop.permute.xlu0 %342 }
 0x143   :  { %v416_v20 = vmul.f32 %v343_v33, %v753_v41 }
 0x144   :  { %459 = vxpose.xlu0.b32.start [1/16] %v411_v13, 128  ;;  %437 = vxpose.xlu1.b32.cont [11/16] %v405_v52, 128 }
 0x145   :  { %v328_v12 = vpop.permute.xlu1 %327 }
 0x146   :  { %v413_v63 = vmul.f32 %v328_v12, %v744_v38  ;;  %v353_v32 = vpop.permute.xlu0 %352 }
 0x147   :  { %v418_v14 = vmul.f32 %v353_v32, %v767_v45 }
 0x148   :  { %438 = vxpose.xlu1.b32.cont [12/16] %v406_v56, 128  ;;  %460 = vxpose.xlu0.b32.cont [2/16] %v412_v60, 128 }
 0x149   :  { %v338_v17 = vpop.permute.xlu1 %337 }
 0x14a   :  { %v415_v4 = vmul.f32 %v338_v17, %v758_v42  ;;  %v363_v11 = vpop.permute.xlu0 %362 }
 0x14c   :  { %461 = vxpose.xlu0.b32.cont [3/16] %v413_v63, 128 }
 0x14d   :  { %v348_v3 = vpop.permute.xlu1 %347 }
 0x14e   :  { %v417_v10 = vmul.f32 %v348_v3, %v772_v46  ;;  %v373_v19 = vpop.permute.xlu0 %372 }
 0x14f   :  { %v422_v23 = vmul.f32 %v373_v19, %v795_v53 }
 0x150   :  { %462 = vxpose.xlu0.b32.cont [4/16] %v414_v21, 128 }
 0x151   :  { %v358_v59 = vpop.permute.xlu1 %357 }
 0x152   :  { %v419_v41 = vmul.f32 %v358_v59, %v786_v50  ;;  %v378_v45 = vpop.permute.xlu0 %377 }
 0x154   :  { %463 = vxpose.xlu0.b32.cont [5/16] %v415_v4, 128 }
 0x155   :  { %v368_v6 = vpop.permute.xlu1 %367 }
 0x156   :  { %v383_v27 = vpop.permute.xlu0 %382 }
 0x157   :  { %v424_v51 = vmul.f32 %v383_v27, %v814_v58 }
 0x158   :  { %464 = vxpose.xlu0.b32.cont [6/16] %v416_v20, 128 }
 0x159   :  { %v298_v7 = vpop.permute.xlu1 %297 }
 0x15a   :  { %v407_v38 = vmul.f32 %v298_v7, %v702_v25  ;;  %v420_v25 = vmul.f32 %v363_v11, %v781_v49  ;;  %v388_v50 = vpop.permute.xlu0 %387 }
 0x15b   :  { %v425_v49 = vmul.f32 %v388_v50, %v823_v61 }
 0x15c   :  { %439 = vxpose.xlu1.b32.cont [13/16] %v407_v38, 128  ;;  %465 = vxpose.xlu0.b32.cont [7/16] %v417_v10, 128 }
 0x15d   :  { %v303_v37 = vpop.permute.xlu1 %302 }
 0x15e   :  { %v408_v15 = vmul.f32 %v303_v37, %v697_v24  ;;  %v421_v24 = vmul.f32 %v368_v6, %v800_v54 }
 0x160   :  { %440 = vxpose.xlu1.b32.cont [14/16] %v408_v15, 128  ;;  %466 = vxpose.xlu0.b32.cont [8/16] %v418_v14, 128 }
 0x161   :  { %v308_v42 = vpop.permute.xlu1 %307 }
 0x162   :  { %v409_v18 = vmul.f32 %v308_v42, %v716_v29  ;;  %v423_v29 = vmul.f32 %v378_v45, %v809_v57 }
 0x164   :  { %441 = vxpose.xlu1.b32.cont [15/16] %v409_v18, 128  ;;  %467 = vxpose.xlu0.b32.cont [9/16] %v419_v41, 128 }
 0x165   :  { %v313_v46 = vpop.permute.xlu1 %312 }
 0x166   :  { %v410_v22 = vmul.f32 %v313_v46, %v711_v28  ;;  %v393_v28 = vpop.permute.xlu0 %392 }
 0x167   :  { %v426_v30 = vmul.f32 %v393_v28, %v828_v62 }
 0x168   :  { %442 = vxpose.xlu1.b32.end [16/16] %v410_v22, 128  ;;  %468 = vxpose.xlu0.b32.cont [10/16] %v420_v25, 128 }
 0x16c   :  { %469 = vxpose.xlu0.b32.cont [11/16] %v421_v24, 128 }
 0x170   :  { %470 = vxpose.xlu0.b32.cont [12/16] %v422_v23, 128 }
 0x174   :  { %471 = vxpose.xlu0.b32.cont [13/16] %v423_v29, 128 }
 0x178   :  { %472 = vxpose.xlu0.b32.cont [14/16] %v424_v51, 128 }
 0x17c   :  { %473 = vxpose.xlu0.b32.cont [15/16] %v425_v49, 128 }
 0x180   :  { %474 = vxpose.xlu0.b32.end [16/16] %v426_v30, 128 }
 0x1a8   :  { %v443_v54 = vpop.trf.xlu1 }
 0x1a9   :  { %491 = vst [vmem:[%s1072_s2] sm:$0xff] %v443_v54 }
 0x1ac   :  { %v444_v53 = vpop.trf.xlu1 }
 0x1ad   :  { %493 = vst [vmem:[%s1072_s2 + $0x10] sm:$0xff] %v444_v53 }
 0x1b0   :  { %v445_v57 = vpop.trf.xlu1 }
 0x1b1   :  { %495 = vst [vmem:[%s1072_s2 + $0x20] sm:$0xff] %v445_v57 }
 0x1b4   :  { %v446_v58 = vpop.trf.xlu1 }
 0x1b5   :  { %497 = vst [vmem:[%s1072_s2 + $0x30] sm:$0xff] %v446_v58 }
 0x1b8   :  { %v447_v61 = vpop.trf.xlu1 }
 0x1b9   :  { %499 = vst [vmem:[%s1072_s2 + $0x40] sm:$0xff] %v447_v61 }
 0x1bc   :  { %v448_v62 = vpop.trf.xlu1 }
 0x1bd   :  { %501 = vst [vmem:[%s1072_s2 + $0x50] sm:$0xff] %v448_v62 }
 0x1c0   :  { %v475_v26 = vpop.trf.xlu0  ;;  %v449_v31 = vpop.trf.xlu1 }
 0x1c1   :  { %492 = vst [vmem:[%s1072_s2 + $0x8] sm:$0xff] %v475_v26  ;;  %503 = vst [vmem:[%s1072_s2 + $0x60] sm:$0xff] %v449_v31 }
 0x1c4   :  { %v476_v34 = vpop.trf.xlu0  ;;  %v450_v35 = vpop.trf.xlu1 }
 0x1c5   :  { %494 = vst [vmem:[%s1072_s2 + $0x18] sm:$0xff] %v476_v34  ;;  %505 = vst [vmem:[%s1072_s2 + $0x70] sm:$0xff] %v450_v35 }
 0x1c8   :  { %v477_v36 = vpop.trf.xlu0  ;;  %v451_v1 = vpop.trf.xlu1 }
 0x1c9   :  { %496 = vst [vmem:[%s1072_s2 + $0x28] sm:$0xff] %v477_v36  ;;  %507 = vst [vmem:[%s1072_s2 + $0x80] sm:$0xff] %v451_v1 }
 0x1cc   :  { %v478_v39 = vpop.trf.xlu0  ;;  %v452_v5 = vpop.trf.xlu1 }
 0x1cd   :  { %498 = vst [vmem:[%s1072_s2 + $0x38] sm:$0xff] %v478_v39  ;;  %509 = vst [vmem:[%s1072_s2 + $0x90] sm:$0xff] %v452_v5 }
 0x1d0   :  { %v479_v48 = vpop.trf.xlu0  ;;  %v453_v0 = vpop.trf.xlu1 }
 0x1d1   :  { %500 = vst [vmem:[%s1072_s2 + $0x48] sm:$0xff] %v479_v48  ;;  %511 = vst [vmem:[%s1072_s2 + $0xa0] sm:$0xff] %v453_v0 }
 0x1d4   :  { %v480_v40 = vpop.trf.xlu0  ;;  %v454_v43 = vpop.trf.xlu1 }
 0x1d5   :  { %502 = vst [vmem:[%s1072_s2 + $0x58] sm:$0xff] %v480_v40  ;;  %513 = vst [vmem:[%s1072_s2 + $0xb0] sm:$0xff] %v454_v43 }
 0x1d8   :  { %v481_v2 = vpop.trf.xlu0  ;;  %v455_v44 = vpop.trf.xlu1 }
 0x1d9   :  { %504 = vst [vmem:[%s1072_s2 + $0x68] sm:$0xff] %v481_v2  ;;  %515 = vst [vmem:[%s1072_s2 + $0xc0] sm:$0xff] %v455_v44 }
 0x1dc   :  { %v482_v9 = vpop.trf.xlu0  ;;  %v456_v47 = vpop.trf.xlu1 }
 0x1dd   :  { %506 = vst [vmem:[%s1072_s2 + $0x78] sm:$0xff] %v482_v9  ;;  %517 = vst [vmem:[%s1072_s2 + $0xd0] sm:$0xff] %v456_v47 }
 0x1e0   :  { %v483_v8 = vpop.trf.xlu0  ;;  %v457_v52 = vpop.trf.xlu1 }
 0x1e1   :  { %508 = vst [vmem:[%s1072_s2 + $0x88] sm:$0xff] %v483_v8  ;;  %519 = vst [vmem:[%s1072_s2 + $0xe0] sm:$0xff] %v457_v52 }
 0x1e4   :  { %v484_v13 = vpop.trf.xlu0  ;;  %v458_v55 = vpop.trf.xlu1 }
 0x1e5   :  { %510 = vst [vmem:[%s1072_s2 + $0x98] sm:$0xff] %v484_v13  ;;  %521 = vst [vmem:[%s1072_s2 + $0xf0] sm:$0xff] %v458_v55 }
 0x1e8   :  { %v485_v12 = vpop.trf.xlu0 }
 0x1e9   :  { %512 = vst [vmem:[%s1072_s2 + $0xa8] sm:$0xff] %v485_v12 }
 0x1ec   :  { %v486_v56 = vpop.trf.xlu0 }
 0x1ed   :  { %514 = vst [vmem:[%s1072_s2 + $0xb8] sm:$0xff] %v486_v56 }
 0x1f0   :  { %v487_v60 = vpop.trf.xlu0 }
 0x1f1   :  { %516 = vst [vmem:[%s1072_s2 + $0xc8] sm:$0xff] %v487_v60 }
 0x1f4   :  { %v488_v17 = vpop.trf.xlu0 }
 0x1f5   :  { %518 = vst [vmem:[%s1072_s2 + $0xd8] sm:$0xff] %v488_v17 }
 0x1f8   :  { %v489_v63 = vpop.trf.xlu0 }
 0x1f9   :  { %520 = vst [vmem:[%s1072_s2 + $0xe8] sm:$0xff] %v489_v63 }
 0x1fc   :  { %v490_v16 = vpop.trf.xlu0 }
 0x1fd   :  { %522 = vst [vmem:[%s1072_s2 + $0xf8] sm:$0xff] %v490_v16 }

// kernel: _forward_impl.4
= control target key start
LH: loop header
LB: loop body
LE: loop exit
PB: predicated region body
PF: predicated region fallthrough
CT: control target
= control target key end

     0   :  { %7 = vsyncpa [#allocation3], 0  ;;  %s458_s9 = smov [#allocation2]   ;;  %s784_s0 = inlined_call_operand.hbm [shape: f32[128,256], index: 0, kind: input, shape index: {}]   ;;  %s785_s1 = inlined_call_operand.vmem [shape: f32[128,1], index: 1, kind: input, shape index: {}]   ;;  %s786_s2 = inlined_call_operand.vmem [shape: f32[256,128], index: 2, kind: output, shape index: {}]  }
   0x1   :  { %s13_s10 = sshll.u32 %s458_s9, 4  ;;  %s14_s10 = int_to_ptr.vmem [resolvable:$true] %s13_s10 }
   0x2   :  { %s444_s11 = scalar_lea.vmem %s14_s10, 4096  ;;  %p449_p1 = scmp.lt.s32.totalorder %s14_s10, %s14_s10 }
   0x3   :  { %p445_p0 = scmp.ne.s32.totalorder %s14_s10, %s444_s11  ;;  %p450_p2 = scmp.lt.s32.totalorder %s444_s11, %s444_s11 }
   0x5   :  { %p451_p3 = por %p450_p2, %p449_p1 }
   0x7   :  { %p452_p4 = pnand %p451_p3, %p445_p0 }
   0x9   :  { %455 = shalt.err (!%p452_p4)
}
   0xa   :  { %s459_s12 = smov 256   ;;  %s460_s13 = smov 16  }
   0xb   :  { %19 = dma.hbm_to_vmem [thread:$0]  %s784_s0, 4096, %s14_s10, [#allocation3], %s459_s12, %s459_s12, %s460_s13  }
   0xc   :  { %456 = dma.done.wait [#allocation3], 4096  }
   0xd   :  { %457 = vsyncadd [#allocation3], 4294963200  ;;  %v480_v0 = vld [vmem:[#allocation2 + $0x20] sm:$0xff]  ;;  %v482_v1 = vld [vmem:[#allocation2 + $0x28] sm:$0xff] }
   0xe   :  { %v484_v2 = vld [vmem:[#allocation2] sm:$0xff]  ;;  %v61_v3 = vmul.f32 %v480_v0, %v480_v0  ;;  %v62_v4 = vmul.f32 %v482_v1, %v482_v1  ;;  %v490_v5 = vld [vmem:[#allocation2 + $0x8] sm:$0xff]  ;;  %v494_v7 = vld [vmem:[#allocation2 + $0x30] sm:$0xff] }
   0xf   :  { %v57_v6 = vmul.f32 %v484_v2, %v484_v2  ;;  %v496_v8 = vld [vmem:[#allocation2 + $0x38] sm:$0xff]  ;;  %v58_v9 = vmul.f32 %v490_v5, %v490_v5  ;;  %v63_v10 = vmul.f32 %v494_v7, %v494_v7  ;;  %v504_v12 = vld [vmem:[#allocation2 + $0x10] sm:$0xff]  ;;  %v516_v20 = vld [vmem:[#allocation2 + $0x40] sm:$0xff] }
  0x10   :  { %v64_v11 = vmul.f32 %v496_v8, %v496_v8  ;;  %v506_v13 = vld [vmem:[#allocation2 + $0x18] sm:$0xff]  ;;  %v508_v14 = vld [vmem:[#allocation2 + $0x50] sm:$0xff]  ;;  %v95_v15 = vadd.f32 %v62_v4, %v61_v3  ;;  %v59_v16 = vmul.f32 %v504_v12, %v504_v12  ;;  %v522_v24 = vld [vmem:[#allocation2 + $0x48] sm:$0xff]  ;;  %v65_v28 = vmul.f32 %v516_v20, %v516_v20 }
  0x11   :  { %v60_v17 = vmul.f32 %v506_v13, %v506_v13  ;;  %v514_v18 = vld [vmem:[#allocation2 + $0x58] sm:$0xff]  ;;  %v89_v19 = vadd.f32 %v58_v9, %v57_v6  ;;  %v67_v22 = vmul.f32 %v508_v14, %v508_v14  ;;  %v524_v26 = vld [vmem:[#allocation2 + $0x70] sm:$0xff]  ;;  %v66_v29 = vmul.f32 %v522_v24, %v522_v24  ;;  %v532_v30 = vld [vmem:[#allocation2 + $0x60] sm:$0xff] }
  0x12   :  { %96 = vadd.xlane.f32.xlu1 %v95_v15  ;;  %v98_v21 = vadd.f32 %v64_v11, %v63_v10  ;;  %v68_v23 = vmul.f32 %v514_v18, %v514_v18  ;;  %v526_v27 = vld [vmem:[#allocation2 + $0x78] sm:$0xff]  ;;  %v534_v31 = vld [vmem:[#allocation2 + $0x68] sm:$0xff]  ;;  %v71_v33 = vmul.f32 %v524_v26, %v524_v26  ;;  %v540_v35 = vld [vmem:[#allocation2 + $0x90] sm:$0xff]  ;;  %v69_v38 = vmul.f32 %v532_v30, %v532_v30 }
  0x13   :  { %90 = vadd.xlane.f32.xlu0 %v89_v19  ;;  %v92_v25 = vadd.f32 %v60_v17, %v59_v16  ;;  %v72_v34 = vmul.f32 %v526_v27, %v526_v27  ;;  %v542_v36 = vld [vmem:[#allocation2 + $0x98] sm:$0xff]  ;;  %v101_v37 = vadd.f32 %v66_v29, %v65_v28  ;;  %v70_v39 = vmul.f32 %v534_v31, %v534_v31  ;;  %v548_v40 = vld [vmem:[#allocation2 + $0x80] sm:$0xff]  ;;  %v550_v41 = vld [vmem:[#allocation2 + $0x88] sm:$0xff] }
  0x14   :  { %v104_v32 = vadd.f32 %v68_v23, %v67_v22  ;;  %v75_v43 = vmul.f32 %v540_v35, %v540_v35  ;;  %v76_v44 = vmul.f32 %v542_v36, %v542_v36  ;;  %v556_v45 = vld [vmem:[#allocation2 + $0xb0] sm:$0xff]  ;;  %v558_v46 = vld [vmem:[#allocation2 + $0xb8] sm:$0xff]  ;;  %v73_v48 = vmul.f32 %v548_v40, %v548_v40  ;;  %v564_v50 = vld [vmem:[#allocation2 + $0xa0] sm:$0xff] }
  0x15   :  { %v110_v42 = vadd.f32 %v72_v34, %v71_v33  ;;  %v107_v47 = vadd.f32 %v70_v39, %v69_v38  ;;  %v74_v49 = vmul.f32 %v550_v41, %v550_v41  ;;  %v566_v51 = vld [vmem:[#allocation2 + $0xa8] sm:$0xff]  ;;  %v79_v53 = vmul.f32 %v556_v45, %v556_v45  ;;  %v572_v55 = vld [vmem:[#allocation2 + $0xd0] sm:$0xff]  ;;  %v574_v56 = vld [vmem:[#allocation2 + $0xd8] sm:$0xff] }
  0x16   :  { %99 = vadd.xlane.f32.xlu1 %v98_v21  ;;  %v116_v52 = vadd.f32 %v76_v44, %v75_v43  ;;  %v80_v54 = vmul.f32 %v558_v46, %v558_v46  ;;  %v77_v58 = vmul.f32 %v564_v50, %v564_v50  ;;  %v78_v59 = vmul.f32 %v566_v51, %v566_v51  ;;  %v580_v60 = vld [vmem:[#allocation2 + $0xc0] sm:$0xff]  ;;  %v582_v61 = vld [vmem:[#allocation2 + $0xc8] sm:$0xff]  ;;  %v588_v4 = vld [vmem:[#allocation2 + $0xf0] sm:$0xff] }
  0x17   :  { %93 = vadd.xlane.f32.xlu0 %v92_v25  ;;  %v113_v57 = vadd.f32 %v74_v49, %v73_v48  ;;  %v83_v63 = vmul.f32 %v572_v55, %v572_v55  ;;  %v84_v3 = vmul.f32 %v574_v56, %v574_v56  ;;  %v590_v6 = vld [vmem:[#allocation2 + $0xf8] sm:$0xff]  ;;  %v81_v10 = vmul.f32 %v580_v60, %v580_v60  ;;  %v596_v15 = vld [vmem:[#allocation2 + $0xe0] sm:$0xff]  ;;  %v598_v16 = vld [vmem:[#allocation2 + $0xe8] sm:$0xff] }
  0x18   :  { %v122_v62 = vadd.f32 %v80_v54, %v79_v53  ;;  %v119_v9 = vadd.f32 %v78_v59, %v77_v58  ;;  %v82_v11 = vmul.f32 %v582_v61, %v582_v61  ;;  %v87_v19 = vmul.f32 %v588_v4, %v588_v4  ;;  %v153_v44 = vld [vmem:[%s785_s1] sm:$0xff]  ;;  %v155_v58 = vld [vmem:[%s785_s1 + $0x10] sm:$0xff] }
  0x19   :  { %v128_v17 = vadd.f32 %v84_v3, %v83_v63  ;;  %v88_v21 = vmul.f32 %v590_v6, %v590_v6  ;;  %v85_v23 = vmul.f32 %v596_v15, %v596_v15  ;;  %v86_v25 = vmul.f32 %v598_v16, %v598_v16 }
  0x1a   :  { %105 = vadd.xlane.f32.xlu1 %v104_v32  ;;  %v125_v22 = vadd.f32 %v82_v11, %v81_v10  ;;  %v461_v28 = vmov 0   ;;  %v156_v10 = vld [vmem:[%s785_s1 + $0x18] sm:$0xff] }
  0x1b   :  { %102 = vadd.xlane.f32.xlu0 %v101_v37  ;;  %403 = vset.pattern.permute.xlu1 %v461_v28  ;;  %v134_v29 = vadd.f32 %v88_v21, %v87_v19  ;;  %v131_v32 = vadd.f32 %v86_v25, %v85_v23  ;;  %v157_v21 = vld [vmem:[%s785_s1 + $0x20] sm:$0xff]  ;;  %v162_v25 = vld [vmem:[%s785_s1 + $0x48] sm:$0xff] }
  0x1c   :  { %402 = vset.pattern.permute.xlu0 %v461_v28 }
  0x1e   :  { %111 = vadd.xlane.f32.xlu1 %v110_v42 }
  0x1f   :  { %108 = vadd.xlane.f32.xlu0 %v107_v47 }
  0x22   :  { %117 = vadd.xlane.f32.xlu1 %v116_v52  ;;  %v154_v52 = vld [vmem:[%s785_s1 + $0x8] sm:$0xff] }
  0x23   :  { %114 = vadd.xlane.f32.xlu0 %v113_v57 }
  0x26   :  { %123 = vadd.xlane.f32.xlu1 %v122_v62 }
  0x27   :  { %120 = vadd.xlane.f32.xlu0 %v119_v9 }
  0x2a   :  { %129 = vadd.xlane.f32.xlu1 %v128_v17 }
  0x2b   :  { %126 = vadd.xlane.f32.xlu0 %v125_v22 }
  0x2e   :  { %135 = vadd.xlane.f32.xlu1 %v134_v29 }
  0x2f   :  { %132 = vadd.xlane.f32.xlu0 %v131_v32 }
  0x9b   :  { %v97_v33 = vpop.xlane.xlu1 %96 }
  0x9c   :  { %v91_v34 = vpop.xlane.xlu0 %90 }
  0x9d   :  { %404 = vrsqrt.f32 %v91_v34  ;;  %v158_v34 = vld [vmem:[%s785_s1 + $0x28] sm:$0xff] }
  0x9e   :  { %406 = vrsqrt.f32 %v97_v33 }
  0x9f   :  { %v100_v37 = vpop.xlane.xlu1 %99 }
  0xa0   :  { %v94_v38 = vpop.xlane.xlu0 %93 }
  0xa1   :  { %408 = vrsqrt.f32 %v94_v38 }
  0xa2   :  { %410 = vrsqrt.f32 %v100_v37  ;;  %v164_v37 = vld [vmem:[%s785_s1 + $0x58] sm:$0xff] }
  0xa3   :  { %v106_v39 = vpop.xlane.xlu1 %105 }
  0xa4   :  { %v103_v42 = vpop.xlane.xlu0 %102 }
  0xa5   :  { %412 = vrsqrt.f32 %v103_v42 }
  0xa7   :  { %v112_v43 = vpop.xlane.xlu1 %111 }
  0xa8   :  { %v109_v53 = vpop.xlane.xlu0 %108 }
  0xaa   :  { %v405_v47 = vpop.eup %404 }
  0xab   :  { %v118_v48 = vpop.xlane.xlu1 %117  ;;  %v169_v49 = vmul.f32 %v405_v47, %v153_v44  ;;  %v407_v54 = vpop.eup %406  ;;  %v159_v47 = vld [vmem:[%s785_s1 + $0x30] sm:$0xff] }
  0xac   :  { %414 = vrsqrt.f32 %v118_v48  ;;  %v115_v63 = vpop.xlane.xlu0 %114  ;;  %v171_v3 = vmul.f32 %v407_v54, %v155_v58  ;;  %v166_v48 = vld [vmem:[%s785_s1 + $0x68] sm:$0xff]  ;;  %v160_v58 = vld [vmem:[%s785_s1 + $0x38] sm:$0xff] }
  0xad   :  { %416 = vrsqrt.f32 %v106_v39  ;;  %187 = vperm.xlu0 %402, %v169_v49  }
  0xae   :  { %v409_v57 = vpop.eup %408 }
  0xaf   :  { %v124_v59 = vpop.xlane.xlu1 %123  ;;  %v170_v62 = vmul.f32 %v409_v57, %v154_v52  ;;  %v411_v9 = vpop.eup %410 }
  0xb0   :  { %418 = vrsqrt.f32 %v124_v59  ;;  %v172_v17 = vmul.f32 %v411_v9, %v156_v10  ;;  %v121_v22 = vpop.xlane.xlu0 %120  ;;  %v168_v59 = vld [vmem:[%s785_s1 + $0x78] sm:$0xff]  ;;  %v161_v10 = vld [vmem:[%s785_s1 + $0x40] sm:$0xff] }
  0xb1   :  { %192 = vperm.xlu1 %403, %v170_v62   ;;  %420 = vrsqrt.f32 %v109_v53 }
  0xb2   :  { %v413_v19 = vpop.eup %412 }
  0xb3   :  { %v130_v11 = vpop.xlane.xlu1 %129  ;;  %v173_v29 = vmul.f32 %v413_v19, %v157_v21  ;;  %v163_v19 = vld [vmem:[%s785_s1 + $0x50] sm:$0xff] }
  0xb4   :  { %422 = vrsqrt.f32 %v130_v11  ;;  %v127_v38 = vpop.xlane.xlu0 %126 }
  0xb5   :  { %424 = vrsqrt.f32 %v112_v43  ;;  %197 = vperm.xlu1 %403, %v171_v3  }
  0xb7   :  { %v136_v23 = vpop.xlane.xlu1 %135 }
  0xb8   :  { %426 = vrsqrt.f32 %v136_v23  ;;  %v133_v57 = vpop.xlane.xlu0 %132  ;;  %v165_v23 = vld [vmem:[%s785_s1 + $0x60] sm:$0xff] }
  0xb9   :  { %v415_v28 = vpop.eup %414  ;;  %202 = vperm.xlu1 %403, %v172_v17   ;;  %428 = vrsqrt.f32 %v115_v63 }
  0xba   :  { %v417_v32 = vpop.eup %416  ;;  %v178_v33 = vmul.f32 %v415_v28, %v162_v25  ;;  %430 = vrsqrt.f32 %v121_v22 }
  0xbb   :  { %v174_v42 = vmul.f32 %v417_v32, %v158_v34  ;;  %432 = vrsqrt.f32 %v127_v38 }
  0xbc   :  { %232 = vperm.xlu0 %402, %v178_v33   ;;  %434 = vrsqrt.f32 %v133_v57 }
  0xbd   :  { %v419_v39 = vpop.eup %418  ;;  %207 = vperm.xlu1 %403, %v173_v29   ;;  %v167_v29 = vld [vmem:[%s785_s1 + $0x70] sm:$0xff] }
  0xbe   :  { %v421_v43 = vpop.eup %420  ;;  %v180_v44 = vmul.f32 %v419_v39, %v164_v37 }
  0xbf   :  { %v175_v52 = vmul.f32 %v421_v43, %v159_v47 }
  0xc0   :  { %242 = vperm.xlu0 %402, %v180_v44  }
  0xc1   :  { %v423_v49 = vpop.eup %422  ;;  %212 = vperm.xlu1 %403, %v174_v42  }
  0xc2   :  { %v425_v53 = vpop.eup %424  ;;  %v182_v54 = vmul.f32 %v423_v49, %v166_v48 }
  0xc3   :  { %v176_v63 = vmul.f32 %v425_v53, %v160_v58 }
  0xc4   :  { %252 = vperm.xlu0 %402, %v182_v54  }
  0xc5   :  { %v427_v62 = vpop.eup %426  ;;  %217 = vperm.xlu1 %403, %v175_v52  }
  0xc6   :  { %v429_v3 = vpop.eup %428  ;;  %v184_v9 = vmul.f32 %v427_v62, %v168_v59 }
  0xc7   :  { %v177_v11 = vmul.f32 %v429_v3, %v161_v10  ;;  %v431_v17 = vpop.eup %430 }
  0xc8   :  { %262 = vperm.xlu0 %402, %v184_v9   ;;  %v179_v21 = vmul.f32 %v431_v17, %v163_v19  ;;  %v433_v22 = vpop.eup %432 }
  0xc9   :  { %222 = vperm.xlu1 %403, %v176_v63   ;;  %v181_v25 = vmul.f32 %v433_v22, %v165_v23  ;;  %v435_v28 = vpop.eup %434 }
  0xca   :  { %v183_v32 = vmul.f32 %v435_v28, %v167_v29 }
  0xcd   :  { %227 = vperm.xlu1 %403, %v177_v11  }
  0xd1   :  { %237 = vperm.xlu1 %403, %v179_v21  }
  0xd5   :  { %247 = vperm.xlu1 %403, %v181_v25  }
  0xd9   :  { %257 = vperm.xlu1 %403, %v183_v32  }
 0x128   :  { %v188_v33 = vpop.permute.xlu0 %187 }
 0x129   :  { %v265_v34 = vmul.f32 %v188_v33, %v484_v2  ;;  %v266_v37 = vmul.f32 %v188_v33, %v490_v5 }
 0x12b   :  { %329 = vxpose.xlu0.b32.start [1/16] %v266_v37, 128  ;;  %297 = vxpose.xlu1.b32.start [1/16] %v265_v34, 128 }
 0x12c   :  { %v193_v38 = vpop.permute.xlu1 %192 }
 0x12d   :  { %v267_v39 = vmul.f32 %v193_v38, %v504_v12  ;;  %v268_v42 = vmul.f32 %v193_v38, %v506_v13 }
 0x12f   :  { %330 = vxpose.xlu0.b32.cont [2/16] %v268_v42, 128  ;;  %298 = vxpose.xlu1.b32.cont [2/16] %v267_v39, 128 }
 0x130   :  { %v198_v43 = vpop.permute.xlu1 %197 }
 0x131   :  { %v269_v44 = vmul.f32 %v198_v43, %v480_v0  ;;  %v270_v47 = vmul.f32 %v198_v43, %v482_v1 }
 0x133   :  { %331 = vxpose.xlu0.b32.cont [3/16] %v270_v47, 128  ;;  %299 = vxpose.xlu1.b32.cont [3/16] %v269_v44, 128 }
 0x134   :  { %v203_v48 = vpop.permute.xlu1 %202 }
 0x135   :  { %v271_v2 = vmul.f32 %v203_v48, %v494_v7  ;;  %v272_v5 = vmul.f32 %v203_v48, %v496_v8 }
 0x137   :  { %332 = vxpose.xlu0.b32.cont [4/16] %v272_v5, 128  ;;  %300 = vxpose.xlu1.b32.cont [4/16] %v271_v2, 128  ;;  %v233_v58 = vpop.permute.xlu0 %232 }
 0x138   :  { %v208_v49 = vpop.permute.xlu1 %207 }
 0x139   :  { %v273_v12 = vmul.f32 %v208_v49, %v516_v20  ;;  %v274_v13 = vmul.f32 %v208_v49, %v522_v24 }
 0x13b   :  { %333 = vxpose.xlu0.b32.cont [5/16] %v274_v13, 128  ;;  %301 = vxpose.xlu1.b32.cont [5/16] %v273_v12, 128  ;;  %v243_v62 = vpop.permute.xlu0 %242 }
 0x13c   :  { %v213_v52 = vpop.permute.xlu1 %212 }
 0x13d   :  { %v275_v0 = vmul.f32 %v213_v52, %v508_v14  ;;  %v276_v1 = vmul.f32 %v213_v52, %v514_v18 }
 0x13f   :  { %334 = vxpose.xlu0.b32.cont [6/16] %v276_v1, 128  ;;  %302 = vxpose.xlu1.b32.cont [6/16] %v275_v0, 128  ;;  %v253_v3 = vpop.permute.xlu0 %252 }
 0x140   :  { %v218_v53 = vpop.permute.xlu1 %217 }
 0x141   :  { %v277_v7 = vmul.f32 %v218_v53, %v532_v30  ;;  %v278_v8 = vmul.f32 %v218_v53, %v534_v31  ;;  %v283_v30 = vmul.f32 %v233_v58, %v540_v35  ;;  %v284_v31 = vmul.f32 %v233_v58, %v542_v36 }
 0x143   :  { %335 = vxpose.xlu0.b32.cont [7/16] %v278_v8, 128  ;;  %303 = vxpose.xlu1.b32.cont [7/16] %v277_v7, 128  ;;  %v263_v10 = vpop.permute.xlu0 %262 }
 0x144   :  { %v223_v54 = vpop.permute.xlu1 %222 }
 0x145   :  { %v279_v20 = vmul.f32 %v223_v54, %v524_v26  ;;  %v280_v24 = vmul.f32 %v223_v54, %v526_v27 }
 0x147   :  { %336 = vxpose.xlu0.b32.cont [8/16] %v280_v24, 128  ;;  %304 = vxpose.xlu1.b32.cont [8/16] %v279_v20, 128 }
 0x148   :  { %v228_v57 = vpop.permute.xlu1 %227 }
 0x149   :  { %v281_v14 = vmul.f32 %v228_v57, %v548_v40  ;;  %v282_v18 = vmul.f32 %v228_v57, %v550_v41  ;;  %v287_v40 = vmul.f32 %v243_v62, %v556_v45  ;;  %v288_v41 = vmul.f32 %v243_v62, %v558_v46 }
 0x14b   :  { %337 = vxpose.xlu0.b32.cont [9/16] %v282_v18, 128  ;;  %305 = vxpose.xlu1.b32.cont [9/16] %v281_v14, 128 }
 0x14c   :  { %v238_v59 = vpop.permute.xlu1 %237 }
 0x14d   :  { %v285_v26 = vmul.f32 %v238_v59, %v564_v50  ;;  %v286_v27 = vmul.f32 %v238_v59, %v566_v51  ;;  %v291_v50 = vmul.f32 %v253_v3, %v572_v55  ;;  %v292_v51 = vmul.f32 %v253_v3, %v574_v56 }
 0x14f   :  { %338 = vxpose.xlu0.b32.cont [10/16] %v284_v31, 128  ;;  %306 = vxpose.xlu1.b32.cont [10/16] %v283_v30, 128 }
 0x150   :  { %v248_v63 = vpop.permute.xlu1 %247 }
 0x151   :  { %v289_v35 = vmul.f32 %v248_v63, %v580_v60  ;;  %v290_v36 = vmul.f32 %v248_v63, %v582_v61  ;;  %v295_v60 = vmul.f32 %v263_v10, %v588_v4  ;;  %v296_v61 = vmul.f32 %v263_v10, %v590_v6 }
 0x153   :  { %339 = vxpose.xlu0.b32.cont [11/16] %v286_v27, 128  ;;  %307 = vxpose.xlu1.b32.cont [11/16] %v285_v26, 128 }
 0x154   :  { %v258_v9 = vpop.permute.xlu1 %257 }
 0x155   :  { %v293_v45 = vmul.f32 %v258_v9, %v596_v15  ;;  %v294_v46 = vmul.f32 %v258_v9, %v598_v16 }
 0x157   :  { %340 = vxpose.xlu0.b32.cont [12/16] %v288_v41, 128  ;;  %308 = vxpose.xlu1.b32.cont [12/16] %v287_v40, 128 }
 0x15b   :  { %341 = vxpose.xlu0.b32.cont [13/16] %v290_v36, 128  ;;  %309 = vxpose.xlu1.b32.cont [13/16] %v289_v35, 128 }
 0x15f   :  { %342 = vxpose.xlu0.b32.cont [14/16] %v292_v51, 128  ;;  %310 = vxpose.xlu1.b32.cont [14/16] %v291_v50, 128 }
 0x163   :  { %343 = vxpose.xlu0.b32.cont [15/16] %v294_v46, 128  ;;  %311 = vxpose.xlu1.b32.cont [15/16] %v293_v45, 128 }
 0x167   :  { %344 = vxpose.xlu0.b32.end [16/16] %v296_v61, 128  ;;  %312 = vxpose.xlu1.b32.end [16/16] %v295_v60, 128 }
 0x1a7   :  { %v345_v11 = vpop.trf.xlu0  ;;  %v313_v55 = vpop.trf.xlu1 }
 0x1a8   :  { %377 = vst [vmem:[%s786_s2 + $0x80] sm:$0xff] %v345_v11  ;;  %361 = vst [vmem:[%s786_s2] sm:$0xff] %v313_v55 }
 0x1ab   :  { %v346_v56 = vpop.trf.xlu0  ;;  %v314_v15 = vpop.trf.xlu1 }
 0x1ac   :  { %378 = vst [vmem:[%s786_s2 + $0x88] sm:$0xff] %v346_v56  ;;  %362 = vst [vmem:[%s786_s2 + $0x8] sm:$0xff] %v314_v15 }
 0x1af   :  { %v347_v4 = vpop.trf.xlu0  ;;  %v315_v6 = vpop.trf.xlu1 }
 0x1b0   :  { %379 = vst [vmem:[%s786_s2 + $0x90] sm:$0xff] %v347_v4  ;;  %363 = vst [vmem:[%s786_s2 + $0x10] sm:$0xff] %v315_v6 }
 0x1b3   :  { %v348_v16 = vpop.trf.xlu0  ;;  %v316_v17 = vpop.trf.xlu1 }
 0x1b4   :  { %380 = vst [vmem:[%s786_s2 + $0x98] sm:$0xff] %v348_v16  ;;  %364 = vst [vmem:[%s786_s2 + $0x18] sm:$0xff] %v316_v17 }
 0x1b7   :  { %v349_v19 = vpop.trf.xlu0  ;;  %v317_v21 = vpop.trf.xlu1 }
 0x1b8   :  { %381 = vst [vmem:[%s786_s2 + $0xa0] sm:$0xff] %v349_v19  ;;  %365 = vst [vmem:[%s786_s2 + $0x20] sm:$0xff] %v317_v21 }
 0x1bb   :  { %v350_v22 = vpop.trf.xlu0  ;;  %v318_v23 = vpop.trf.xlu1 }
 0x1bc   :  { %382 = vst [vmem:[%s786_s2 + $0xa8] sm:$0xff] %v350_v22  ;;  %366 = vst [vmem:[%s786_s2 + $0x28] sm:$0xff] %v318_v23 }
 0x1bf   :  { %v351_v25 = vpop.trf.xlu0  ;;  %v319_v28 = vpop.trf.xlu1 }
 0x1c0   :  { %383 = vst [vmem:[%s786_s2 + $0xb0] sm:$0xff] %v351_v25  ;;  %367 = vst [vmem:[%s786_s2 + $0x30] sm:$0xff] %v319_v28 }
 0x1c3   :  { %v352_v29 = vpop.trf.xlu0  ;;  %v320_v32 = vpop.trf.xlu1 }
 0x1c4   :  { %384 = vst [vmem:[%s786_s2 + $0xb8] sm:$0xff] %v352_v29  ;;  %368 = vst [vmem:[%s786_s2 + $0x38] sm:$0xff] %v320_v32 }
 0x1c7   :  { %v353_v33 = vpop.trf.xlu0  ;;  %v321_v34 = vpop.trf.xlu1 }
 0x1c8   :  { %385 = vst [vmem:[%s786_s2 + $0xc0] sm:$0xff] %v353_v33  ;;  %369 = vst [vmem:[%s786_s2 + $0x40] sm:$0xff] %v321_v34 }
 0x1cb   :  { %v354_v37 = vpop.trf.xlu0  ;;  %v322_v38 = vpop.trf.xlu1 }
 0x1cc   :  { %386 = vst [vmem:[%s786_s2 + $0xc8] sm:$0xff] %v354_v37  ;;  %370 = vst [vmem:[%s786_s2 + $0x48] sm:$0xff] %v322_v38 }
 0x1cf   :  { %v355_v39 = vpop.trf.xlu0  ;;  %v323_v42 = vpop.trf.xlu1 }
 0x1d0   :  { %387 = vst [vmem:[%s786_s2 + $0xd0] sm:$0xff] %v355_v39  ;;  %371 = vst [vmem:[%s786_s2 + $0x50] sm:$0xff] %v323_v42 }
 0x1d3   :  { %v356_v43 = vpop.trf.xlu0  ;;  %v324_v44 = vpop.trf.xlu1 }
 0x1d4   :  { %388 = vst [vmem:[%s786_s2 + $0xd8] sm:$0xff] %v356_v43  ;;  %372 = vst [vmem:[%s786_s2 + $0x58] sm:$0xff] %v324_v44 }
 0x1d7   :  { %v357_v47 = vpop.trf.xlu0  ;;  %v325_v48 = vpop.trf.xlu1 }
 0x1d8   :  { %389 = vst [vmem:[%s786_s2 + $0xe0] sm:$0xff] %v357_v47  ;;  %373 = vst [vmem:[%s786_s2 + $0x60] sm:$0xff] %v325_v48 }
 0x1db   :  { %v358_v2 = vpop.trf.xlu0  ;;  %v326_v5 = vpop.trf.xlu1 }
 0x1dc   :  { %390 = vst [vmem:[%s786_s2 + $0xe8] sm:$0xff] %v358_v2  ;;  %374 = vst [vmem:[%s786_s2 + $0x68] sm:$0xff] %v326_v5 }
 0x1df   :  { %v359_v49 = vpop.trf.xlu0  ;;  %v327_v12 = vpop.trf.xlu1 }
 0x1e0   :  { %391 = vst [vmem:[%s786_s2 + $0xf0] sm:$0xff] %v359_v49  ;;  %375 = vst [vmem:[%s786_s2 + $0x70] sm:$0xff] %v327_v12 }
 0x1e3   :  { %v360_v13 = vpop.trf.xlu0  ;;  %v328_v52 = vpop.trf.xlu1 }
 0x1e4   :  { %392 = vst [vmem:[%s786_s2 + $0xf8] sm:$0xff] %v360_v13  ;;  %376 = vst [vmem:[%s786_s2 + $0x78] sm:$0xff] %v328_v52 }
 0x1e5   :  { %397 = vsyncpa [#allocation3], 1 }

// kernel: _forward_impl.5
= control target key start
LH: loop header
LB: loop body
LE: loop exit
PB: predicated region body
PF: predicated region fallthrough
CT: control target
= control target key end

     0   :  { %12 = vsyncpa [#allocation3], 0  ;;  %v929_v4 = vmov 0.0   ;;  %s1477_s0 = inlined_call_operand.vmem [shape: f32[256,128], index: 0, kind: input, shape index: {}]   ;;  %s1478_s1 = inlined_call_operand.vmem [shape: f32[128,256], index: 1, kind: input, shape index: {}]   ;;  %s1479_s2 = inlined_call_operand.vmem [shape: f32[1,256], index: 2, kind: input, shape index: {}]   ;;  %s1480_s3 = inlined_call_operand.vmem [shape: f32[256,128], index: 3, kind: input, shape index: {}]   ;;  %s1481_s4 = inlined_call_operand.vmem [shape: f32[1,128], index: 4, kind: input, shape index: {}]   ;;  %s1482_s5 = inlined_call_operand.hbm [shape: f32[256,256], index: 5, kind: output, shape index: {0}]   ;;  %s1483_s6 = inlined_call_operand.hbm [shape: f32[256,128], index: 6, kind: output, shape index: {1}]  }
   0x1   :  { %v87_v0 = vld [vmem:[%s1478_s1 + $0xf8] sm:$0xff]  ;;  %v86_v1 = vld [vmem:[%s1478_s1 + $0xf0] sm:$0xff]  ;;  %v85_v2 = vld [vmem:[%s1478_s1 + $0xe8] sm:$0xff]  ;;  %164 = vmatprep.mubr.f32.mxu0 %v929_v4  ;;  %814 = vmatprep.subr.mxu1 %v929_v4 }
   0x2   :  { %100 = vmatprep.subr.mxu0 %v87_v0  ;;  %v84_v3 = vld [vmem:[%s1478_s1 + $0xe0] sm:$0xff]  ;;  %v83_v5 = vld [vmem:[%s1478_s1 + $0xd8] sm:$0xff]  ;;  %v82_v6 = vld [vmem:[%s1478_s1 + $0xd0] sm:$0xff] }
   0x3   :  { %101 = vmatpush1.msra.mxu0 %v86_v1  ;;  %v81_v7 = vld [vmem:[%s1478_s1 + $0xc8] sm:$0xff]  ;;  %v80_v8 = vld [vmem:[%s1478_s1 + $0xc0] sm:$0xff]  ;;  %v79_v9 = vld [vmem:[%s1478_s1 + $0xb8] sm:$0xff] }
   0x4   :  { %102 = vmatprep.subr.mxu0 %v85_v2  ;;  %v78_v10 = vld [vmem:[%s1478_s1 + $0xb0] sm:$0xff]  ;;  %v77_v11 = vld [vmem:[%s1478_s1 + $0xa8] sm:$0xff]  ;;  %v76_v12 = vld [vmem:[%s1478_s1 + $0xa0] sm:$0xff] }
   0x5   :  { %103 = vmatpush1.msra.mxu0 %v84_v3  ;;  %v75_v13 = vld [vmem:[%s1478_s1 + $0x98] sm:$0xff]  ;;  %v74_v14 = vld [vmem:[%s1478_s1 + $0x90] sm:$0xff]  ;;  %v73_v15 = vld [vmem:[%s1478_s1 + $0x88] sm:$0xff] }
   0x6   :  { %104 = vmatprep.subr.mxu0 %v83_v5  ;;  %v72_v16 = vld [vmem:[%s1478_s1 + $0x80] sm:$0xff]  ;;  %v71_v17 = vld [vmem:[%s1478_s1 + $0x78] sm:$0xff]  ;;  %v70_v18 = vld [vmem:[%s1478_s1 + $0x70] sm:$0xff] }
   0x7   :  { %105 = vmatpush1.msra.mxu0 %v82_v6  ;;  %v69_v19 = vld [vmem:[%s1478_s1 + $0x68] sm:$0xff]  ;;  %v68_v20 = vld [vmem:[%s1478_s1 + $0x60] sm:$0xff]  ;;  %v67_v21 = vld [vmem:[%s1478_s1 + $0x58] sm:$0xff] }
   0x8   :  { %106 = vmatprep.subr.mxu0 %v81_v7  ;;  %v66_v22 = vld [vmem:[%s1478_s1 + $0x50] sm:$0xff]  ;;  %v65_v23 = vld [vmem:[%s1478_s1 + $0x48] sm:$0xff] }
   0x9   :  { %107 = vmatpush1.msra.mxu0 %v80_v8 }
   0xa   :  { %108 = vmatprep.subr.mxu0 %v79_v9 }
   0xb   :  { %109 = vmatpush1.msra.mxu0 %v78_v10 }
   0xc   :  { %110 = vmatprep.subr.mxu0 %v77_v11 }
   0xd   :  { %111 = vmatpush1.msra.mxu0 %v76_v12 }
   0xe   :  { %112 = vmatprep.subr.mxu0 %v75_v13 }
   0xf   :  { %113 = vmatpush1.msra.mxu0 %v74_v14 }
  0x10   :  { %114 = vmatprep.subr.mxu0 %v73_v15 }
  0x11   :  { %115 = vmatpush1.msra.mxu0 %v72_v16 }
  0x12   :  { %116 = vmatprep.subr.mxu0 %v71_v17 }
  0x13   :  { %117 = vmatpush1.msra.mxu0 %v70_v18 }
  0x14   :  { %118 = vmatprep.subr.mxu0 %v69_v19 }
  0x15   :  { %119 = vmatpush1.msra.mxu0 %v68_v20 }
  0x16   :  { %13 = vsyncpa [#allocation5], 0  ;;  %120 = vmatprep.subr.mxu0 %v67_v21  ;;  %v64_v24 = vld [vmem:[%s1478_s1 + $0x40] sm:$0xff]  ;;  %v63_v25 = vld [vmem:[%s1478_s1 + $0x38] sm:$0xff] }
  0x17   :  { %121 = vmatpush1.msra.mxu0 %v66_v22  ;;  %v62_v26 = vld [vmem:[%s1478_s1 + $0x30] sm:$0xff]  ;;  %v61_v27 = vld [vmem:[%s1478_s1 + $0x28] sm:$0xff]  ;;  %v60_v28 = vld [vmem:[%s1478_s1 + $0x20] sm:$0xff] }
  0x18   :  { %122 = vmatprep.subr.mxu0 %v65_v23  ;;  %v59_v29 = vld [vmem:[%s1478_s1 + $0x18] sm:$0xff]  ;;  %v58_v30 = vld [vmem:[%s1478_s1 + $0x10] sm:$0xff]  ;;  %v57_v31 = vld [vmem:[%s1478_s1 + $0x8] sm:$0xff] }
  0x19   :  { %123 = vmatpush1.msra.mxu0 %v64_v24  ;;  %v56_v32 = vld [vmem:[%s1478_s1] sm:$0xff]  ;;  %v500_v33 = vld [vmem:[%s1480_s3 + $0x78] sm:$0xff]  ;;  %v499_v35 = vld [vmem:[%s1480_s3 + $0x70] sm:$0xff] }
  0x1a   :  { %124 = vmatprep.subr.mxu0 %v63_v25  ;;  %v24_v34 = vld [vmem:[%s1477_s0] sm:$0xff]  ;;  %846 = vmatpush1.msra.mxu1 %v500_v33  ;;  %v25_v36 = vld [vmem:[%s1477_s0 + $0x8] sm:$0xff]  ;;  %v26_v39 = vld [vmem:[%s1477_s0 + $0x10] sm:$0xff] }
  0x1b   :  { %125 = vmatpush1.msra.mxu0 %v62_v26  ;;  %815 = vmatprep.subr.mxu1 %v929_v4  ;;  %v498_v37 = vld [vmem:[%s1480_s3 + $0x68] sm:$0xff]  ;;  %v497_v38 = vld [vmem:[%s1480_s3 + $0x60] sm:$0xff]  ;;  %v496_v40 = vld [vmem:[%s1480_s3 + $0x58] sm:$0xff] }
  0x1c   :  { %126 = vmatprep.subr.mxu0 %v61_v27  ;;  %847 = vmatpush1.msra.mxu1 %v499_v35  ;;  %v495_v41 = vld [vmem:[%s1480_s3 + $0x50] sm:$0xff]  ;;  %v27_v42 = vld [vmem:[%s1477_s0 + $0x18] sm:$0xff]  ;;  %v494_v43 = vld [vmem:[%s1480_s3 + $0x48] sm:$0xff] }
  0x1d   :  { %127 = vmatpush1.msra.mxu0 %v60_v28  ;;  %816 = vmatprep.subr.mxu1 %v929_v4  ;;  %v493_v44 = vld [vmem:[%s1480_s3 + $0x40] sm:$0xff]  ;;  %v492_v46 = vld [vmem:[%s1480_s3 + $0x38] sm:$0xff]  ;;  %v491_v47 = vld [vmem:[%s1480_s3 + $0x30] sm:$0xff] }
  0x1e   :  { %128 = vmatprep.subr.mxu0 %v59_v29  ;;  %848 = vmatpush1.msra.mxu1 %v498_v37  ;;  %v28_v45 = vld [vmem:[%s1477_s0 + $0x20] sm:$0xff]  ;;  %v29_v48 = vld [vmem:[%s1477_s0 + $0x28] sm:$0xff]  ;;  %v30_v51 = vld [vmem:[%s1477_s0 + $0x30] sm:$0xff] }
  0x1f   :  { %129 = vmatpush1.msra.mxu0 %v58_v30  ;;  %817 = vmatprep.subr.mxu1 %v929_v4  ;;  %v490_v49 = vld [vmem:[%s1480_s3 + $0x28] sm:$0xff]  ;;  %v489_v50 = vld [vmem:[%s1480_s3 + $0x20] sm:$0xff]  ;;  %v488_v52 = vld [vmem:[%s1480_s3 + $0x18] sm:$0xff] }
  0x20   :  { %130 = vmatprep.subr.mxu0 %v57_v31  ;;  %849 = vmatpush1.msra.mxu1 %v497_v38  ;;  %v487_v53 = vld [vmem:[%s1480_s3 + $0x10] sm:$0xff]  ;;  %v31_v54 = vld [vmem:[%s1477_s0 + $0x38] sm:$0xff]  ;;  %v486_v55 = vld [vmem:[%s1480_s3 + $0x8] sm:$0xff] }
  0x21   :  { %131 = vmatpush1.msra.mxu0 %v56_v32  ;;  %818 = vmatprep.subr.mxu1 %v929_v4  ;;  %v485_v56 = vld [vmem:[%s1480_s3] sm:$0xff]  ;;  %v516_v58 = vld [vmem:[%s1480_s3 + $0xf8] sm:$0xff]  ;;  %v515_v59 = vld [vmem:[%s1480_s3 + $0xf0] sm:$0xff] }
  0x22   :  { %165 = vmatmul.mubr.f32.vlgmr.msra.gmra.mxu0 %v24_v34  ;;  %524 = vmatprep.subr.mxu0 %v929_v4  ;;  %v32_v57 = vld [vmem:[%s1477_s0 + $0x40] sm:$0xff]  ;;  %v33_v60 = vld [vmem:[%s1477_s0 + $0x48] sm:$0xff]  ;;  %v34_v63 = vld [vmem:[%s1477_s0 + $0x50] sm:$0xff]  ;;  %v90_v34 = vlaneseq }
  0x23   :  { %170 = vmatprep.mubr.f32.mxu0 %v929_v4  ;;  %525 = vmatpush1.msra.mxu0 %v500_v33  ;;  %v514_v61 = vld [vmem:[%s1480_s3 + $0xe8] sm:$0xff]  ;;  %v1197_v62 = vld [vmem:[%s1480_s3 + $0xe0] sm:$0xff]  ;;  %v512_v0 = vld [vmem:[%s1480_s3 + $0xd8] sm:$0xff] }
  0x24   :  { %526 = vmatprep.subr.mxu0 %v929_v4  ;;  %850 = vmatpush1.msra.mxu1 %v496_v40  ;;  %v35_v1 = vld [vmem:[%s1477_s0 + $0x58] sm:$0xff]  ;;  %v511_v2 = vld [vmem:[%s1480_s3 + $0xd0] sm:$0xff]  ;;  %v1223_v3 = vld [vmem:[%s1480_s3 + $0xc8] sm:$0xff] }
  0x25   :  { %527 = vmatpush1.msra.mxu0 %v499_v35  ;;  %819 = vmatprep.subr.mxu1 %v929_v4  ;;  %v36_v5 = vld [vmem:[%s1477_s0 + $0x60] sm:$0xff]  ;;  %v37_v7 = vld [vmem:[%s1477_s0 + $0x68] sm:$0xff]  ;;  %v508_v8 = vld [vmem:[%s1480_s3 + $0xb8] sm:$0xff]  ;;  %v91_v35 = vshrl.u32 %v90_v34, 7 }
  0x26   :  { %171 = vmatmul.mubr.f32.gmra.mxu0 %v25_v36  ;;  %528 = vmatprep.subr.mxu0 %v929_v4  ;;  %v509_v6 = vld [vmem:[%s1480_s3 + $0xc0] sm:$0xff]  ;;  %v38_v9 = vld [vmem:[%s1477_s0 + $0x70] sm:$0xff]  ;;  %v39_v11 = vld [vmem:[%s1477_s0 + $0x78] sm:$0xff] }
  0x27   :  { %176 = vmatprep.mubr.f32.mxu0 %v929_v4  ;;  %529 = vmatpush1.msra.mxu0 %v498_v37  ;;  %v507_v10 = vld [vmem:[%s1480_s3 + $0xb0] sm:$0xff]  ;;  %v506_v12 = vld [vmem:[%s1480_s3 + $0xa8] sm:$0xff]  ;;  %v505_v13 = vld [vmem:[%s1480_s3 + $0xa0] sm:$0xff]  ;;  %v92_v36 = vsub.s32 0, %v91_v35 }
  0x28   :  { %530 = vmatprep.subr.mxu0 %v929_v4  ;;  %851 = vmatpush1.msra.mxu1 %v495_v41  ;;  %v40_v14 = vld [vmem:[%s1477_s0 + $0x80] sm:$0xff]  ;;  %v504_v15 = vld [vmem:[%s1480_s3 + $0x98] sm:$0xff]  ;;  %v503_v16 = vld [vmem:[%s1480_s3 + $0x90] sm:$0xff] }
  0x29   :  { %531 = vmatpush1.msra.mxu0 %v497_v38  ;;  %820 = vmatprep.subr.mxu1 %v929_v4  ;;  %v41_v17 = vld [vmem:[%s1477_s0 + $0x88] sm:$0xff]  ;;  %v42_v19 = vld [vmem:[%s1477_s0 + $0x90] sm:$0xff]  ;;  %v501_v20 = vld [vmem:[%s1480_s3 + $0x80] sm:$0xff]  ;;  %v96_v38 = vsub.s32 1, %v91_v35 }
  0x2a   :  { %177 = vmatmul.mubr.f32.gmra.mxu0 %v26_v39  ;;  %532 = vmatprep.subr.mxu0 %v929_v4  ;;  %v502_v18 = vld [vmem:[%s1480_s3 + $0x88] sm:$0xff]  ;;  %v43_v21 = vld [vmem:[%s1477_s0 + $0x98] sm:$0xff]  ;;  %v44_v22 = vld [vmem:[%s1477_s0 + $0xa0] sm:$0xff]  ;;  %s930_s3 = smov [#allocation2]  }
  0x2b   :  { %182 = vmatprep.mubr.f32.mxu0 %v929_v4  ;;  %533 = vmatpush1.msra.mxu0 %v496_v40  ;;  %v45_v23 = vld [vmem:[%s1477_s0 + $0xa8] sm:$0xff]  ;;  %v46_v24 = vld [vmem:[%s1477_s0 + $0xb0] sm:$0xff]  ;;  %v47_v25 = vld [vmem:[%s1477_s0 + $0xb8] sm:$0xff]  ;;  %s786_s17 = sshll.u32 %s930_s3, 4  ;;  %s787_s17 = int_to_ptr.vmem [resolvable:$true] %s786_s17 }
  0x2c   :  { %534 = vmatprep.subr.mxu0 %v929_v4  ;;  %852 = vmatpush1.msra.mxu1 %v494_v43  ;;  %v48_v26 = vld [vmem:[%s1477_s0 + $0xc0] sm:$0xff]  ;;  %v49_v27 = vld [vmem:[%s1477_s0 + $0xc8] sm:$0xff]  ;;  %v50_v28 = vld [vmem:[%s1477_s0 + $0xd0] sm:$0xff]  ;;  %s885_s18 = scalar_lea.vmem %s787_s17, 8192  ;;  %p890_p1 = scmp.lt.s32.totalorder %s787_s17, %s787_s17 }
  0x2d   :  { %535 = vmatpush1.msra.mxu0 %v495_v41  ;;  %821 = vmatprep.subr.mxu1 %v929_v4  ;;  %v51_v29 = vld [vmem:[%s1477_s0 + $0xd8] sm:$0xff]  ;;  %v52_v30 = vld [vmem:[%s1477_s0 + $0xe0] sm:$0xff]  ;;  %v53_v31 = vld [vmem:[%s1477_s0 + $0xe8] sm:$0xff]  ;;  %p886_p0 = scmp.ne.s32.totalorder %s787_s17, %s885_s18  ;;  %p891_p2 = scmp.lt.s32.totalorder %s885_s18, %s885_s18 }
  0x2e   :  { %183 = vmatmul.mubr.f32.gmra.mxu0 %v27_v42  ;;  %536 = vmatprep.subr.mxu0 %v929_v4  ;;  %v54_v32 = vld [vmem:[%s1477_s0 + $0xf0] sm:$0xff]  ;;  %v55_v33 = vld [vmem:[%s1477_s0 + $0xf8] sm:$0xff]  ;;  %v88_v37 = vld [vmem:[%s1479_s2] sm:$0x3] }
  0x2f   :  { %188 = vmatprep.mubr.f32.mxu0 %v929_v4  ;;  %537 = vmatpush1.msra.mxu0 %v494_v43  ;;  %v1366_v39 = vrot.slane %v88_v37, %v92_v36  ;;  %v1368_v40 = vrot.slane %v88_v37, %v96_v38  ;;  %p892_p3 = por %p891_p2, %p890_p1 }
  0x30   :  { %538 = vmatprep.subr.mxu0 %v929_v4  ;;  %853 = vmatpush1.msra.mxu1 %v493_v44 }
  0x31   :  { %539 = vmatpush1.msra.mxu0 %v493_v44  ;;  %822 = vmatprep.subr.mxu1 %v929_v4  ;;  %p893_p4 = pnand %p892_p3, %p886_p0 }
  0x32   :  { %189 = vmatmul.mubr.f32.gmra.mxu0 %v28_v45  ;;  %540 = vmatprep.subr.mxu0 %v929_v4 }
  0x33   :  { %194 = vmatprep.mubr.f32.mxu0 %v929_v4  ;;  %541 = vmatpush1.msra.mxu0 %v492_v46 }
  0x34   :  { %542 = vmatprep.subr.mxu0 %v929_v4  ;;  %854 = vmatpush1.msra.mxu1 %v492_v46 }
  0x35   :  { %543 = vmatpush1.msra.mxu0 %v491_v47  ;;  %823 = vmatprep.subr.mxu1 %v929_v4 }
  0x36   :  { %195 = vmatmul.mubr.f32.gmra.mxu0 %v29_v48  ;;  %544 = vmatprep.subr.mxu0 %v929_v4 }
  0x37   :  { %200 = vmatprep.mubr.f32.mxu0 %v929_v4  ;;  %545 = vmatpush1.msra.mxu0 %v490_v49 }
  0x38   :  { %546 = vmatprep.subr.mxu0 %v929_v4  ;;  %855 = vmatpush1.msra.mxu1 %v491_v47 }
  0x39   :  { %547 = vmatpush1.msra.mxu0 %v489_v50  ;;  %824 = vmatprep.subr.mxu1 %v929_v4 }
  0x3a   :  { %201 = vmatmul.mubr.f32.gmra.mxu0 %v30_v51  ;;  %548 = vmatprep.subr.mxu0 %v929_v4 }
  0x3b   :  { %206 = vmatprep.mubr.f32.mxu0 %v929_v4  ;;  %549 = vmatpush1.msra.mxu0 %v488_v52 }
  0x3c   :  { %550 = vmatprep.subr.mxu0 %v929_v4  ;;  %856 = vmatpush1.msra.mxu1 %v490_v49 }
  0x3d   :  { %551 = vmatpush1.msra.mxu0 %v487_v53  ;;  %825 = vmatprep.subr.mxu1 %v929_v4 }
  0x3e   :  { %207 = vmatmul.mubr.f32.gmra.mxu0 %v31_v54  ;;  %552 = vmatprep.subr.mxu0 %v929_v4 }
  0x3f   :  { %212 = vmatprep.mubr.f32.mxu0 %v929_v4  ;;  %553 = vmatpush1.msra.mxu0 %v486_v55 }
  0x40   :  { %554 = vmatprep.subr.mxu0 %v929_v4  ;;  %857 = vmatpush1.msra.mxu1 %v489_v50 }
  0x41   :  { %555 = vmatpush1.msra.mxu0 %v485_v56  ;;  %826 = vmatprep.subr.mxu1 %v929_v4 }
  0x42   :  { %213 = vmatmul.mubr.f32.gmra.mxu0 %v32_v57  ;;  %556 = vmatprep.subr.mxu0 %v929_v4 }
  0x43   :  { %218 = vmatprep.mubr.f32.mxu0 %v929_v4  ;;  %557 = vmatpush2.msra.mxu0 %v516_v58 }
  0x44   :  { %558 = vmatprep.subr.mxu0 %v929_v4  ;;  %858 = vmatpush1.msra.mxu1 %v488_v52 }
  0x45   :  { %559 = vmatpush2.msra.mxu0 %v515_v59  ;;  %827 = vmatprep.subr.mxu1 %v929_v4 }
  0x46   :  { %219 = vmatmul.mubr.f32.gmra.mxu0 %v33_v60  ;;  %560 = vmatprep.subr.mxu0 %v929_v4 }
  0x47   :  { %224 = vmatprep.mubr.f32.mxu0 %v929_v4  ;;  %561 = vmatpush2.msra.mxu0 %v514_v61 }
  0x48   :  { %562 = vmatprep.subr.mxu0 %v929_v4  ;;  %859 = vmatpush1.msra.mxu1 %v487_v53 }
  0x49   :  { %563 = vmatpush2.msra.mxu0 %v1197_v62  ;;  %828 = vmatprep.subr.mxu1 %v929_v4 }
  0x4a   :  { %225 = vmatmul.mubr.f32.gmra.mxu0 %v34_v63  ;;  %564 = vmatprep.subr.mxu0 %v929_v4 }
  0x4b   :  { %230 = vmatprep.mubr.f32.mxu0 %v929_v4  ;;  %565 = vmatpush2.msra.mxu0 %v512_v0 }
  0x4c   :  { %566 = vmatprep.subr.mxu0 %v929_v4  ;;  %860 = vmatpush1.msra.mxu1 %v486_v55 }
  0x4d   :  { %567 = vmatpush2.msra.mxu0 %v511_v2  ;;  %829 = vmatprep.subr.mxu1 %v929_v4 }
  0x4e   :  { %231 = vmatmul.mubr.f32.gmra.mxu0 %v35_v1  ;;  %568 = vmatprep.subr.mxu0 %v929_v4 }
  0x4f   :  { %236 = vmatprep.mubr.f32.mxu0 %v929_v4  ;;  %569 = vmatpush2.msra.mxu0 %v1223_v3 }
  0x50   :  { %570 = vmatprep.subr.mxu0 %v929_v4  ;;  %861 = vmatpush1.msra.mxu1 %v485_v56 }
  0x51   :  { %571 = vmatpush2.msra.mxu0 %v509_v6  ;;  %830 = vmatprep.subr.mxu1 %v929_v4 }
  0x52   :  { %237 = vmatmul.mubr.f32.gmra.mxu0 %v36_v5  ;;  %572 = vmatprep.subr.mxu0 %v929_v4 }
  0x53   :  { %242 = vmatprep.mubr.f32.mxu0 %v929_v4  ;;  %862 = vmatpush2.msra.mxu1 %v516_v58 }
  0x54   :  { %573 = vmatpush2.msra.mxu0 %v508_v8  ;;  %831 = vmatprep.subr.mxu1 %v929_v4 }
  0x55   :  { %574 = vmatprep.subr.mxu0 %v929_v4  ;;  %863 = vmatpush2.msra.mxu1 %v515_v59 }
  0x56   :  { %243 = vmatmul.mubr.f32.gmra.mxu0 %v37_v7  ;;  %832 = vmatprep.subr.mxu1 %v929_v4 }
  0x57   :  { %248 = vmatprep.mubr.f32.mxu0 %v929_v4  ;;  %575 = vmatpush2.msra.mxu0 %v507_v10 }
  0x58   :  { %576 = vmatprep.subr.mxu0 %v929_v4  ;;  %864 = vmatpush2.msra.mxu1 %v514_v61 }
  0x59   :  { %577 = vmatpush2.msra.mxu0 %v506_v12  ;;  %833 = vmatprep.subr.mxu1 %v929_v4 }
  0x5a   :  { %249 = vmatmul.mubr.f32.gmra.mxu0 %v38_v9  ;;  %578 = vmatprep.subr.mxu0 %v929_v4 }
  0x5b   :  { %254 = vmatprep.mubr.f32.mxu0 %v929_v4  ;;  %865 = vmatpush2.msra.mxu1 %v1197_v62 }
  0x5c   :  { %579 = vmatpush2.msra.mxu0 %v505_v13  ;;  %834 = vmatprep.subr.mxu1 %v929_v4 }
  0x5d   :  { %580 = vmatprep.subr.mxu0 %v929_v4  ;;  %866 = vmatpush2.msra.mxu1 %v512_v0 }
  0x5e   :  { %255 = vmatmul.mubr.f32.gmra.mxu0 %v39_v11  ;;  %835 = vmatprep.subr.mxu1 %v929_v4 }
  0x5f   :  { %260 = vmatprep.mubr.f32.mxu0 %v929_v4  ;;  %581 = vmatpush2.msra.mxu0 %v504_v15 }
  0x60   :  { %582 = vmatprep.subr.mxu0 %v929_v4  ;;  %867 = vmatpush2.msra.mxu1 %v511_v2 }
  0x61   :  { %583 = vmatpush2.msra.mxu0 %v503_v16  ;;  %836 = vmatprep.subr.mxu1 %v929_v4 }
  0x62   :  { %261 = vmatmul.mubr.f32.gmra.mxu0 %v40_v14  ;;  %584 = vmatprep.subr.mxu0 %v929_v4 }
  0x63   :  { %266 = vmatprep.mubr.f32.mxu0 %v929_v4  ;;  %868 = vmatpush2.msra.mxu1 %v1223_v3 }
  0x64   :  { %585 = vmatpush2.msra.mxu0 %v502_v18  ;;  %837 = vmatprep.subr.mxu1 %v929_v4 }
  0x65   :  { %586 = vmatprep.subr.mxu0 %v929_v4  ;;  %869 = vmatpush2.msra.mxu1 %v509_v6 }
  0x66   :  { %267 = vmatmul.mubr.f32.gmra.mxu0 %v41_v17  ;;  %838 = vmatprep.subr.mxu1 %v929_v4 }
  0x67   :  { %272 = vmatprep.mubr.f32.mxu0 %v929_v4  ;;  %587 = vmatpush2.msra.mxu0 %v501_v20 }
  0x68   :  { %870 = vmatpush2.msra.mxu1 %v508_v8 }
  0x69   :  { %839 = vmatprep.subr.mxu1 %v929_v4 }
  0x6a   :  { %273 = vmatmul.mubr.f32.gmra.mxu0 %v42_v19  ;;  %871 = vmatpush2.msra.mxu1 %v507_v10 }
  0x6b   :  { %278 = vmatprep.mubr.f32.mxu0 %v929_v4  ;;  %840 = vmatprep.subr.mxu1 %v929_v4 }
  0x6c   :  { %872 = vmatpush2.msra.mxu1 %v506_v12 }
  0x6d   :  { %841 = vmatprep.subr.mxu1 %v929_v4 }
  0x6e   :  { %279 = vmatmul.mubr.f32.gmra.mxu0 %v43_v21  ;;  %873 = vmatpush2.msra.mxu1 %v505_v13 }
  0x6f   :  { %284 = vmatprep.mubr.f32.mxu0 %v929_v4  ;;  %842 = vmatprep.subr.mxu1 %v929_v4 }
  0x70   :  { %874 = vmatpush2.msra.mxu1 %v504_v15 }
  0x71   :  { %843 = vmatprep.subr.mxu1 %v929_v4 }
  0x72   :  { %285 = vmatmul.mubr.f32.gmra.mxu0 %v44_v22  ;;  %875 = vmatpush2.msra.mxu1 %v503_v16 }
  0x73   :  { %290 = vmatprep.mubr.f32.mxu0 %v929_v4  ;;  %844 = vmatprep.subr.mxu1 %v929_v4 }
  0x74   :  { %876 = vmatpush2.msra.mxu1 %v502_v18 }
  0x75   :  { %845 = vmatprep.subr.mxu1 %v929_v4 }
  0x76   :  { %291 = vmatmul.mubr.f32.gmra.mxu0 %v45_v23  ;;  %877 = vmatpush2.msra.mxu1 %v501_v20 }
  0x77   :  { %296 = vmatprep.mubr.f32.mxu0 %v929_v4 }
  0x7a   :  { %297 = vmatmul.mubr.f32.gmra.mxu0 %v46_v24 }
  0x7b   :  { %302 = vmatprep.mubr.f32.mxu0 %v929_v4 }
  0x7e   :  { %303 = vmatmul.mubr.f32.gmra.mxu0 %v47_v25 }
  0x7f   :  { %308 = vmatprep.mubr.f32.mxu0 %v929_v4 }
  0x82   :  { %309 = vmatmul.mubr.f32.gmra.mxu0 %v48_v26 }
  0x83   :  { %314 = vmatprep.mubr.f32.mxu0 %v929_v4 }
  0x86   :  { %315 = vmatmul.mubr.f32.gmra.mxu0 %v49_v27 }
  0x87   :  { %320 = vmatprep.mubr.f32.mxu0 %v929_v4 }
  0x8a   :  { %321 = vmatmul.mubr.f32.gmra.mxu0 %v50_v28 }
  0x8b   :  { %326 = vmatprep.mubr.f32.mxu0 %v929_v4 }
  0x8e   :  { %327 = vmatmul.mubr.f32.gmra.mxu0 %v51_v29 }
  0x8f   :  { %332 = vmatprep.mubr.f32.mxu0 %v929_v4 }
  0x92   :  { %333 = vmatmul.mubr.f32.gmra.mxu0 %v52_v30 }
  0x93   :  { %338 = vmatprep.mubr.f32.mxu0 %v929_v4 }
  0x96   :  { %339 = vmatmul.mubr.f32.gmra.mxu0 %v53_v31 }
  0x97   :  { %344 = vmatprep.mubr.f32.mxu0 %v929_v4 }
  0x9a   :  { %345 = vmatmul.mubr.f32.gmra.mxu0 %v54_v32 }
  0x9b   :  { %350 = vmatprep.mubr.f32.mxu0 %v929_v4 }
  0x9e   :  { %351 = vmatmul.mubr.f32.gmra.mxu0 %v55_v33 }
  0xe2   :  { %v166_v41 = vpop.f32.mrf.mxu0 }
  0xe3   :  { %v167_v4 = vadd.f32 %v166_v41, %v1366_v39 }
  0xe4   :  { %v168_v42 = vpop.f32.mrf.mxu0 }
  0xe5   :  { %357 = vst [vmem:[#allocation2] sm:$0xff] %v167_v4  ;;  %v169_v43 = vadd.f32 %v168_v42, %v1368_v40 }
  0xe6   :  { %v172_v44 = vpop.f32.mrf.mxu0 }
  0xe7   :  { %358 = vst [vmem:[#allocation2 + $0x8] sm:$0xff] %v169_v43  ;;  %v173_v45 = vadd.f32 %v172_v44, %v1366_v39  ;;  %588 = vmatprep.mubr.f32.mxu0 %v169_v43 }
  0xe8   :  { %v174_v46 = vpop.f32.mrf.mxu0  ;;  %589 = vmatmul.mubr.f32.vlgmr.msra.gmra.mxu0 %v167_v4 }
  0xe9   :  { %359 = vst [vmem:[#allocation2 + $0x10] sm:$0xff] %v173_v45  ;;  %v175_v47 = vadd.f32 %v174_v46, %v1368_v40 }
  0xea   :  { %v178_v48 = vpop.f32.mrf.mxu0 }
  0xeb   :  { %360 = vst [vmem:[#allocation2 + $0x18] sm:$0xff] %v175_v47  ;;  %v179_v49 = vadd.f32 %v178_v48, %v1366_v39  ;;  %593 = vmatprep.mubr.f32.mxu0 %v175_v47 }
  0xec   :  { %v180_v50 = vpop.f32.mrf.mxu0  ;;  %594 = vmatmul.mubr.f32.gmra.mxu0 %v173_v45 }
  0xed   :  { %361 = vst [vmem:[#allocation2 + $0x20] sm:$0xff] %v179_v49  ;;  %v181_v51 = vadd.f32 %v180_v50, %v1368_v40 }
  0xee   :  { %v184_v52 = vpop.f32.mrf.mxu0 }
  0xef   :  { %362 = vst [vmem:[#allocation2 + $0x28] sm:$0xff] %v181_v51  ;;  %v185_v53 = vadd.f32 %v184_v52, %v1366_v39  ;;  %598 = vmatprep.mubr.f32.mxu0 %v181_v51 }
  0xf0   :  { %v186_v54 = vpop.f32.mrf.mxu0  ;;  %599 = vmatmul.mubr.f32.gmra.mxu0 %v179_v49 }
  0xf1   :  { %363 = vst [vmem:[#allocation2 + $0x30] sm:$0xff] %v185_v53  ;;  %v187_v55 = vadd.f32 %v186_v54, %v1368_v40 }
  0xf2   :  { %v190_v56 = vpop.f32.mrf.mxu0 }
  0xf3   :  { %364 = vst [vmem:[#allocation2 + $0x38] sm:$0xff] %v187_v55  ;;  %v191_v57 = vadd.f32 %v190_v56, %v1366_v39  ;;  %603 = vmatprep.mubr.f32.mxu0 %v187_v55 }
  0xf4   :  { %v192_v58 = vpop.f32.mrf.mxu0  ;;  %604 = vmatmul.mubr.f32.gmra.mxu0 %v185_v53 }
  0xf5   :  { %365 = vst [vmem:[#allocation2 + $0x40] sm:$0xff] %v191_v57  ;;  %v193_v59 = vadd.f32 %v192_v58, %v1368_v40 }
  0xf6   :  { %v196_v60 = vpop.f32.mrf.mxu0 }
  0xf7   :  { %366 = vst [vmem:[#allocation2 + $0x48] sm:$0xff] %v193_v59  ;;  %v197_v61 = vadd.f32 %v196_v60, %v1366_v39  ;;  %608 = vmatprep.mubr.f32.mxu1 %v193_v59 }
  0xf8   :  { %v198_v62 = vpop.f32.mrf.mxu0  ;;  %609 = vmatmul.mubr.f32.vlgmr.msra.gmra.mxu1 %v191_v57 }
  0xf9   :  { %367 = vst [vmem:[#allocation2 + $0x50] sm:$0xff] %v197_v61  ;;  %v199_v63 = vadd.f32 %v198_v62, %v1368_v40 }
  0xfa   :  { %v202_v0 = vpop.f32.mrf.mxu0 }
  0xfb   :  { %368 = vst [vmem:[#allocation2 + $0x58] sm:$0xff] %v199_v63  ;;  %v203_v1 = vadd.f32 %v202_v0, %v1366_v39  ;;  %613 = vmatprep.mubr.f32.mxu1 %v199_v63 }
  0xfc   :  { %v204_v2 = vpop.f32.mrf.mxu0  ;;  %614 = vmatmul.mubr.f32.gmra.mxu1 %v197_v61 }
  0xfd   :  { %369 = vst [vmem:[#allocation2 + $0x60] sm:$0xff] %v203_v1  ;;  %v205_v3 = vadd.f32 %v204_v2, %v1368_v40 }
  0xfe   :  { %v208_v5 = vpop.f32.mrf.mxu0 }
  0xff   :  { %370 = vst [vmem:[#allocation2 + $0x68] sm:$0xff] %v205_v3  ;;  %v209_v6 = vadd.f32 %v208_v5, %v1366_v39  ;;  %618 = vmatprep.mubr.f32.mxu1 %v205_v3 }
 0x100   :  { %v210_v7 = vpop.f32.mrf.mxu0  ;;  %619 = vmatmul.mubr.f32.gmra.mxu1 %v203_v1 }
 0x101   :  { %371 = vst [vmem:[#allocation2 + $0x70] sm:$0xff] %v209_v6  ;;  %v211_v8 = vadd.f32 %v210_v7, %v1368_v40 }
 0x102   :  { %v214_v9 = vpop.f32.mrf.mxu0 }
 0x103   :  { %372 = vst [vmem:[#allocation2 + $0x78] sm:$0xff] %v211_v8  ;;  %v215_v10 = vadd.f32 %v214_v9, %v1366_v39  ;;  %623 = vmatprep.mubr.f32.mxu1 %v211_v8 }
 0x104   :  { %v216_v11 = vpop.f32.mrf.mxu0  ;;  %624 = vmatmul.mubr.f32.gmra.mxu1 %v209_v6 }
 0x105   :  { %373 = vst [vmem:[#allocation2 + $0x80] sm:$0xff] %v215_v10  ;;  %v217_v12 = vadd.f32 %v216_v11, %v1368_v40 }
 0x106   :  { %v220_v13 = vpop.f32.mrf.mxu0 }
 0x107   :  { %374 = vst [vmem:[#allocation2 + $0x88] sm:$0xff] %v217_v12  ;;  %v221_v14 = vadd.f32 %v220_v13, %v1366_v39  ;;  %628 = vmatprep.mubr.f32.mxu1 %v217_v12 }
 0x108   :  { %v222_v15 = vpop.f32.mrf.mxu0  ;;  %629 = vmatmul.mubr.f32.gmra.mxu1 %v215_v10 }
 0x109   :  { %375 = vst [vmem:[#allocation2 + $0x90] sm:$0xff] %v221_v14  ;;  %v223_v16 = vadd.f32 %v222_v15, %v1368_v40 }
 0x10a   :  { %v226_v17 = vpop.f32.mrf.mxu0 }
 0x10b   :  { %376 = vst [vmem:[#allocation2 + $0x98] sm:$0xff] %v223_v16  ;;  %v227_v18 = vadd.f32 %v226_v17, %v1366_v39  ;;  %633 = vmatprep.mubr.f32.mxu1 %v223_v16 }
 0x10c   :  { %v228_v19 = vpop.f32.mrf.mxu0  ;;  %634 = vmatmul.mubr.f32.gmra.mxu1 %v221_v14 }
 0x10d   :  { %377 = vst [vmem:[#allocation2 + $0xa0] sm:$0xff] %v227_v18  ;;  %v229_v20 = vadd.f32 %v228_v19, %v1368_v40 }
 0x10e   :  { %v232_v21 = vpop.f32.mrf.mxu0 }
 0x10f   :  { %378 = vst [vmem:[#allocation2 + $0xa8] sm:$0xff] %v229_v20  ;;  %v233_v22 = vadd.f32 %v232_v21, %v1366_v39  ;;  %638 = vmatprep.mubr.f32.mxu1 %v229_v20 }
 0x110   :  { %v234_v23 = vpop.f32.mrf.mxu0  ;;  %639 = vmatmul.mubr.f32.gmra.mxu1 %v227_v18 }
 0x111   :  { %379 = vst [vmem:[#allocation2 + $0xb0] sm:$0xff] %v233_v22  ;;  %v235_v24 = vadd.f32 %v234_v23, %v1368_v40 }
 0x112   :  { %v238_v25 = vpop.f32.mrf.mxu0 }
 0x113   :  { %380 = vst [vmem:[#allocation2 + $0xb8] sm:$0xff] %v235_v24  ;;  %v239_v26 = vadd.f32 %v238_v25, %v1366_v39  ;;  %643 = vmatprep.mubr.f32.mxu1 %v235_v24 }
 0x114   :  { %v240_v27 = vpop.f32.mrf.mxu0  ;;  %644 = vmatmul.mubr.f32.gmra.mxu1 %v233_v22 }
 0x115   :  { %381 = vst [vmem:[#allocation2 + $0xc0] sm:$0xff] %v239_v26  ;;  %v241_v28 = vadd.f32 %v240_v27, %v1368_v40 }
 0x116   :  { %v244_v29 = vpop.f32.mrf.mxu0 }
 0x117   :  { %382 = vst [vmem:[#allocation2 + $0xc8] sm:$0xff] %v241_v28  ;;  %v245_v30 = vadd.f32 %v244_v29, %v1366_v39  ;;  %648 = vmatprep.mubr.f32.mxu1 %v241_v28 }
 0x118   :  { %v246_v31 = vpop.f32.mrf.mxu0  ;;  %649 = vmatmul.mubr.f32.gmra.mxu1 %v239_v26 }
 0x119   :  { %383 = vst [vmem:[#allocation2 + $0xd0] sm:$0xff] %v245_v30  ;;  %v247_v32 = vadd.f32 %v246_v31, %v1368_v40 }
 0x11a   :  { %v250_v33 = vpop.f32.mrf.mxu0 }
 0x11b   :  { %384 = vst [vmem:[#allocation2 + $0xd8] sm:$0xff] %v247_v32  ;;  %v251_v34 = vadd.f32 %v250_v33, %v1366_v39  ;;  %653 = vmatprep.mubr.f32.mxu1 %v247_v32 }
 0x11c   :  { %v252_v35 = vpop.f32.mrf.mxu0  ;;  %654 = vmatmul.mubr.f32.gmra.mxu1 %v245_v30 }
 0x11d   :  { %385 = vst [vmem:[#allocation2 + $0xe0] sm:$0xff] %v251_v34  ;;  %v253_v36 = vadd.f32 %v252_v35, %v1368_v40 }
 0x11e   :  { %v256_v37 = vpop.f32.mrf.mxu0 }
 0x11f   :  { %386 = vst [vmem:[#allocation2 + $0xe8] sm:$0xff] %v253_v36  ;;  %v257_v38 = vadd.f32 %v256_v37, %v1366_v39  ;;  %658 = vmatprep.mubr.f32.mxu1 %v253_v36 }
 0x120   :  { %v258_v41 = vpop.f32.mrf.mxu0  ;;  %659 = vmatmul.mubr.f32.gmra.mxu1 %v251_v34 }
 0x121   :  { %387 = vst [vmem:[#allocation2 + $0xf0] sm:$0xff] %v257_v38  ;;  %v259_v4 = vadd.f32 %v258_v41, %v1368_v40 }
 0x122   :  { %v262_v42 = vpop.f32.mrf.mxu0 }
 0x123   :  { %388 = vst [vmem:[#allocation2 + $0xf8] sm:$0xff] %v259_v4  ;;  %v263_v43 = vadd.f32 %v262_v42, %v1366_v39  ;;  %663 = vmatprep.mubr.f32.mxu1 %v259_v4 }
 0x124   :  { %v264_v44 = vpop.f32.mrf.mxu0  ;;  %664 = vmatmul.mubr.f32.gmra.mxu1 %v257_v38 }
 0x125   :  { %389 = vst [vmem:[#allocation2 + $0x100] sm:$0xff] %v263_v43  ;;  %v265_v45 = vadd.f32 %v264_v44, %v1368_v40  ;;  %v1437_v44 = vld [vmem:[%s1481_s4] ss:$0 sm:$0xff] }
 0x126   :  { %v268_v46 = vpop.f32.mrf.mxu0 }
 0x127   :  { %390 = vst [vmem:[#allocation2 + $0x108] sm:$0xff] %v265_v45  ;;  %v269_v47 = vadd.f32 %v268_v46, %v1366_v39  ;;  %668 = vmatprep.mubr.f32.mxu1 %v265_v45 }
 0x128   :  { %v270_v48 = vpop.f32.mrf.mxu0  ;;  %669 = vmatmul.mubr.f32.gmra.mxu1 %v263_v43 }
 0x129   :  { %391 = vst [vmem:[#allocation2 + $0x110] sm:$0xff] %v269_v47  ;;  %v271_v49 = vadd.f32 %v270_v48, %v1368_v40 }
 0x12a   :  { %v274_v50 = vpop.f32.mrf.mxu0 }
 0x12b   :  { %392 = vst [vmem:[#allocation2 + $0x118] sm:$0xff] %v271_v49  ;;  %v275_v51 = vadd.f32 %v274_v50, %v1366_v39  ;;  %673 = vmatprep.mubr.f32.mxu1 %v271_v49 }
 0x12c   :  { %v276_v52 = vpop.f32.mrf.mxu0  ;;  %674 = vmatmul.mubr.f32.gmra.mxu1 %v269_v47 }
 0x12d   :  { %393 = vst [vmem:[#allocation2 + $0x120] sm:$0xff] %v275_v51  ;;  %v277_v53 = vadd.f32 %v276_v52, %v1368_v40 }
 0x12e   :  { %v280_v54 = vpop.f32.mrf.mxu0 }
 0x12f   :  { %394 = vst [vmem:[#allocation2 + $0x128] sm:$0xff] %v277_v53  ;;  %v281_v55 = vadd.f32 %v280_v54, %v1366_v39  ;;  %678 = vmatprep.mubr.f32.mxu1 %v277_v53 }
 0x130   :  { %v282_v56 = vpop.f32.mrf.mxu0  ;;  %679 = vmatmul.mubr.f32.gmra.mxu1 %v275_v51 }
 0x131   :  { %395 = vst [vmem:[#allocation2 + $0x130] sm:$0xff] %v281_v55  ;;  %v283_v57 = vadd.f32 %v282_v56, %v1368_v40 }
 0x132   :  { %v286_v58 = vpop.f32.mrf.mxu0 }
 0x133   :  { %396 = vst [vmem:[#allocation2 + $0x138] sm:$0xff] %v283_v57  ;;  %v287_v59 = vadd.f32 %v286_v58, %v1366_v39  ;;  %683 = vmatprep.mubr.f32.mxu1 %v283_v57 }
 0x134   :  { %v288_v60 = vpop.f32.mrf.mxu0  ;;  %684 = vmatmul.mubr.f32.gmra.mxu1 %v281_v55 }
 0x135   :  { %397 = vst [vmem:[#allocation2 + $0x140] sm:$0xff] %v287_v59  ;;  %v289_v61 = vadd.f32 %v288_v60, %v1368_v40 }
 0x136   :  { %v292_v62 = vpop.f32.mrf.mxu0 }
 0x137   :  { %398 = vst [vmem:[#allocation2 + $0x148] sm:$0xff] %v289_v61  ;;  %v293_v63 = vadd.f32 %v292_v62, %v1366_v39  ;;  %688 = vmatprep.mubr.f32.mxu1 %v289_v61 }
 0x138   :  { %v294_v0 = vpop.f32.mrf.mxu0  ;;  %689 = vmatmul.mubr.f32.gmra.mxu1 %v287_v59 }
 0x139   :  { %399 = vst [vmem:[#allocation2 + $0x150] sm:$0xff] %v293_v63  ;;  %v295_v1 = vadd.f32 %v294_v0, %v1368_v40 }
 0x13a   :  { %v298_v2 = vpop.f32.mrf.mxu0 }
 0x13b   :  { %400 = vst [vmem:[#allocation2 + $0x158] sm:$0xff] %v295_v1  ;;  %v299_v3 = vadd.f32 %v298_v2, %v1366_v39  ;;  %693 = vmatprep.mubr.f32.mxu1 %v295_v1 }
 0x13c   :  { %v300_v5 = vpop.f32.mrf.mxu0  ;;  %694 = vmatmul.mubr.f32.gmra.mxu1 %v293_v63 }
 0x13d   :  { %401 = vst [vmem:[#allocation2 + $0x160] sm:$0xff] %v299_v3  ;;  %v301_v6 = vadd.f32 %v300_v5, %v1368_v40 }
 0x13e   :  { %v304_v7 = vpop.f32.mrf.mxu0 }
 0x13f   :  { %402 = vst [vmem:[#allocation2 + $0x168] sm:$0xff] %v301_v6  ;;  %v305_v8 = vadd.f32 %v304_v7, %v1366_v39  ;;  %698 = vmatprep.mubr.f32.mxu1 %v301_v6 }
 0x140   :  { %v306_v9 = vpop.f32.mrf.mxu0  ;;  %699 = vmatmul.mubr.f32.gmra.mxu1 %v299_v3 }
 0x141   :  { %403 = vst [vmem:[#allocation2 + $0x170] sm:$0xff] %v305_v8  ;;  %v307_v10 = vadd.f32 %v306_v9, %v1368_v40 }
 0x142   :  { %v310_v11 = vpop.f32.mrf.mxu0 }
 0x143   :  { %404 = vst [vmem:[#allocation2 + $0x178] sm:$0xff] %v307_v10  ;;  %v311_v12 = vadd.f32 %v310_v11, %v1366_v39  ;;  %703 = vmatprep.mubr.f32.mxu1 %v307_v10 }
 0x144   :  { %v312_v13 = vpop.f32.mrf.mxu0  ;;  %704 = vmatmul.mubr.f32.gmra.mxu1 %v305_v8 }
 0x145   :  { %405 = vst [vmem:[#allocation2 + $0x180] sm:$0xff] %v311_v12  ;;  %v313_v14 = vadd.f32 %v312_v13, %v1368_v40 }
 0x146   :  { %v316_v15 = vpop.f32.mrf.mxu0 }
 0x147   :  { %406 = vst [vmem:[#allocation2 + $0x188] sm:$0xff] %v313_v14  ;;  %v317_v16 = vadd.f32 %v316_v15, %v1366_v39  ;;  %708 = vmatprep.mubr.f32.mxu1 %v313_v14 }
 0x148   :  { %v318_v17 = vpop.f32.mrf.mxu0  ;;  %709 = vmatmul.mubr.f32.gmra.mxu1 %v311_v12 }
 0x149   :  { %407 = vst [vmem:[#allocation2 + $0x190] sm:$0xff] %v317_v16  ;;  %v319_v18 = vadd.f32 %v318_v17, %v1368_v40 }
 0x14a   :  { %v322_v19 = vpop.f32.mrf.mxu0 }
 0x14b   :  { %408 = vst [vmem:[#allocation2 + $0x198] sm:$0xff] %v319_v18  ;;  %v323_v20 = vadd.f32 %v322_v19, %v1366_v39  ;;  %713 = vmatprep.mubr.f32.mxu1 %v319_v18 }
 0x14c   :  { %v324_v21 = vpop.f32.mrf.mxu0  ;;  %714 = vmatmul.mubr.f32.gmra.mxu1 %v317_v16 }
 0x14d   :  { %409 = vst [vmem:[#allocation2 + $0x1a0] sm:$0xff] %v323_v20  ;;  %v325_v22 = vadd.f32 %v324_v21, %v1368_v40 }
 0x14e   :  { %v328_v23 = vpop.f32.mrf.mxu0 }
 0x14f   :  { %410 = vst [vmem:[#allocation2 + $0x1a8] sm:$0xff] %v325_v22  ;;  %v329_v24 = vadd.f32 %v328_v23, %v1366_v39  ;;  %718 = vmatprep.mubr.f32.mxu1 %v325_v22 }
 0x150   :  { %v330_v25 = vpop.f32.mrf.mxu0  ;;  %719 = vmatmul.mubr.f32.gmra.mxu1 %v323_v20 }
 0x151   :  { %411 = vst [vmem:[#allocation2 + $0x1b0] sm:$0xff] %v329_v24  ;;  %v331_v26 = vadd.f32 %v330_v25, %v1368_v40 }
 0x152   :  { %v334_v27 = vpop.f32.mrf.mxu0 }
 0x153   :  { %412 = vst [vmem:[#allocation2 + $0x1b8] sm:$0xff] %v331_v26  ;;  %v335_v28 = vadd.f32 %v334_v27, %v1366_v39  ;;  %723 = vmatprep.mubr.f32.mxu1 %v331_v26 }
 0x154   :  { %v336_v29 = vpop.f32.mrf.mxu0  ;;  %724 = vmatmul.mubr.f32.gmra.mxu1 %v329_v24 }
 0x155   :  { %413 = vst [vmem:[#allocation2 + $0x1c0] sm:$0xff] %v335_v28  ;;  %v337_v30 = vadd.f32 %v336_v29, %v1368_v40 }
 0x156   :  { %v340_v31 = vpop.f32.mrf.mxu0 }
 0x157   :  { %414 = vst [vmem:[#allocation2 + $0x1c8] sm:$0xff] %v337_v30  ;;  %v341_v32 = vadd.f32 %v340_v31, %v1366_v39  ;;  %728 = vmatprep.mubr.f32.mxu1 %v337_v30 }
 0x158   :  { %v342_v33 = vpop.f32.mrf.mxu0  ;;  %729 = vmatmul.mubr.f32.gmra.mxu1 %v335_v28 }
 0x159   :  { %415 = vst [vmem:[#allocation2 + $0x1d0] sm:$0xff] %v341_v32  ;;  %v343_v34 = vadd.f32 %v342_v33, %v1368_v40 }
 0x15a   :  { %v346_v35 = vpop.f32.mrf.mxu0 }
 0x15b   :  { %416 = vst [vmem:[#allocation2 + $0x1d8] sm:$0xff] %v343_v34  ;;  %v347_v36 = vadd.f32 %v346_v35, %v1366_v39  ;;  %733 = vmatprep.mubr.f32.mxu1 %v343_v34 }
 0x15c   :  { %v348_v37 = vpop.f32.mrf.mxu0  ;;  %734 = vmatmul.mubr.f32.gmra.mxu1 %v341_v32 }
 0x15d   :  { %417 = vst [vmem:[#allocation2 + $0x1e0] sm:$0xff] %v347_v36  ;;  %v349_v38 = vadd.f32 %v348_v37, %v1368_v40 }
 0x15e   :  { %v352_v41 = vpop.f32.mrf.mxu0 }
 0x15f   :  { %418 = vst [vmem:[#allocation2 + $0x1e8] sm:$0xff] %v349_v38  ;;  %v353_v4 = vadd.f32 %v352_v41, %v1366_v39  ;;  %738 = vmatprep.mubr.f32.mxu1 %v349_v38 }
 0x160   :  { %v354_v42 = vpop.f32.mrf.mxu0  ;;  %739 = vmatmul.mubr.f32.gmra.mxu1 %v347_v36 }
 0x161   :  { %419 = vst [vmem:[#allocation2 + $0x1f0] sm:$0xff] %v353_v4  ;;  %v355_v43 = vadd.f32 %v354_v42, %v1368_v40 }
 0x163   :  { %420 = vst [vmem:[#allocation2 + $0x1f8] sm:$0xff] %v355_v43  ;;  %743 = vmatprep.mubr.f32.mxu1 %v355_v43 }
 0x164   :  { %744 = vmatmul.mubr.f32.gmra.mxu1 %v353_v4 }
 0x1a8   :  { %v590_v45 = vpop.f32.mrf.mxu0 }
 0x1a9   :  { %v591_v39 = vadd.f32 %v1437_v44, %v590_v45 }
 0x1aa   :  { %896 = shalt.err (!%p893_p4)
}
 0x1ab   :  { %s931_s1 = smov 256   ;;  %s932_s19 = smov 16   ;;  %v592_v40 = vpop.f32.mrf.mxu0  ;;  %749 = vst [vmem:[#allocation4] sm:$0xff] %v591_v39 }
 0x1ac   :  { %792 = dma.vmem_to_hbm [thread:$0]  %s787_s17, 8192, %s1482_s5, [#allocation3], %s931_s1, %s931_s1, %s932_s19  }
 0x1ad   :  { %v595_v46 = vpop.f32.mrf.mxu0  ;;  %s933_s4 = smov [#allocation4]  }
 0x1ae   :  { %v596_v47 = vadd.f32 %v1437_v44, %v595_v46  ;;  %s798_s5 = sshll.u32 %s933_s4, 4  ;;  %s799_s5 = int_to_ptr.vmem [resolvable:$true] %s798_s5 }
 0x1af   :  { %v597_v48 = vpop.f32.mrf.mxu0  ;;  %s905_s22 = scalar_lea.vmem %s799_s5, 4096  ;;  %p910_p6 = scmp.lt.s32.totalorder %s799_s5, %s799_s5 }
 0x1b0   :  { %750 = vst [vmem:[#allocation4 + $0x8] sm:$0xff] %v596_v47  ;;  %p906_p5 = scmp.ne.s32.totalorder %s799_s5, %s905_s22  ;;  %p911_p7 = scmp.lt.s32.totalorder %s905_s22, %s905_s22 }
 0x1b1   :  { %v600_v49 = vpop.f32.mrf.mxu0 }
 0x1b2   :  { %v601_v50 = vadd.f32 %v1437_v44, %v600_v49  ;;  %p912_p8 = por %p911_p7, %p910_p6 }
 0x1b3   :  { %v602_v51 = vpop.f32.mrf.mxu0 }
 0x1b4   :  { %751 = vst [vmem:[#allocation4 + $0x10] sm:$0xff] %v601_v50  ;;  %p913_p9 = pnand %p912_p8, %p906_p5 }
 0x1b5   :  { %v605_v52 = vpop.f32.mrf.mxu0 }
 0x1b6   :  { %v606_v53 = vadd.f32 %v1437_v44, %v605_v52 }
 0x1b7   :  { %v607_v54 = vpop.f32.mrf.mxu0 }
 0x1b8   :  { %752 = vst [vmem:[#allocation4 + $0x18] sm:$0xff] %v606_v53  ;;  %v610_v55 = vpop.f32.mrf.mxu1 }
 0x1b9   :  { %v611_v56 = vadd.f32 %v1437_v44, %v610_v55 }
 0x1ba   :  { %v612_v57 = vpop.f32.mrf.mxu1 }
 0x1bb   :  { %753 = vst [vmem:[#allocation4 + $0x20] sm:$0xff] %v611_v56 }
 0x1bc   :  { %v615_v58 = vpop.f32.mrf.mxu1 }
 0x1bd   :  { %v616_v59 = vadd.f32 %v1437_v44, %v615_v58 }
 0x1be   :  { %v617_v60 = vpop.f32.mrf.mxu1 }
 0x1bf   :  { %754 = vst [vmem:[#allocation4 + $0x28] sm:$0xff] %v616_v59 }
 0x1c0   :  { %v620_v61 = vpop.f32.mrf.mxu1 }
 0x1c1   :  { %v621_v62 = vadd.f32 %v1437_v44, %v620_v61 }
 0x1c2   :  { %v622_v63 = vpop.f32.mrf.mxu1 }
 0x1c3   :  { %755 = vst [vmem:[#allocation4 + $0x30] sm:$0xff] %v621_v62 }
 0x1c4   :  { %v625_v0 = vpop.f32.mrf.mxu1 }
 0x1c5   :  { %v626_v1 = vadd.f32 %v1437_v44, %v625_v0 }
 0x1c6   :  { %v627_v2 = vpop.f32.mrf.mxu1 }
 0x1c7   :  { %756 = vst [vmem:[#allocation4 + $0x38] sm:$0xff] %v626_v1 }
 0x1c8   :  { %v630_v3 = vpop.f32.mrf.mxu1 }
 0x1c9   :  { %v631_v5 = vadd.f32 %v1437_v44, %v630_v3 }
 0x1ca   :  { %v632_v6 = vpop.f32.mrf.mxu1 }
 0x1cb   :  { %757 = vst [vmem:[#allocation4 + $0x40] sm:$0xff] %v631_v5 }
 0x1cc   :  { %v635_v7 = vpop.f32.mrf.mxu1 }
 0x1cd   :  { %v636_v8 = vadd.f32 %v1437_v44, %v635_v7 }
 0x1ce   :  { %v637_v9 = vpop.f32.mrf.mxu1 }
 0x1cf   :  { %758 = vst [vmem:[#allocation4 + $0x48] sm:$0xff] %v636_v8 }
 0x1d0   :  { %v640_v10 = vpop.f32.mrf.mxu1 }
 0x1d1   :  { %v641_v11 = vadd.f32 %v1437_v44, %v640_v10 }
 0x1d2   :  { %v642_v12 = vpop.f32.mrf.mxu1 }
 0x1d3   :  { %759 = vst [vmem:[#allocation4 + $0x50] sm:$0xff] %v641_v11 }
 0x1d4   :  { %v645_v13 = vpop.f32.mrf.mxu1 }
 0x1d5   :  { %v646_v14 = vadd.f32 %v1437_v44, %v645_v13 }
 0x1d6   :  { %v647_v15 = vpop.f32.mrf.mxu1 }
 0x1d7   :  { %760 = vst [vmem:[#allocation4 + $0x58] sm:$0xff] %v646_v14 }
 0x1d8   :  { %v650_v16 = vpop.f32.mrf.mxu1 }
 0x1d9   :  { %v651_v17 = vadd.f32 %v1437_v44, %v650_v16 }
 0x1da   :  { %v652_v18 = vpop.f32.mrf.mxu1 }
 0x1db   :  { %761 = vst [vmem:[#allocation4 + $0x60] sm:$0xff] %v651_v17 }
 0x1dc   :  { %v655_v19 = vpop.f32.mrf.mxu1 }
 0x1dd   :  { %v656_v20 = vadd.f32 %v1437_v44, %v655_v19 }
 0x1de   :  { %v657_v21 = vpop.f32.mrf.mxu1 }
 0x1df   :  { %762 = vst [vmem:[#allocation4 + $0x68] sm:$0xff] %v656_v20 }
 0x1e0   :  { %v660_v22 = vpop.f32.mrf.mxu1 }
 0x1e1   :  { %v661_v23 = vadd.f32 %v1437_v44, %v660_v22 }
 0x1e2   :  { %v662_v24 = vpop.f32.mrf.mxu1 }
 0x1e3   :  { %763 = vst [vmem:[#allocation4 + $0x70] sm:$0xff] %v661_v23 }
 0x1e4   :  { %v665_v25 = vpop.f32.mrf.mxu1 }
 0x1e5   :  { %v666_v26 = vadd.f32 %v1437_v44, %v665_v25 }
 0x1e6   :  { %v667_v27 = vpop.f32.mrf.mxu1 }
 0x1e7   :  { %764 = vst [vmem:[#allocation4 + $0x78] sm:$0xff] %v666_v26 }
 0x1e8   :  { %v670_v28 = vpop.f32.mrf.mxu1 }
 0x1e9   :  { %v671_v29 = vadd.f32 %v1437_v44, %v670_v28 }
 0x1ea   :  { %v672_v30 = vpop.f32.mrf.mxu1 }
 0x1eb   :  { %765 = vst [vmem:[#allocation4 + $0x80] sm:$0xff] %v671_v29 }
 0x1ec   :  { %v675_v31 = vpop.f32.mrf.mxu1 }
 0x1ed   :  { %v676_v32 = vadd.f32 %v1437_v44, %v675_v31 }
 0x1ee   :  { %v677_v33 = vpop.f32.mrf.mxu1 }
 0x1ef   :  { %766 = vst [vmem:[#allocation4 + $0x88] sm:$0xff] %v676_v32 }
 0x1f0   :  { %v680_v34 = vpop.f32.mrf.mxu1 }
 0x1f1   :  { %v681_v35 = vadd.f32 %v1437_v44, %v680_v34 }
 0x1f2   :  { %v682_v36 = vpop.f32.mrf.mxu1 }
 0x1f3   :  { %767 = vst [vmem:[#allocation4 + $0x90] sm:$0xff] %v681_v35 }
 0x1f4   :  { %v685_v37 = vpop.f32.mrf.mxu1 }
 0x1f5   :  { %v686_v38 = vadd.f32 %v1437_v44, %v685_v37 }
 0x1f6   :  { %v687_v41 = vpop.f32.mrf.mxu1 }
 0x1f7   :  { %768 = vst [vmem:[#allocation4 + $0x98] sm:$0xff] %v686_v38 }
 0x1f8   :  { %v690_v4 = vpop.f32.mrf.mxu1 }
 0x1f9   :  { %v691_v42 = vadd.f32 %v1437_v44, %v690_v4 }
 0x1fa   :  { %v692_v43 = vpop.f32.mrf.mxu1 }
 0x1fb   :  { %769 = vst [vmem:[#allocation4 + $0xa0] sm:$0xff] %v691_v42 }
 0x1fc   :  { %v695_v45 = vpop.f32.mrf.mxu1 }
 0x1fd   :  { %v696_v39 = vadd.f32 %v1437_v44, %v695_v45 }
 0x1fe   :  { %v697_v40 = vpop.f32.mrf.mxu1 }
 0x1ff   :  { %770 = vst [vmem:[#allocation4 + $0xa8] sm:$0xff] %v696_v39 }
 0x200   :  { %v700_v46 = vpop.f32.mrf.mxu1 }
 0x201   :  { %v701_v47 = vadd.f32 %v1437_v44, %v700_v46 }
 0x202   :  { %v702_v48 = vpop.f32.mrf.mxu1 }
 0x203   :  { %771 = vst [vmem:[#allocation4 + $0xb0] sm:$0xff] %v701_v47 }
 0x204   :  { %v705_v49 = vpop.f32.mrf.mxu1 }
 0x205   :  { %v706_v50 = vadd.f32 %v1437_v44, %v705_v49 }
 0x206   :  { %v707_v51 = vpop.f32.mrf.mxu1 }
 0x207   :  { %772 = vst [vmem:[#allocation4 + $0xb8] sm:$0xff] %v706_v50 }
 0x208   :  { %v710_v52 = vpop.f32.mrf.mxu1 }
 0x209   :  { %v711_v53 = vadd.f32 %v1437_v44, %v710_v52 }
 0x20a   :  { %v712_v54 = vpop.f32.mrf.mxu1 }
 0x20b   :  { %773 = vst [vmem:[#allocation4 + $0xc0] sm:$0xff] %v711_v53 }
 0x20c   :  { %v715_v55 = vpop.f32.mrf.mxu1 }
 0x20d   :  { %v716_v56 = vadd.f32 %v1437_v44, %v715_v55 }
 0x20e   :  { %v717_v57 = vpop.f32.mrf.mxu1 }
 0x20f   :  { %774 = vst [vmem:[#allocation4 + $0xc8] sm:$0xff] %v716_v56 }
 0x210   :  { %v720_v58 = vpop.f32.mrf.mxu1 }
 0x211   :  { %v721_v59 = vadd.f32 %v1437_v44, %v720_v58 }
 0x212   :  { %v722_v60 = vpop.f32.mrf.mxu1 }
 0x213   :  { %775 = vst [vmem:[#allocation4 + $0xd0] sm:$0xff] %v721_v59 }
 0x214   :  { %v725_v61 = vpop.f32.mrf.mxu1 }
 0x215   :  { %v726_v62 = vadd.f32 %v1437_v44, %v725_v61 }
 0x216   :  { %v727_v63 = vpop.f32.mrf.mxu1 }
 0x217   :  { %776 = vst [vmem:[#allocation4 + $0xd8] sm:$0xff] %v726_v62 }
 0x218   :  { %v730_v0 = vpop.f32.mrf.mxu1 }
 0x219   :  { %v731_v1 = vadd.f32 %v1437_v44, %v730_v0 }
 0x21a   :  { %v732_v2 = vpop.f32.mrf.mxu1 }
 0x21b   :  { %777 = vst [vmem:[#allocation4 + $0xe0] sm:$0xff] %v731_v1 }
 0x21c   :  { %v735_v3 = vpop.f32.mrf.mxu1 }
 0x21d   :  { %v736_v5 = vadd.f32 %v1437_v44, %v735_v3 }
 0x21e   :  { %v737_v6 = vpop.f32.mrf.mxu1 }
 0x21f   :  { %778 = vst [vmem:[#allocation4 + $0xe8] sm:$0xff] %v736_v5 }
 0x220   :  { %v740_v7 = vpop.f32.mrf.mxu1 }
 0x221   :  { %v741_v8 = vadd.f32 %v1437_v44, %v740_v7 }
 0x222   :  { %v742_v9 = vpop.f32.mrf.mxu1 }
 0x223   :  { %779 = vst [vmem:[#allocation4 + $0xf0] sm:$0xff] %v741_v8 }
 0x224   :  { %v745_v10 = vpop.f32.mrf.mxu1 }
 0x225   :  { %v746_v11 = vadd.f32 %v1437_v44, %v745_v10 }
 0x226   :  { %v747_v12 = vpop.f32.mrf.mxu1 }
 0x227   :  { %780 = vst [vmem:[#allocation4 + $0xf8] sm:$0xff] %v746_v11 }
 0x228   :  { %916 = shalt.err (!%p913_p9)
}
 0x229   :  { %s934_s23 = smov 128   ;;  %s935_s24 = smov 8  }
 0x22a   :  { %804 = dma.vmem_to_hbm [thread:$0]  %s799_s5, 4096, %s1483_s6, [#allocation5], %s934_s23, %s934_s23, %s935_s24  }
 0x22b   :  { %925 = dma.done.wait [#allocation3], 8192  }
 0x22c   :  { %926 = vsyncadd [#allocation3], 4294959104 }
 0x22d   :  { %927 = dma.done.wait [#allocation5], 4096  }
 0x22e   :  { %928 = vsyncadd [#allocation5], 4294963200 }
 0x22f   :  { %811 = vsyncpa [#allocation3], 1 }
 0x230   :  { %812 = vsyncpa [#allocation5], 1 }

// kernel: _forward_impl.4
= control target key start
LH: loop header
LB: loop body
LE: loop exit
PB: predicated region body
PF: predicated region fallthrough
CT: control target
= control target key end

     0   :  { %7 = vsyncpa [#allocation3], 0  ;;  %s458_s9 = smov [#allocation2]   ;;  %s784_s0 = inlined_call_operand.hbm [shape: f32[128,256], index: 0, kind: input, shape index: {}]   ;;  %s785_s1 = inlined_call_operand.vmem [shape: f32[128,1], index: 1, kind: input, shape index: {}]   ;;  %s786_s2 = inlined_call_operand.vmem [shape: f32[256,128], index: 2, kind: output, shape index: {}]  }
   0x1   :  { %s13_s10 = sshll.u32 %s458_s9, 4  ;;  %s14_s10 = int_to_ptr.vmem [resolvable:$true] %s13_s10 }
   0x2   :  { %s444_s11 = scalar_lea.vmem %s14_s10, 4096  ;;  %p449_p1 = scmp.lt.s32.totalorder %s14_s10, %s14_s10 }
   0x3   :  { %p445_p0 = scmp.ne.s32.totalorder %s14_s10, %s444_s11  ;;  %p450_p2 = scmp.lt.s32.totalorder %s444_s11, %s444_s11 }
   0x5   :  { %p451_p3 = por %p450_p2, %p449_p1 }
   0x7   :  { %p452_p4 = pnand %p451_p3, %p445_p0 }
   0x9   :  { %455 = shalt.err (!%p452_p4)
}
   0xa   :  { %s459_s12 = smov 256   ;;  %s460_s13 = smov 16  }
   0xb   :  { %19 = dma.hbm_to_vmem [thread:$0]  %s784_s0, 4096, %s14_s10, [#allocation3], %s459_s12, %s459_s12, %s460_s13  }
   0xc   :  { %456 = dma.done.wait [#allocation3], 4096  }
   0xd   :  { %457 = vsyncadd [#allocation3], 4294963200  ;;  %v480_v0 = vld [vmem:[#allocation2 + $0x20] sm:$0xff]  ;;  %v482_v1 = vld [vmem:[#allocation2 + $0x28] sm:$0xff] }
   0xe   :  { %v484_v2 = vld [vmem:[#allocation2] sm:$0xff]  ;;  %v61_v3 = vmul.f32 %v480_v0, %v480_v0  ;;  %v62_v4 = vmul.f32 %v482_v1, %v482_v1  ;;  %v490_v5 = vld [vmem:[#allocation2 + $0x8] sm:$0xff]  ;;  %v494_v7 = vld [vmem:[#allocation2 + $0x30] sm:$0xff] }
   0xf   :  { %v57_v6 = vmul.f32 %v484_v2, %v484_v2  ;;  %v496_v8 = vld [vmem:[#allocation2 + $0x38] sm:$0xff]  ;;  %v58_v9 = vmul.f32 %v490_v5, %v490_v5  ;;  %v63_v10 = vmul.f32 %v494_v7, %v494_v7  ;;  %v504_v12 = vld [vmem:[#allocation2 + $0x10] sm:$0xff]  ;;  %v516_v20 = vld [vmem:[#allocation2 + $0x40] sm:$0xff] }
  0x10   :  { %v64_v11 = vmul.f32 %v496_v8, %v496_v8  ;;  %v506_v13 = vld [vmem:[#allocation2 + $0x18] sm:$0xff]  ;;  %v508_v14 = vld [vmem:[#allocation2 + $0x50] sm:$0xff]  ;;  %v95_v15 = vadd.f32 %v62_v4, %v61_v3  ;;  %v59_v16 = vmul.f32 %v504_v12, %v504_v12  ;;  %v522_v24 = vld [vmem:[#allocation2 + $0x48] sm:$0xff]  ;;  %v65_v28 = vmul.f32 %v516_v20, %v516_v20 }
  0x11   :  { %v60_v17 = vmul.f32 %v506_v13, %v506_v13  ;;  %v514_v18 = vld [vmem:[#allocation2 + $0x58] sm:$0xff]  ;;  %v89_v19 = vadd.f32 %v58_v9, %v57_v6  ;;  %v67_v22 = vmul.f32 %v508_v14, %v508_v14  ;;  %v524_v26 = vld [vmem:[#allocation2 + $0x70] sm:$0xff]  ;;  %v66_v29 = vmul.f32 %v522_v24, %v522_v24  ;;  %v532_v30 = vld [vmem:[#allocation2 + $0x60] sm:$0xff] }
  0x12   :  { %96 = vadd.xlane.f32.xlu1 %v95_v15  ;;  %v98_v21 = vadd.f32 %v64_v11, %v63_v10  ;;  %v68_v23 = vmul.f32 %v514_v18, %v514_v18  ;;  %v526_v27 = vld [vmem:[#allocation2 + $0x78] sm:$0xff]  ;;  %v534_v31 = vld [vmem:[#allocation2 + $0x68] sm:$0xff]  ;;  %v71_v33 = vmul.f32 %v524_v26, %v524_v26  ;;  %v540_v35 = vld [vmem:[#allocation2 + $0x90] sm:$0xff]  ;;  %v69_v38 = vmul.f32 %v532_v30, %v532_v30 }
  0x13   :  { %90 = vadd.xlane.f32.xlu0 %v89_v19  ;;  %v92_v25 = vadd.f32 %v60_v17, %v59_v16  ;;  %v72_v34 = vmul.f32 %v526_v27, %v526_v27  ;;  %v542_v36 = vld [vmem:[#allocation2 + $0x98] sm:$0xff]  ;;  %v101_v37 = vadd.f32 %v66_v29, %v65_v28  ;;  %v70_v39 = vmul.f32 %v534_v31, %v534_v31  ;;  %v548_v40 = vld [vmem:[#allocation2 + $0x80] sm:$0xff]  ;;  %v550_v41 = vld [vmem:[#allocation2 + $0x88] sm:$0xff] }
  0x14   :  { %v104_v32 = vadd.f32 %v68_v23, %v67_v22  ;;  %v75_v43 = vmul.f32 %v540_v35, %v540_v35  ;;  %v76_v44 = vmul.f32 %v542_v36, %v542_v36  ;;  %v556_v45 = vld [vmem:[#allocation2 + $0xb0] sm:$0xff]  ;;  %v558_v46 = vld [vmem:[#allocation2 + $0xb8] sm:$0xff]  ;;  %v73_v48 = vmul.f32 %v548_v40, %v548_v40  ;;  %v564_v50 = vld [vmem:[#allocation2 + $0xa0] sm:$0xff] }
  0x15   :  { %v110_v42 = vadd.f32 %v72_v34, %v71_v33  ;;  %v107_v47 = vadd.f32 %v70_v39, %v69_v38  ;;  %v74_v49 = vmul.f32 %v550_v41, %v550_v41  ;;  %v566_v51 = vld [vmem:[#allocation2 + $0xa8] sm:$0xff]  ;;  %v79_v53 = vmul.f32 %v556_v45, %v556_v45  ;;  %v572_v55 = vld [vmem:[#allocation2 + $0xd0] sm:$0xff]  ;;  %v574_v56 = vld [vmem:[#allocation2 + $0xd8] sm:$0xff] }
  0x16   :  { %99 = vadd.xlane.f32.xlu1 %v98_v21  ;;  %v116_v52 = vadd.f32 %v76_v44, %v75_v43  ;;  %v80_v54 = vmul.f32 %v558_v46, %v558_v46  ;;  %v77_v58 = vmul.f32 %v564_v50, %v564_v50  ;;  %v78_v59 = vmul.f32 %v566_v51, %v566_v51  ;;  %v580_v60 = vld [vmem:[#allocation2 + $0xc0] sm:$0xff]  ;;  %v582_v61 = vld [vmem:[#allocation2 + $0xc8] sm:$0xff]  ;;  %v588_v4 = vld [vmem:[#allocation2 + $0xf0] sm:$0xff] }
  0x17   :  { %93 = vadd.xlane.f32.xlu0 %v92_v25  ;;  %v113_v57 = vadd.f32 %v74_v49, %v73_v48  ;;  %v83_v63 = vmul.f32 %v572_v55, %v572_v55  ;;  %v84_v3 = vmul.f32 %v574_v56, %v574_v56  ;;  %v590_v6 = vld [vmem:[#allocation2 + $0xf8] sm:$0xff]  ;;  %v81_v10 = vmul.f32 %v580_v60, %v580_v60  ;;  %v596_v15 = vld [vmem:[#allocation2 + $0xe0] sm:$0xff]  ;;  %v598_v16 = vld [vmem:[#allocation2 + $0xe8] sm:$0xff] }
  0x18   :  { %v122_v62 = vadd.f32 %v80_v54, %v79_v53  ;;  %v119_v9 = vadd.f32 %v78_v59, %v77_v58  ;;  %v82_v11 = vmul.f32 %v582_v61, %v582_v61  ;;  %v87_v19 = vmul.f32 %v588_v4, %v588_v4  ;;  %v153_v44 = vld [vmem:[%s785_s1] sm:$0xff]  ;;  %v155_v58 = vld [vmem:[%s785_s1 + $0x10] sm:$0xff] }
  0x19   :  { %v128_v17 = vadd.f32 %v84_v3, %v83_v63  ;;  %v88_v21 = vmul.f32 %v590_v6, %v590_v6  ;;  %v85_v23 = vmul.f32 %v596_v15, %v596_v15  ;;  %v86_v25 = vmul.f32 %v598_v16, %v598_v16 }
  0x1a   :  { %105 = vadd.xlane.f32.xlu1 %v104_v32  ;;  %v125_v22 = vadd.f32 %v82_v11, %v81_v10  ;;  %v461_v28 = vmov 0   ;;  %v156_v10 = vld [vmem:[%s785_s1 + $0x18] sm:$0xff] }
  0x1b   :  { %102 = vadd.xlane.f32.xlu0 %v101_v37  ;;  %403 = vset.pattern.permute.xlu1 %v461_v28  ;;  %v134_v29 = vadd.f32 %v88_v21, %v87_v19  ;;  %v131_v32 = vadd.f32 %v86_v25, %v85_v23  ;;  %v157_v21 = vld [vmem:[%s785_s1 + $0x20] sm:$0xff]  ;;  %v162_v25 = vld [vmem:[%s785_s1 + $0x48] sm:$0xff] }
  0x1c   :  { %402 = vset.pattern.permute.xlu0 %v461_v28 }
  0x1e   :  { %111 = vadd.xlane.f32.xlu1 %v110_v42 }
  0x1f   :  { %108 = vadd.xlane.f32.xlu0 %v107_v47 }
  0x22   :  { %117 = vadd.xlane.f32.xlu1 %v116_v52  ;;  %v154_v52 = vld [vmem:[%s785_s1 + $0x8] sm:$0xff] }
  0x23   :  { %114 = vadd.xlane.f32.xlu0 %v113_v57 }
  0x26   :  { %123 = vadd.xlane.f32.xlu1 %v122_v62 }
  0x27   :  { %120 = vadd.xlane.f32.xlu0 %v119_v9 }
  0x2a   :  { %129 = vadd.xlane.f32.xlu1 %v128_v17 }
  0x2b   :  { %126 = vadd.xlane.f32.xlu0 %v125_v22 }
  0x2e   :  { %135 = vadd.xlane.f32.xlu1 %v134_v29 }
  0x2f   :  { %132 = vadd.xlane.f32.xlu0 %v131_v32 }
  0x9b   :  { %v97_v33 = vpop.xlane.xlu1 %96 }
  0x9c   :  { %v91_v34 = vpop.xlane.xlu0 %90 }
  0x9d   :  { %404 = vrsqrt.f32 %v91_v34  ;;  %v158_v34 = vld [vmem:[%s785_s1 + $0x28] sm:$0xff] }
  0x9e   :  { %406 = vrsqrt.f32 %v97_v33 }
  0x9f   :  { %v100_v37 = vpop.xlane.xlu1 %99 }
  0xa0   :  { %v94_v38 = vpop.xlane.xlu0 %93 }
  0xa1   :  { %408 = vrsqrt.f32 %v94_v38 }
  0xa2   :  { %410 = vrsqrt.f32 %v100_v37  ;;  %v164_v37 = vld [vmem:[%s785_s1 + $0x58] sm:$0xff] }
  0xa3   :  { %v106_v39 = vpop.xlane.xlu1 %105 }
  0xa4   :  { %v103_v42 = vpop.xlane.xlu0 %102 }
  0xa5   :  { %412 = vrsqrt.f32 %v103_v42 }
  0xa7   :  { %v112_v43 = vpop.xlane.xlu1 %111 }
  0xa8   :  { %v109_v53 = vpop.xlane.xlu0 %108 }
  0xaa   :  { %v405_v47 = vpop.eup %404 }
  0xab   :  { %v118_v48 = vpop.xlane.xlu1 %117  ;;  %v169_v49 = vmul.f32 %v405_v47, %v153_v44  ;;  %v407_v54 = vpop.eup %406  ;;  %v159_v47 = vld [vmem:[%s785_s1 + $0x30] sm:$0xff] }
  0xac   :  { %414 = vrsqrt.f32 %v118_v48  ;;  %v115_v63 = vpop.xlane.xlu0 %114  ;;  %v171_v3 = vmul.f32 %v407_v54, %v155_v58  ;;  %v166_v48 = vld [vmem:[%s785_s1 + $0x68] sm:$0xff]  ;;  %v160_v58 = vld [vmem:[%s785_s1 + $0x38] sm:$0xff] }
  0xad   :  { %416 = vrsqrt.f32 %v106_v39  ;;  %187 = vperm.xlu0 %402, %v169_v49  }
  0xae   :  { %v409_v57 = vpop.eup %408 }
  0xaf   :  { %v124_v59 = vpop.xlane.xlu1 %123  ;;  %v170_v62 = vmul.f32 %v409_v57, %v154_v52  ;;  %v411_v9 = vpop.eup %410 }
  0xb0   :  { %418 = vrsqrt.f32 %v124_v59  ;;  %v172_v17 = vmul.f32 %v411_v9, %v156_v10  ;;  %v121_v22 = vpop.xlane.xlu0 %120  ;;  %v168_v59 = vld [vmem:[%s785_s1 + $0x78] sm:$0xff]  ;;  %v161_v10 = vld [vmem:[%s785_s1 + $0x40] sm:$0xff] }
  0xb1   :  { %192 = vperm.xlu1 %403, %v170_v62   ;;  %420 = vrsqrt.f32 %v109_v53 }
  0xb2   :  { %v413_v19 = vpop.eup %412 }
  0xb3   :  { %v130_v11 = vpop.xlane.xlu1 %129  ;;  %v173_v29 = vmul.f32 %v413_v19, %v157_v21  ;;  %v163_v19 = vld [vmem:[%s785_s1 + $0x50] sm:$0xff] }
  0xb4   :  { %422 = vrsqrt.f32 %v130_v11  ;;  %v127_v38 = vpop.xlane.xlu0 %126 }
  0xb5   :  { %424 = vrsqrt.f32 %v112_v43  ;;  %197 = vperm.xlu1 %403, %v171_v3  }
  0xb7   :  { %v136_v23 = vpop.xlane.xlu1 %135 }
  0xb8   :  { %426 = vrsqrt.f32 %v136_v23  ;;  %v133_v57 = vpop.xlane.xlu0 %132  ;;  %v165_v23 = vld [vmem:[%s785_s1 + $0x60] sm:$0xff] }
  0xb9   :  { %v415_v28 = vpop.eup %414  ;;  %202 = vperm.xlu1 %403, %v172_v17   ;;  %428 = vrsqrt.f32 %v115_v63 }
  0xba   :  { %v417_v32 = vpop.eup %416  ;;  %v178_v33 = vmul.f32 %v415_v28, %v162_v25  ;;  %430 = vrsqrt.f32 %v121_v22 }
  0xbb   :  { %v174_v42 = vmul.f32 %v417_v32, %v158_v34  ;;  %432 = vrsqrt.f32 %v127_v38 }
  0xbc   :  { %232 = vperm.xlu0 %402, %v178_v33   ;;  %434 = vrsqrt.f32 %v133_v57 }
  0xbd   :  { %v419_v39 = vpop.eup %418  ;;  %207 = vperm.xlu1 %403, %v173_v29   ;;  %v167_v29 = vld [vmem:[%s785_s1 + $0x70] sm:$0xff] }
  0xbe   :  { %v421_v43 = vpop.eup %420  ;;  %v180_v44 = vmul.f32 %v419_v39, %v164_v37 }
  0xbf   :  { %v175_v52 = vmul.f32 %v421_v43, %v159_v47 }
  0xc0   :  { %242 = vperm.xlu0 %402, %v180_v44  }
  0xc1   :  { %v423_v49 = vpop.eup %422  ;;  %212 = vperm.xlu1 %403, %v174_v42  }
  0xc2   :  { %v425_v53 = vpop.eup %424  ;;  %v182_v54 = vmul.f32 %v423_v49, %v166_v48 }
  0xc3   :  { %v176_v63 = vmul.f32 %v425_v53, %v160_v58 }
  0xc4   :  { %252 = vperm.xlu0 %402, %v182_v54  }
  0xc5   :  { %v427_v62 = vpop.eup %426  ;;  %217 = vperm.xlu1 %403, %v175_v52  }
  0xc6   :  { %v429_v3 = vpop.eup %428  ;;  %v184_v9 = vmul.f32 %v427_v62, %v168_v59 }
  0xc7   :  { %v177_v11 = vmul.f32 %v429_v3, %v161_v10  ;;  %v431_v17 = vpop.eup %430 }
  0xc8   :  { %262 = vperm.xlu0 %402, %v184_v9   ;;  %v179_v21 = vmul.f32 %v431_v17, %v163_v19  ;;  %v433_v22 = vpop.eup %432 }
  0xc9   :  { %222 = vperm.xlu1 %403, %v176_v63   ;;  %v181_v25 = vmul.f32 %v433_v22, %v165_v23  ;;  %v435_v28 = vpop.eup %434 }
  0xca   :  { %v183_v32 = vmul.f32 %v435_v28, %v167_v29 }
  0xcd   :  { %227 = vperm.xlu1 %403, %v177_v11  }
  0xd1   :  { %237 = vperm.xlu1 %403, %v179_v21  }
  0xd5   :  { %247 = vperm.xlu1 %403, %v181_v25  }
  0xd9   :  { %257 = vperm.xlu1 %403, %v183_v32  }
 0x128   :  { %v188_v33 = vpop.permute.xlu0 %187 }
 0x129   :  { %v265_v34 = vmul.f32 %v188_v33, %v484_v2  ;;  %v266_v37 = vmul.f32 %v188_v33, %v490_v5 }
 0x12b   :  { %329 = vxpose.xlu0.b32.start [1/16] %v266_v37, 128  ;;  %297 = vxpose.xlu1.b32.start [1/16] %v265_v34, 128 }
 0x12c   :  { %v193_v38 = vpop.permute.xlu1 %192 }
 0x12d   :  { %v267_v39 = vmul.f32 %v193_v38, %v504_v12  ;;  %v268_v42 = vmul.f32 %v193_v38, %v506_v13 }
 0x12f   :  { %330 = vxpose.xlu0.b32.cont [2/16] %v268_v42, 128  ;;  %298 = vxpose.xlu1.b32.cont [2/16] %v267_v39, 128 }
 0x130   :  { %v198_v43 = vpop.permute.xlu1 %197 }
 0x131   :  { %v269_v44 = vmul.f32 %v198_v43, %v480_v0  ;;  %v270_v47 = vmul.f32 %v198_v43, %v482_v1 }
 0x133   :  { %331 = vxpose.xlu0.b32.cont [3/16] %v270_v47, 128  ;;  %299 = vxpose.xlu1.b32.cont [3/16] %v269_v44, 128 }
 0x134   :  { %v203_v48 = vpop.permute.xlu1 %202 }
 0x135   :  { %v271_v2 = vmul.f32 %v203_v48, %v494_v7  ;;  %v272_v5 = vmul.f32 %v203_v48, %v496_v8 }
 0x137   :  { %332 = vxpose.xlu0.b32.cont [4/16] %v272_v5, 128  ;;  %300 = vxpose.xlu1.b32.cont [4/16] %v271_v2, 128  ;;  %v233_v58 = vpop.permute.xlu0 %232 }
 0x138   :  { %v208_v49 = vpop.permute.xlu1 %207 }
 0x139   :  { %v273_v12 = vmul.f32 %v208_v49, %v516_v20  ;;  %v274_v13 = vmul.f32 %v208_v49, %v522_v24 }
 0x13b   :  { %333 = vxpose.xlu0.b32.cont [5/16] %v274_v13, 128  ;;  %301 = vxpose.xlu1.b32.cont [5/16] %v273_v12, 128  ;;  %v243_v62 = vpop.permute.xlu0 %242 }
 0x13c   :  { %v213_v52 = vpop.permute.xlu1 %212 }
 0x13d   :  { %v275_v0 = vmul.f32 %v213_v52, %v508_v14  ;;  %v276_v1 = vmul.f32 %v213_v52, %v514_v18 }
 0x13f   :  { %334 = vxpose.xlu0.b32.cont [6/16] %v276_v1, 128  ;;  %302 = vxpose.xlu1.b32.cont [6/16] %v275_v0, 128  ;;  %v253_v3 = vpop.permute.xlu0 %252 }
 0x140   :  { %v218_v53 = vpop.permute.xlu1 %217 }
 0x141   :  { %v277_v7 = vmul.f32 %v218_v53, %v532_v30  ;;  %v278_v8 = vmul.f32 %v218_v53, %v534_v31  ;;  %v283_v30 = vmul.f32 %v233_v58, %v540_v35  ;;  %v284_v31 = vmul.f32 %v233_v58, %v542_v36 }
 0x143   :  { %335 = vxpose.xlu0.b32.cont [7/16] %v278_v8, 128  ;;  %303 = vxpose.xlu1.b32.cont [7/16] %v277_v7, 128  ;;  %v263_v10 = vpop.permute.xlu0 %262 }
 0x144   :  { %v223_v54 = vpop.permute.xlu1 %222 }
 0x145   :  { %v279_v20 = vmul.f32 %v223_v54, %v524_v26  ;;  %v280_v24 = vmul.f32 %v223_v54, %v526_v27 }
 0x147   :  { %336 = vxpose.xlu0.b32.cont [8/16] %v280_v24, 128  ;;  %304 = vxpose.xlu1.b32.cont [8/16] %v279_v20, 128 }
 0x148   :  { %v228_v57 = vpop.permute.xlu1 %227 }
 0x149   :  { %v281_v14 = vmul.f32 %v228_v57, %v548_v40  ;;  %v282_v18 = vmul.f32 %v228_v57, %v550_v41  ;;  %v287_v40 = vmul.f32 %v243_v62, %v556_v45  ;;  %v288_v41 = vmul.f32 %v243_v62, %v558_v46 }
 0x14b   :  { %337 = vxpose.xlu0.b32.cont [9/16] %v282_v18, 128  ;;  %305 = vxpose.xlu1.b32.cont [9/16] %v281_v14, 128 }
 0x14c   :  { %v238_v59 = vpop.permute.xlu1 %237 }
 0x14d   :  { %v285_v26 = vmul.f32 %v238_v59, %v564_v50  ;;  %v286_v27 = vmul.f32 %v238_v59, %v566_v51  ;;  %v291_v50 = vmul.f32 %v253_v3, %v572_v55  ;;  %v292_v51 = vmul.f32 %v253_v3, %v574_v56 }
 0x14f   :  { %338 = vxpose.xlu0.b32.cont [10/16] %v284_v31, 128  ;;  %306 = vxpose.xlu1.b32.cont [10/16] %v283_v30, 128 }
 0x150   :  { %v248_v63 = vpop.permute.xlu1 %247 }
 0x151   :  { %v289_v35 = vmul.f32 %v248_v63, %v580_v60  ;;  %v290_v36 = vmul.f32 %v248_v63, %v582_v61  ;;  %v295_v60 = vmul.f32 %v263_v10, %v588_v4  ;;  %v296_v61 = vmul.f32 %v263_v10, %v590_v6 }
 0x153   :  { %339 = vxpose.xlu0.b32.cont [11/16] %v286_v27, 128  ;;  %307 = vxpose.xlu1.b32.cont [11/16] %v285_v26, 128 }
 0x154   :  { %v258_v9 = vpop.permute.xlu1 %257 }
 0x155   :  { %v293_v45 = vmul.f32 %v258_v9, %v596_v15  ;;  %v294_v46 = vmul.f32 %v258_v9, %v598_v16 }
 0x157   :  { %340 = vxpose.xlu0.b32.cont [12/16] %v288_v41, 128  ;;  %308 = vxpose.xlu1.b32.cont [12/16] %v287_v40, 128 }
 0x15b   :  { %341 = vxpose.xlu0.b32.cont [13/16] %v290_v36, 128  ;;  %309 = vxpose.xlu1.b32.cont [13/16] %v289_v35, 128 }
 0x15f   :  { %342 = vxpose.xlu0.b32.cont [14/16] %v292_v51, 128  ;;  %310 = vxpose.xlu1.b32.cont [14/16] %v291_v50, 128 }
 0x163   :  { %343 = vxpose.xlu0.b32.cont [15/16] %v294_v46, 128  ;;  %311 = vxpose.xlu1.b32.cont [15/16] %v293_v45, 128 }
 0x167   :  { %344 = vxpose.xlu0.b32.end [16/16] %v296_v61, 128  ;;  %312 = vxpose.xlu1.b32.end [16/16] %v295_v60, 128 }
 0x1a7   :  { %v345_v11 = vpop.trf.xlu0  ;;  %v313_v55 = vpop.trf.xlu1 }
 0x1a8   :  { %377 = vst [vmem:[%s786_s2 + $0x80] sm:$0xff] %v345_v11  ;;  %361 = vst [vmem:[%s786_s2] sm:$0xff] %v313_v55 }
 0x1ab   :  { %v346_v56 = vpop.trf.xlu0  ;;  %v314_v15 = vpop.trf.xlu1 }
 0x1ac   :  { %378 = vst [vmem:[%s786_s2 + $0x88] sm:$0xff] %v346_v56  ;;  %362 = vst [vmem:[%s786_s2 + $0x8] sm:$0xff] %v314_v15 }
 0x1af   :  { %v347_v4 = vpop.trf.xlu0  ;;  %v315_v6 = vpop.trf.xlu1 }
 0x1b0   :  { %379 = vst [vmem:[%s786_s2 + $0x90] sm:$0xff] %v347_v4  ;;  %363 = vst [vmem:[%s786_s2 + $0x10] sm:$0xff] %v315_v6 }
 0x1b3   :  { %v348_v16 = vpop.trf.xlu0  ;;  %v316_v17 = vpop.trf.xlu1 }
 0x1b4   :  { %380 = vst [vmem:[%s786_s2 + $0x98] sm:$0xff] %v348_v16  ;;  %364 = vst [vmem:[%s786_s2 + $0x18] sm:$0xff] %v316_v17 }
 0x1b7   :  { %v349_v19 = vpop.trf.xlu0  ;;  %v317_v21 = vpop.trf.xlu1 }
 0x1b8   :  { %381 = vst [vmem:[%s786_s2 + $0xa0] sm:$0xff] %v349_v19  ;;  %365 = vst [vmem:[%s786_s2 + $0x20] sm:$0xff] %v317_v21 }
 0x1bb   :  { %v350_v22 = vpop.trf.xlu0  ;;  %v318_v23 = vpop.trf.xlu1 }
 0x1bc   :  { %382 = vst [vmem:[%s786_s2 + $0xa8] sm:$0xff] %v350_v22  ;;  %366 = vst [vmem:[%s786_s2 + $0x28] sm:$0xff] %v318_v23 }
 0x1bf   :  { %v351_v25 = vpop.trf.xlu0  ;;  %v319_v28 = vpop.trf.xlu1 }
 0x1c0   :  { %383 = vst [vmem:[%s786_s2 + $0xb0] sm:$0xff] %v351_v25  ;;  %367 = vst [vmem:[%s786_s2 + $0x30] sm:$0xff] %v319_v28 }
 0x1c3   :  { %v352_v29 = vpop.trf.xlu0  ;;  %v320_v32 = vpop.trf.xlu1 }
 0x1c4   :  { %384 = vst [vmem:[%s786_s2 + $0xb8] sm:$0xff] %v352_v29  ;;  %368 = vst [vmem:[%s786_s2 + $0x38] sm:$0xff] %v320_v32 }
 0x1c7   :  { %v353_v33 = vpop.trf.xlu0  ;;  %v321_v34 = vpop.trf.xlu1 }
 0x1c8   :  { %385 = vst [vmem:[%s786_s2 + $0xc0] sm:$0xff] %v353_v33  ;;  %369 = vst [vmem:[%s786_s2 + $0x40] sm:$0xff] %v321_v34 }
 0x1cb   :  { %v354_v37 = vpop.trf.xlu0  ;;  %v322_v38 = vpop.trf.xlu1 }
 0x1cc   :  { %386 = vst [vmem:[%s786_s2 + $0xc8] sm:$0xff] %v354_v37  ;;  %370 = vst [vmem:[%s786_s2 + $0x48] sm:$0xff] %v322_v38 }
 0x1cf   :  { %v355_v39 = vpop.trf.xlu0  ;;  %v323_v42 = vpop.trf.xlu1 }
 0x1d0   :  { %387 = vst [vmem:[%s786_s2 + $0xd0] sm:$0xff] %v355_v39  ;;  %371 = vst [vmem:[%s786_s2 + $0x50] sm:$0xff] %v323_v42 }
 0x1d3   :  { %v356_v43 = vpop.trf.xlu0  ;;  %v324_v44 = vpop.trf.xlu1 }
 0x1d4   :  { %388 = vst [vmem:[%s786_s2 + $0xd8] sm:$0xff] %v356_v43  ;;  %372 = vst [vmem:[%s786_s2 + $0x58] sm:$0xff] %v324_v44 }
 0x1d7   :  { %v357_v47 = vpop.trf.xlu0  ;;  %v325_v48 = vpop.trf.xlu1 }
 0x1d8   :  { %389 = vst [vmem:[%s786_s2 + $0xe0] sm:$0xff] %v357_v47  ;;  %373 = vst [vmem:[%s786_s2 + $0x60] sm:$0xff] %v325_v48 }
 0x1db   :  { %v358_v2 = vpop.trf.xlu0  ;;  %v326_v5 = vpop.trf.xlu1 }
 0x1dc   :  { %390 = vst [vmem:[%s786_s2 + $0xe8] sm:$0xff] %v358_v2  ;;  %374 = vst [vmem:[%s786_s2 + $0x68] sm:$0xff] %v326_v5 }
 0x1df   :  { %v359_v49 = vpop.trf.xlu0  ;;  %v327_v12 = vpop.trf.xlu1 }
 0x1e0   :  { %391 = vst [vmem:[%s786_s2 + $0xf0] sm:$0xff] %v359_v49  ;;  %375 = vst [vmem:[%s786_s2 + $0x70] sm:$0xff] %v327_v12 }
 0x1e3   :  { %v360_v13 = vpop.trf.xlu0  ;;  %v328_v52 = vpop.trf.xlu1 }
 0x1e4   :  { %392 = vst [vmem:[%s786_s2 + $0xf8] sm:$0xff] %v360_v13  ;;  %376 = vst [vmem:[%s786_s2 + $0x78] sm:$0xff] %v328_v52 }
 0x1e5   :  { %397 = vsyncpa [#allocation3], 1 }

// kernel: _forward_impl.5
= control target key start
LH: loop header
LB: loop body
LE: loop exit
PB: predicated region body
PF: predicated region fallthrough
CT: control target
= control target key end

     0   :  { %12 = vsyncpa [#allocation3], 0  ;;  %v929_v4 = vmov 0.0   ;;  %s1477_s0 = inlined_call_operand.vmem [shape: f32[256,128], index: 0, kind: input, shape index: {}]   ;;  %s1478_s1 = inlined_call_operand.vmem [shape: f32[128,256], index: 1, kind: input, shape index: {}]   ;;  %s1479_s2 = inlined_call_operand.vmem [shape: f32[1,256], index: 2, kind: input, shape index: {}]   ;;  %s1480_s3 = inlined_call_operand.vmem [shape: f32[256,128], index: 3, kind: input, shape index: {}]   ;;  %s1481_s4 = inlined_call_operand.vmem [shape: f32[1,128], index: 4, kind: input, shape index: {}]   ;;  %s1482_s5 = inlined_call_operand.hbm [shape: f32[256,256], index: 5, kind: output, shape index: {0}]   ;;  %s1483_s6 = inlined_call_operand.hbm [shape: f32[256,128], index: 6, kind: output, shape index: {1}]  }
   0x1   :  { %v87_v0 = vld [vmem:[%s1478_s1 + $0xf8] sm:$0xff]  ;;  %v86_v1 = vld [vmem:[%s1478_s1 + $0xf0] sm:$0xff]  ;;  %v85_v2 = vld [vmem:[%s1478_s1 + $0xe8] sm:$0xff]  ;;  %164 = vmatprep.mubr.f32.mxu0 %v929_v4  ;;  %814 = vmatprep.subr.mxu1 %v929_v4 }
   0x2   :  { %100 = vmatprep.subr.mxu0 %v87_v0  ;;  %v84_v3 = vld [vmem:[%s1478_s1 + $0xe0] sm:$0xff]  ;;  %v83_v5 = vld [vmem:[%s1478_s1 + $0xd8] sm:$0xff]  ;;  %v82_v6 = vld [vmem:[%s1478_s1 + $0xd0] sm:$0xff] }
   0x3   :  { %101 = vmatpush1.msra.mxu0 %v86_v1  ;;  %v81_v7 = vld [vmem:[%s1478_s1 + $0xc8] sm:$0xff]  ;;  %v80_v8 = vld [vmem:[%s1478_s1 + $0xc0] sm:$0xff]  ;;  %v79_v9 = vld [vmem:[%s1478_s1 + $0xb8] sm:$0xff] }
   0x4   :  { %102 = vmatprep.subr.mxu0 %v85_v2  ;;  %v78_v10 = vld [vmem:[%s1478_s1 + $0xb0] sm:$0xff]  ;;  %v77_v11 = vld [vmem:[%s1478_s1 + $0xa8] sm:$0xff]  ;;  %v76_v12 = vld [vmem:[%s1478_s1 + $0xa0] sm:$0xff] }
   0x5   :  { %103 = vmatpush1.msra.mxu0 %v84_v3  ;;  %v75_v13 = vld [vmem:[%s1478_s1 + $0x98] sm:$0xff]  ;;  %v74_v14 = vld [vmem:[%s1478_s1 + $0x90] sm:$0xff]  ;;  %v73_v15 = vld [vmem:[%s1478_s1 + $0x88] sm:$0xff] }
   0x6   :  { %104 = vmatprep.subr.mxu0 %v83_v5  ;;  %v72_v16 = vld [vmem:[%s1478_s1 + $0x80] sm:$0xff]  ;;  %v71_v17 = vld [vmem:[%s1478_s1 + $0x78] sm:$0xff]  ;;  %v70_v18 = vld [vmem:[%s1478_s1 + $0x70] sm:$0xff] }
   0x7   :  { %105 = vmatpush1.msra.mxu0 %v82_v6  ;;  %v69_v19 = vld [vmem:[%s1478_s1 + $0x68] sm:$0xff]  ;;  %v68_v20 = vld [vmem:[%s1478_s1 + $0x60] sm:$0xff]  ;;  %v67_v21 = vld [vmem:[%s1478_s1 + $0x58] sm:$0xff] }
   0x8   :  { %106 = vmatprep.subr.mxu0 %v81_v7  ;;  %v66_v22 = vld [vmem:[%s1478_s1 + $0x50] sm:$0xff]  ;;  %v65_v23 = vld [vmem:[%s1478_s1 + $0x48] sm:$0xff] }
   0x9   :  { %107 = vmatpush1.msra.mxu0 %v80_v8 }
   0xa   :  { %108 = vmatprep.subr.mxu0 %v79_v9 }
   0xb   :  { %109 = vmatpush1.msra.mxu0 %v78_v10 }
   0xc   :  { %110 = vmatprep.subr.mxu0 %v77_v11 }
   0xd   :  { %111 = vmatpush1.msra.mxu0 %v76_v12 }
   0xe   :  { %112 = vmatprep.subr.mxu0 %v75_v13 }
   0xf   :  { %113 = vmatpush1.msra.mxu0 %v74_v14 }
  0x10   :  { %114 = vmatprep.subr.mxu0 %v73_v15 }
  0x11   :  { %115 = vmatpush1.msra.mxu0 %v72_v16 }
  0x12   :  { %116 = vmatprep.subr.mxu0 %v71_v17 }
  0x13   :  { %117 = vmatpush1.msra.mxu0 %v70_v18 }
  0x14   :  { %118 = vmatprep.subr.mxu0 %v69_v19 }
  0x15   :  { %119 = vmatpush1.msra.mxu0 %v68_v20 }
  0x16   :  { %13 = vsyncpa [#allocation5], 0  ;;  %120 = vmatprep.subr.mxu0 %v67_v21  ;;  %v64_v24 = vld [vmem:[%s1478_s1 + $0x40] sm:$0xff]  ;;  %v63_v25 = vld [vmem:[%s1478_s1 + $0x38] sm:$0xff] }
  0x17   :  { %121 = vmatpush1.msra.mxu0 %v66_v22  ;;  %v62_v26 = vld [vmem:[%s1478_s1 + $0x30] sm:$0xff]  ;;  %v61_v27 = vld [vmem:[%s1478_s1 + $0x28] sm:$0xff]  ;;  %v60_v28 = vld [vmem:[%s1478_s1 + $0x20] sm:$0xff] }
  0x18   :  { %122 = vmatprep.subr.mxu0 %v65_v23  ;;  %v59_v29 = vld [vmem:[%s1478_s1 + $0x18] sm:$0xff]  ;;  %v58_v30 = vld [vmem:[%s1478_s1 + $0x10] sm:$0xff]  ;;  %v57_v31 = vld [vmem:[%s1478_s1 + $0x8] sm:$0xff] }
  0x19   :  { %123 = vmatpush1.msra.mxu0 %v64_v24  ;;  %v56_v32 = vld [vmem:[%s1478_s1] sm:$0xff]  ;;  %v500_v33 = vld [vmem:[%s1480_s3 + $0x78] sm:$0xff]  ;;  %v499_v35 = vld [vmem:[%s1480_s3 + $0x70] sm:$0xff] }
  0x1a   :  { %124 = vmatprep.subr.mxu0 %v63_v25  ;;  %v24_v34 = vld [vmem:[%s1477_s0] sm:$0xff]  ;;  %846 = vmatpush1.msra.mxu1 %v500_v33  ;;  %v25_v36 = vld [vmem:[%s1477_s0 + $0x8] sm:$0xff]  ;;  %v26_v39 = vld [vmem:[%s1477_s0 + $0x10] sm:$0xff] }
  0x1b   :  { %125 = vmatpush1.msra.mxu0 %v62_v26  ;;  %815 = vmatprep.subr.mxu1 %v929_v4  ;;  %v498_v37 = vld [vmem:[%s1480_s3 + $0x68] sm:$0xff]  ;;  %v497_v38 = vld [vmem:[%s1480_s3 + $0x60] sm:$0xff]  ;;  %v496_v40 = vld [vmem:[%s1480_s3 + $0x58] sm:$0xff] }
  0x1c   :  { %126 = vmatprep.subr.mxu0 %v61_v27  ;;  %847 = vmatpush1.msra.mxu1 %v499_v35  ;;  %v495_v41 = vld [vmem:[%s1480_s3 + $0x50] sm:$0xff]  ;;  %v27_v42 = vld [vmem:[%s1477_s0 + $0x18] sm:$0xff]  ;;  %v494_v43 = vld [vmem:[%s1480_s3 + $0x48] sm:$0xff] }
  0x1d   :  { %127 = vmatpush1.msra.mxu0 %v60_v28  ;;  %816 = vmatprep.subr.mxu1 %v929_v4  ;;  %v493_v44 = vld [vmem:[%s1480_s3 + $0x40] sm:$0xff]  ;;  %v492_v46 = vld [vmem:[%s1480_s3 + $0x38] sm:$0xff]  ;;  %v491_v47 = vld [vmem:[%s1480_s3 + $0x30] sm:$0xff] }
  0x1e   :  { %128 = vmatprep.subr.mxu0 %v59_v29  ;;  %848 = vmatpush1.msra.mxu1 %v498_v37  ;;  %v28_v45 = vld [vmem:[%s1477_s0 + $0x20] sm:$0xff]  ;;  %v29_v48 = vld [vmem:[%s1477_s0 + $0x28] sm:$0xff]  ;;  %v30_v51 = vld [vmem:[%s1477_s0 + $0x30] sm:$0xff] }
  0x1f   :  { %129 = vmatpush1.msra.mxu0 %v58_v30  ;;  %817 = vmatprep.subr.mxu1 %v929_v4  ;;  %v490_v49 = vld [vmem:[%s1480_s3 + $0x28] sm:$0xff]  ;;  %v489_v50 = vld [vmem:[%s1480_s3 + $0x20] sm:$0xff]  ;;  %v488_v52 = vld [vmem:[%s1480_s3 + $0x18] sm:$0xff] }
  0x20   :  { %130 = vmatprep.subr.mxu0 %v57_v31  ;;  %849 = vmatpush1.msra.mxu1 %v497_v38  ;;  %v487_v53 = vld [vmem:[%s1480_s3 + $0x10] sm:$0xff]  ;;  %v31_v54 = vld [vmem:[%s1477_s0 + $0x38] sm:$0xff]  ;;  %v486_v55 = vld [vmem:[%s1480_s3 + $0x8] sm:$0xff] }
  0x21   :  { %131 = vmatpush1.msra.mxu0 %v56_v32  ;;  %818 = vmatprep.subr.mxu1 %v929_v4  ;;  %v485_v56 = vld [vmem:[%s1480_s3] sm:$0xff]  ;;  %v516_v58 = vld [vmem:[%s1480_s3 + $0xf8] sm:$0xff]  ;;  %v515_v59 = vld [vmem:[%s1480_s3 + $0xf0] sm:$0xff] }
  0x22   :  { %165 = vmatmul.mubr.f32.vlgmr.msra.gmra.mxu0 %v24_v34  ;;  %524 = vmatprep.subr.mxu0 %v929_v4  ;;  %v32_v57 = vld [vmem:[%s1477_s0 + $0x40] sm:$0xff]  ;;  %v33_v60 = vld [vmem:[%s1477_s0 + $0x48] sm:$0xff]  ;;  %v34_v63 = vld [vmem:[%s1477_s0 + $0x50] sm:$0xff]  ;;  %v90_v34 = vlaneseq }
  0x23   :  { %170 = vmatprep.mubr.f32.mxu0 %v929_v4  ;;  %525 = vmatpush1.msra.mxu0 %v500_v33  ;;  %v514_v61 = vld [vmem:[%s1480_s3 + $0xe8] sm:$0xff]  ;;  %v1197_v62 = vld [vmem:[%s1480_s3 + $0xe0] sm:$0xff]  ;;  %v512_v0 = vld [vmem:[%s1480_s3 + $0xd8] sm:$0xff] }
  0x24   :  { %526 = vmatprep.subr.mxu0 %v929_v4  ;;  %850 = vmatpush1.msra.mxu1 %v496_v40  ;;  %v35_v1 = vld [vmem:[%s1477_s0 + $0x58] sm:$0xff]  ;;  %v511_v2 = vld [vmem:[%s1480_s3 + $0xd0] sm:$0xff]  ;;  %v1223_v3 = vld [vmem:[%s1480_s3 + $0xc8] sm:$0xff] }
  0x25   :  { %527 = vmatpush1.msra.mxu0 %v499_v35  ;;  %819 = vmatprep.subr.mxu1 %v929_v4  ;;  %v36_v5 = vld [vmem:[%s1477_s0 + $0x60] sm:$0xff]  ;;  %v37_v7 = vld [vmem:[%s1477_s0 + $0x68] sm:$0xff]  ;;  %v508_v8 = vld [vmem:[%s1480_s3 + $0xb8] sm:$0xff]  ;;  %v91_v35 = vshrl.u32 %v90_v34, 7 }
  0x26   :  { %171 = vmatmul.mubr.f32.gmra.mxu0 %v25_v36  ;;  %528 = vmatprep.subr.mxu0 %v929_v4  ;;  %v509_v6 = vld [vmem:[%s1480_s3 + $0xc0] sm:$0xff]  ;;  %v38_v9 = vld [vmem:[%s1477_s0 + $0x70] sm:$0xff]  ;;  %v39_v11 = vld [vmem:[%s1477_s0 + $0x78] sm:$0xff] }
  0x27   :  { %176 = vmatprep.mubr.f32.mxu0 %v929_v4  ;;  %529 = vmatpush1.msra.mxu0 %v498_v37  ;;  %v507_v10 = vld [vmem:[%s1480_s3 + $0xb0] sm:$0xff]  ;;  %v506_v12 = vld [vmem:[%s1480_s3 + $0xa8] sm:$0xff]  ;;  %v505_v13 = vld [vmem:[%s1480_s3 + $0xa0] sm:$0xff]  ;;  %v92_v36 = vsub.s32 0, %v91_v35 }
  0x28   :  { %530 = vmatprep.subr.mxu0 %v929_v4  ;;  %851 = vmatpush1.msra.mxu1 %v495_v41  ;;  %v40_v14 = vld [vmem:[%s1477_s0 + $0x80] sm:$0xff]  ;;  %v504_v15 = vld [vmem:[%s1480_s3 + $0x98] sm:$0xff]  ;;  %v503_v16 = vld [vmem:[%s1480_s3 + $0x90] sm:$0xff] }
  0x29   :  { %531 = vmatpush1.msra.mxu0 %v497_v38  ;;  %820 = vmatprep.subr.mxu1 %v929_v4  ;;  %v41_v17 = vld [vmem:[%s1477_s0 + $0x88] sm:$0xff]  ;;  %v42_v19 = vld [vmem:[%s1477_s0 + $0x90] sm:$0xff]  ;;  %v501_v20 = vld [vmem:[%s1480_s3 + $0x80] sm:$0xff]  ;;  %v96_v38 = vsub.s32 1, %v91_v35 }
  0x2a   :  { %177 = vmatmul.mubr.f32.gmra.mxu0 %v26_v39  ;;  %532 = vmatprep.subr.mxu0 %v929_v4  ;;  %v502_v18 = vld [vmem:[%s1480_s3 + $0x88] sm:$0xff]  ;;  %v43_v21 = vld [vmem:[%s1477_s0 + $0x98] sm:$0xff]  ;;  %v44_v22 = vld [vmem:[%s1477_s0 + $0xa0] sm:$0xff]  ;;  %s930_s3 = smov [#allocation2]  }
  0x2b   :  { %182 = vmatprep.mubr.f32.mxu0 %v929_v4  ;;  %533 = vmatpush1.msra.mxu0 %v496_v40  ;;  %v45_v23 = vld [vmem:[%s1477_s0 + $0xa8] sm:$0xff]  ;;  %v46_v24 = vld [vmem:[%s1477_s0 + $0xb0] sm:$0xff]  ;;  %v47_v25 = vld [vmem:[%s1477_s0 + $0xb8] sm:$0xff]  ;;  %s786_s17 = sshll.u32 %s930_s3, 4  ;;  %s787_s17 = int_to_ptr.vmem [resolvable:$true] %s786_s17 }
  0x2c   :  { %534 = vmatprep.subr.mxu0 %v929_v4  ;;  %852 = vmatpush1.msra.mxu1 %v494_v43  ;;  %v48_v26 = vld [vmem:[%s1477_s0 + $0xc0] sm:$0xff]  ;;  %v49_v27 = vld [vmem:[%s1477_s0 + $0xc8] sm:$0xff]  ;;  %v50_v28 = vld [vmem:[%s1477_s0 + $0xd0] sm:$0xff]  ;;  %s885_s18 = scalar_lea.vmem %s787_s17, 8192  ;;  %p890_p1 = scmp.lt.s32.totalorder %s787_s17, %s787_s17 }
  0x2d   :  { %535 = vmatpush1.msra.mxu0 %v495_v41  ;;  %821 = vmatprep.subr.mxu1 %v929_v4  ;;  %v51_v29 = vld [vmem:[%s1477_s0 + $0xd8] sm:$0xff]  ;;  %v52_v30 = vld [vmem:[%s1477_s0 + $0xe0] sm:$0xff]  ;;  %v53_v31 = vld [vmem:[%s1477_s0 + $0xe8] sm:$0xff]  ;;  %p886_p0 = scmp.ne.s32.totalorder %s787_s17, %s885_s18  ;;  %p891_p2 = scmp.lt.s32.totalorder %s885_s18, %s885_s18 }
  0x2e   :  { %183 = vmatmul.mubr.f32.gmra.mxu0 %v27_v42  ;;  %536 = vmatprep.subr.mxu0 %v929_v4  ;;  %v54_v32 = vld [vmem:[%s1477_s0 + $0xf0] sm:$0xff]  ;;  %v55_v33 = vld [vmem:[%s1477_s0 + $0xf8] sm:$0xff]  ;;  %v88_v37 = vld [vmem:[%s1479_s2] sm:$0x3] }
  0x2f   :  { %188 = vmatprep.mubr.f32.mxu0 %v929_v4  ;;  %537 = vmatpush1.msra.mxu0 %v494_v43  ;;  %v1366_v39 = vrot.slane %v88_v37, %v92_v36  ;;  %v1368_v40 = vrot.slane %v88_v37, %v96_v38  ;;  %p892_p3 = por %p891_p2, %p890_p1 }
  0x30   :  { %538 = vmatprep.subr.mxu0 %v929_v4  ;;  %853 = vmatpush1.msra.mxu1 %v493_v44 }
  0x31   :  { %539 = vmatpush1.msra.mxu0 %v493_v44  ;;  %822 = vmatprep.subr.mxu1 %v929_v4  ;;  %p893_p4 = pnand %p892_p3, %p886_p0 }
  0x32   :  { %189 = vmatmul.mubr.f32.gmra.mxu0 %v28_v45  ;;  %540 = vmatprep.subr.mxu0 %v929_v4 }
  0x33   :  { %194 = vmatprep.mubr.f32.mxu0 %v929_v4  ;;  %541 = vmatpush1.msra.mxu0 %v492_v46 }
  0x34   :  { %542 = vmatprep.subr.mxu0 %v929_v4  ;;  %854 = vmatpush1.msra.mxu1 %v492_v46 }
  0x35   :  { %543 = vmatpush1.msra.mxu0 %v491_v47  ;;  %823 = vmatprep.subr.mxu1 %v929_v4 }
  0x36   :  { %195 = vmatmul.mubr.f32.gmra.mxu0 %v29_v48  ;;  %544 = vmatprep.subr.mxu0 %v929_v4 }
  0x37   :  { %200 = vmatprep.mubr.f32.mxu0 %v929_v4  ;;  %545 = vmatpush1.msra.mxu0 %v490_v49 }
  0x38   :  { %546 = vmatprep.subr.mxu0 %v929_v4  ;;  %855 = vmatpush1.msra.mxu1 %v491_v47 }
  0x39   :  { %547 = vmatpush1.msra.mxu0 %v489_v50  ;;  %824 = vmatprep.subr.mxu1 %v929_v4 }
  0x3a   :  { %201 = vmatmul.mubr.f32.gmra.mxu0 %v30_v51  ;;  %548 = vmatprep.subr.mxu0 %v929_v4 }
  0x3b   :  { %206 = vmatprep.mubr.f32.mxu0 %v929_v4  ;;  %549 = vmatpush1.msra.mxu0 %v488_v52 }
  0x3c   :  { %550 = vmatprep.subr.mxu0 %v929_v4  ;;  %856 = vmatpush1.msra.mxu1 %v490_v49 }
  0x3d   :  { %551 = vmatpush1.msra.mxu0 %v487_v53  ;;  %825 = vmatprep.subr.mxu1 %v929_v4 }
  0x3e   :  { %207 = vmatmul.mubr.f32.gmra.mxu0 %v31_v54  ;;  %552 = vmatprep.subr.mxu0 %v929_v4 }
  0x3f   :  { %212 = vmatprep.mubr.f32.mxu0 %v929_v4  ;;  %553 = vmatpush1.msra.mxu0 %v486_v55 }
  0x40   :  { %554 = vmatprep.subr.mxu0 %v929_v4  ;;  %857 = vmatpush1.msra.mxu1 %v489_v50 }
  0x41   :  { %555 = vmatpush1.msra.mxu0 %v485_v56  ;;  %826 = vmatprep.subr.mxu1 %v929_v4 }
  0x42   :  { %213 = vmatmul.mubr.f32.gmra.mxu0 %v32_v57  ;;  %556 = vmatprep.subr.mxu0 %v929_v4 }
  0x43   :  { %218 = vmatprep.mubr.f32.mxu0 %v929_v4  ;;  %557 = vmatpush2.msra.mxu0 %v516_v58 }
  0x44   :  { %558 = vmatprep.subr.mxu0 %v929_v4  ;;  %858 = vmatpush1.msra.mxu1 %v488_v52 }
  0x45   :  { %559 = vmatpush2.msra.mxu0 %v515_v59  ;;  %827 = vmatprep.subr.mxu1 %v929_v4 }
  0x46   :  { %219 = vmatmul.mubr.f32.gmra.mxu0 %v33_v60  ;;  %560 = vmatprep.subr.mxu0 %v929_v4 }
  0x47   :  { %224 = vmatprep.mubr.f32.mxu0 %v929_v4  ;;  %561 = vmatpush2.msra.mxu0 %v514_v61 }
  0x48   :  { %562 = vmatprep.subr.mxu0 %v929_v4  ;;  %859 = vmatpush1.msra.mxu1 %v487_v53 }
  0x49   :  { %563 = vmatpush2.msra.mxu0 %v1197_v62  ;;  %828 = vmatprep.subr.mxu1 %v929_v4 }
  0x4a   :  { %225 = vmatmul.mubr.f32.gmra.mxu0 %v34_v63  ;;  %564 = vmatprep.subr.mxu0 %v929_v4 }
  0x4b   :  { %230 = vmatprep.mubr.f32.mxu0 %v929_v4  ;;  %565 = vmatpush2.msra.mxu0 %v512_v0 }
  0x4c   :  { %566 = vmatprep.subr.mxu0 %v929_v4  ;;  %860 = vmatpush1.msra.mxu1 %v486_v55 }
  0x4d   :  { %567 = vmatpush2.msra.mxu0 %v511_v2  ;;  %829 = vmatprep.subr.mxu1 %v929_v4 }
  0x4e   :  { %231 = vmatmul.mubr.f32.gmra.mxu0 %v35_v1  ;;  %568 = vmatprep.subr.mxu0 %v929_v4 }
  0x4f   :  { %236 = vmatprep.mubr.f32.mxu0 %v929_v4  ;;  %569 = vmatpush2.msra.mxu0 %v1223_v3 }
  0x50   :  { %570 = vmatprep.subr.mxu0 %v929_v4  ;;  %861 = vmatpush1.msra.mxu1 %v485_v56 }
  0x51   :  { %571 = vmatpush2.msra.mxu0 %v509_v6  ;;  %830 = vmatprep.subr.mxu1 %v929_v4 }
  0x52   :  { %237 = vmatmul.mubr.f32.gmra.mxu0 %v36_v5  ;;  %572 = vmatprep.subr.mxu0 %v929_v4 }
  0x53   :  { %242 = vmatprep.mubr.f32.mxu0 %v929_v4  ;;  %862 = vmatpush2.msra.mxu1 %v516_v58 }
  0x54   :  { %573 = vmatpush2.msra.mxu0 %v508_v8  ;;  %831 = vmatprep.subr.mxu1 %v929_v4 }
  0x55   :  { %574 = vmatprep.subr.mxu0 %v929_v4  ;;  %863 = vmatpush2.msra.mxu1 %v515_v59 }
  0x56   :  { %243 = vmatmul.mubr.f32.gmra.mxu0 %v37_v7  ;;  %832 = vmatprep.subr.mxu1 %v929_v4 }
  0x57   :  { %248 = vmatprep.mubr.f32.mxu0 %v929_v4  ;;  %575 = vmatpush2.msra.mxu0 %v507_v10 }
  0x58   :  { %576 = vmatprep.subr.mxu0 %v929_v4  ;;  %864 = vmatpush2.msra.mxu1 %v514_v61 }
  0x59   :  { %577 = vmatpush2.msra.mxu0 %v506_v12  ;;  %833 = vmatprep.subr.mxu1 %v929_v4 }
  0x5a   :  { %249 = vmatmul.mubr.f32.gmra.mxu0 %v38_v9  ;;  %578 = vmatprep.subr.mxu0 %v929_v4 }
  0x5b   :  { %254 = vmatprep.mubr.f32.mxu0 %v929_v4  ;;  %865 = vmatpush2.msra.mxu1 %v1197_v62 }
  0x5c   :  { %579 = vmatpush2.msra.mxu0 %v505_v13  ;;  %834 = vmatprep.subr.mxu1 %v929_v4 }
  0x5d   :  { %580 = vmatprep.subr.mxu0 %v929_v4  ;;  %866 = vmatpush2.msra.mxu1 %v512_v0 }
  0x5e   :  { %255 = vmatmul.mubr.f32.gmra.mxu0 %v39_v11  ;;  %835 = vmatprep.subr.mxu1 %v929_v4 }
  0x5f   :  { %260 = vmatprep.mubr.f32.mxu0 %v929_v4  ;;  %581 = vmatpush2.msra.mxu0 %v504_v15 }
  0x60   :  { %582 = vmatprep.subr.mxu0 %v929_v4  ;;  %867 = vmatpush2.msra.mxu1 %v511_v2 }
  0x61   :  { %583 = vmatpush2.msra.mxu0 %v503_v16  ;;  %836 = vmatprep.subr.mxu1 %v929_v4 }
  0x62   :  { %261 = vmatmul.mubr.f32.gmra.mxu0 %v40_v14  ;;  %584 = vmatprep.subr.mxu0 %v929_v4 }
  0x63   :  { %266 = vmatprep.mubr.f32.mxu0 %v929_v4  ;;  %868 = vmatpush2.msra.mxu1 %v1223_v3 }
  0x64   :  { %585 = vmatpush2.msra.mxu0 %v502_v18  ;;  %837 = vmatprep.subr.mxu1 %v929_v4 }
  0x65   :  { %586 = vmatprep.subr.mxu0 %v929_v4  ;;  %869 = vmatpush2.msra.mxu1 %v509_v6 }
  0x66   :  { %267 = vmatmul.mubr.f32.gmra.mxu0 %v41_v17  ;;  %838 = vmatprep.subr.mxu1 %v929_v4 }
  0x67   :  { %272 = vmatprep.mubr.f32.mxu0 %v929_v4  ;;  %587 = vmatpush2.msra.mxu0 %v501_v20 }
  0x68   :  { %870 = vmatpush2.msra.mxu1 %v508_v8 }
  0x69   :  { %839 = vmatprep.subr.mxu1 %v929_v4 }
  0x6a   :  { %273 = vmatmul.mubr.f32.gmra.mxu0 %v42_v19  ;;  %871 = vmatpush2.msra.mxu1 %v507_v10 }
  0x6b   :  { %278 = vmatprep.mubr.f32.mxu0 %v929_v4  ;;  %840 = vmatprep.subr.mxu1 %v929_v4 }
  0x6c   :  { %872 = vmatpush2.msra.mxu1 %v506_v12 }
  0x6d   :  { %841 = vmatprep.subr.mxu1 %v929_v4 }
  0x6e   :  { %279 = vmatmul.mubr.f32.gmra.mxu0 %v43_v21  ;;  %873 = vmatpush2.msra.mxu1 %v505_v13 }
  0x6f   :  { %284 = vmatprep.mubr.f32.mxu0 %v929_v4  ;;  %842 = vmatprep.subr.mxu1 %v929_v4 }
  0x70   :  { %874 = vmatpush2.msra.mxu1 %v504_v15 }
  0x71   :  { %843 = vmatprep.subr.mxu1 %v929_v4 }
  0x72   :  { %285 = vmatmul.mubr.f32.gmra.mxu0 %v44_v22  ;;  %875 = vmatpush2.msra.mxu1 %v503_v16 }
  0x73   :  { %290 = vmatprep.mubr.f32.mxu0 %v929_v4  ;;  %844 = vmatprep.subr.mxu1 %v929_v4 }
  0x74   :  { %876 = vmatpush2.msra.mxu1 %v502_v18 }
  0x75   :  { %845 = vmatprep.subr.mxu1 %v929_v4 }
  0x76   :  { %291 = vmatmul.mubr.f32.gmra.mxu0 %v45_v23  ;;  %877 = vmatpush2.msra.mxu1 %v501_v20 }
  0x77   :  { %296 = vmatprep.mubr.f32.mxu0 %v929_v4 }
  0x7a   :  { %297 = vmatmul.mubr.f32.gmra.mxu0 %v46_v24 }
  0x7b   :  { %302 = vmatprep.mubr.f32.mxu0 %v929_v4 }
  0x7e   :  { %303 = vmatmul.mubr.f32.gmra.mxu0 %v47_v25 }
  0x7f   :  { %308 = vmatprep.mubr.f32.mxu0 %v929_v4 }
  0x82   :  { %309 = vmatmul.mubr.f32.gmra.mxu0 %v48_v26 }
  0x83   :  { %314 = vmatprep.mubr.f32.mxu0 %v929_v4 }
  0x86   :  { %315 = vmatmul.mubr.f32.gmra.mxu0 %v49_v27 }
  0x87   :  { %320 = vmatprep.mubr.f32.mxu0 %v929_v4 }
  0x8a   :  { %321 = vmatmul.mubr.f32.gmra.mxu0 %v50_v28 }
  0x8b   :  { %326 = vmatprep.mubr.f32.mxu0 %v929_v4 }
  0x8e   :  { %327 = vmatmul.mubr.f32.gmra.mxu0 %v51_v29 }
  0x8f   :  { %332 = vmatprep.mubr.f32.mxu0 %v929_v4 }
  0x92   :  { %333 = vmatmul.mubr.f32.gmra.mxu0 %v52_v30 }
  0x93   :  { %338 = vmatprep.mubr.f32.mxu0 %v929_v4 }
  0x96   :  { %339 = vmatmul.mubr.f32.gmra.mxu0 %v53_v31 }
  0x97   :  { %344 = vmatprep.mubr.f32.mxu0 %v929_v4 }
  0x9a   :  { %345 = vmatmul.mubr.f32.gmra.mxu0 %v54_v32 }
  0x9b   :  { %350 = vmatprep.mubr.f32.mxu0 %v929_v4 }
  0x9e   :  { %351 = vmatmul.mubr.f32.gmra.mxu0 %v55_v33 }
  0xe2   :  { %v166_v41 = vpop.f32.mrf.mxu0 }
  0xe3   :  { %v167_v4 = vadd.f32 %v166_v41, %v1366_v39 }
  0xe4   :  { %v168_v42 = vpop.f32.mrf.mxu0 }
  0xe5   :  { %357 = vst [vmem:[#allocation2] sm:$0xff] %v167_v4  ;;  %v169_v43 = vadd.f32 %v168_v42, %v1368_v40 }
  0xe6   :  { %v172_v44 = vpop.f32.mrf.mxu0 }
  0xe7   :  { %358 = vst [vmem:[#allocation2 + $0x8] sm:$0xff] %v169_v43  ;;  %v173_v45 = vadd.f32 %v172_v44, %v1366_v39  ;;  %588 = vmatprep.mubr.f32.mxu0 %v169_v43 }
  0xe8   :  { %v174_v46 = vpop.f32.mrf.mxu0  ;;  %589 = vmatmul.mubr.f32.vlgmr.msra.gmra.mxu0 %v167_v4 }
  0xe9   :  { %359 = vst [vmem:[#allocation2 + $0x10] sm:$0xff] %v173_v45  ;;  %v175_v47 = vadd.f32 %v174_v46, %v1368_v40 }
  0xea   :  { %v178_v48 = vpop.f32.mrf.mxu0 }
  0xeb   :  { %360 = vst [vmem:[#allocation2 + $0x18] sm:$0xff] %v175_v47  ;;  %v179_v49 = vadd.f32 %v178_v48, %v1366_v39  ;;  %593 = vmatprep.mubr.f32.mxu0 %v175_v47 }
  0xec   :  { %v180_v50 = vpop.f32.mrf.mxu0  ;;  %594 = vmatmul.mubr.f32.gmra.mxu0 %v173_v45 }
  0xed   :  { %361 = vst [vmem:[#allocation2 + $0x20] sm:$0xff] %v179_v49  ;;  %v181_v51 = vadd.f32 %v180_v50, %v1368_v40 }
  0xee   :  { %v184_v52 = vpop.f32.mrf.mxu0 }
  0xef   :  { %362 = vst [vmem:[#allocation2 + $0x28] sm:$0xff] %v181_v51  ;;  %v185_v53 = vadd.f32 %v184_v52, %v1366_v39  ;;  %598 = vmatprep.mubr.f32.mxu0 %v181_v51 }
  0xf0   :  { %v186_v54 = vpop.f32.mrf.mxu0  ;;  %599 = vmatmul.mubr.f32.gmra.mxu0 %v179_v49 }
  0xf1   :  { %363 = vst [vmem:[#allocation2 + $0x30] sm:$0xff] %v185_v53  ;;  %v187_v55 = vadd.f32 %v186_v54, %v1368_v40 }
  0xf2   :  { %v190_v56 = vpop.f32.mrf.mxu0 }
  0xf3   :  { %364 = vst [vmem:[#allocation2 + $0x38] sm:$0xff] %v187_v55  ;;  %v191_v57 = vadd.f32 %v190_v56, %v1366_v39  ;;  %603 = vmatprep.mubr.f32.mxu0 %v187_v55 }
  0xf4   :  { %v192_v58 = vpop.f32.mrf.mxu0  ;;  %604 = vmatmul.mubr.f32.gmra.mxu0 %v185_v53 }
  0xf5   :  { %365 = vst [vmem:[#allocation2 + $0x40] sm:$0xff] %v191_v57  ;;  %v193_v59 = vadd.f32 %v192_v58, %v1368_v40 }
  0xf6   :  { %v196_v60 = vpop.f32.mrf.mxu0 }
  0xf7   :  { %366 = vst [vmem:[#allocation2 + $0x48] sm:$0xff] %v193_v59  ;;  %v197_v61 = vadd.f32 %v196_v60, %v1366_v39  ;;  %608 = vmatprep.mubr.f32.mxu1 %v193_v59 }
  0xf8   :  { %v198_v62 = vpop.f32.mrf.mxu0  ;;  %609 = vmatmul.mubr.f32.vlgmr.msra.gmra.mxu1 %v191_v57 }
  0xf9   :  { %367 = vst [vmem:[#allocation2 + $0x50] sm:$0xff] %v197_v61  ;;  %v199_v63 = vadd.f32 %v198_v62, %v1368_v40 }
  0xfa   :  { %v202_v0 = vpop.f32.mrf.mxu0 }
  0xfb   :  { %368 = vst [vmem:[#allocation2 + $0x58] sm:$0xff] %v199_v63  ;;  %v203_v1 = vadd.f32 %v202_v0, %v1366_v39  ;;  %613 = vmatprep.mubr.f32.mxu1 %v199_v63 }
  0xfc   :  { %v204_v2 = vpop.f32.mrf.mxu0  ;;  %614 = vmatmul.mubr.f32.gmra.mxu1 %v197_v61 }
  0xfd   :  { %369 = vst [vmem:[#allocation2 + $0x60] sm:$0xff] %v203_v1  ;;  %v205_v3 = vadd.f32 %v204_v2, %v1368_v40 }
  0xfe   :  { %v208_v5 = vpop.f32.mrf.mxu0 }
  0xff   :  { %370 = vst [vmem:[#allocation2 + $0x68] sm:$0xff] %v205_v3  ;;  %v209_v6 = vadd.f32 %v208_v5, %v1366_v39  ;;  %618 = vmatprep.mubr.f32.mxu1 %v205_v3 }
 0x100   :  { %v210_v7 = vpop.f32.mrf.mxu0  ;;  %619 = vmatmul.mubr.f32.gmra.mxu1 %v203_v1 }
 0x101   :  { %371 = vst [vmem:[#allocation2 + $0x70] sm:$0xff] %v209_v6  ;;  %v211_v8 = vadd.f32 %v210_v7, %v1368_v40 }
 0x102   :  { %v214_v9 = vpop.f32.mrf.mxu0 }
 0x103   :  { %372 = vst [vmem:[#allocation2 + $0x78] sm:$0xff] %v211_v8  ;;  %v215_v10 = vadd.f32 %v214_v9, %v1366_v39  ;;  %623 = vmatprep.mubr.f32.mxu1 %v211_v8 }
 0x104   :  { %v216_v11 = vpop.f32.mrf.mxu0  ;;  %624 = vmatmul.mubr.f32.gmra.mxu1 %v209_v6 }
 0x105   :  { %373 = vst [vmem:[#allocation2 + $0x80] sm:$0xff] %v215_v10  ;;  %v217_v12 = vadd.f32 %v216_v11, %v1368_v40 }
 0x106   :  { %v220_v13 = vpop.f32.mrf.mxu0 }
 0x107   :  { %374 = vst [vmem:[#allocation2 + $0x88] sm:$0xff] %v217_v12  ;;  %v221_v14 = vadd.f32 %v220_v13, %v1366_v39  ;;  %628 = vmatprep.mubr.f32.mxu1 %v217_v12 }
 0x108   :  { %v222_v15 = vpop.f32.mrf.mxu0  ;;  %629 = vmatmul.mubr.f32.gmra.mxu1 %v215_v10 }
 0x109   :  { %375 = vst [vmem:[#allocation2 + $0x90] sm:$0xff] %v221_v14  ;;  %v223_v16 = vadd.f32 %v222_v15, %v1368_v40 }
 0x10a   :  { %v226_v17 = vpop.f32.mrf.mxu0 }
 0x10b   :  { %376 = vst [vmem:[#allocation2 + $0x98] sm:$0xff] %v223_v16  ;;  %v227_v18 = vadd.f32 %v226_v17, %v1366_v39  ;;  %633 = vmatprep.mubr.f32.mxu1 %v223_v16 }
 0x10c   :  { %v228_v19 = vpop.f32.mrf.mxu0  ;;  %634 = vmatmul.mubr.f32.gmra.mxu1 %v221_v14 }
 0x10d   :  { %377 = vst [vmem:[#allocation2 + $0xa0] sm:$0xff] %v227_v18  ;;  %v229_v20 = vadd.f32 %v228_v19, %v1368_v40 }
 0x10e   :  { %v232_v21 = vpop.f32.mrf.mxu0 }
 0x10f   :  { %378 = vst [vmem:[#allocation2 + $0xa8] sm:$0xff] %v229_v20  ;;  %v233_v22 = vadd.f32 %v232_v21, %v1366_v39  ;;  %638 = vmatprep.mubr.f32.mxu1 %v229_v20 }
 0x110   :  { %v234_v23 = vpop.f32.mrf.mxu0  ;;  %639 = vmatmul.mubr.f32.gmra.mxu1 %v227_v18 }
 0x111   :  { %379 = vst [vmem:[#allocation2 + $0xb0] sm:$0xff] %v233_v22  ;;  %v235_v24 = vadd.f32 %v234_v23, %v1368_v40 }
 0x112   :  { %v238_v25 = vpop.f32.mrf.mxu0 }
 0x113   :  { %380 = vst [vmem:[#allocation2 + $0xb8] sm:$0xff] %v235_v24  ;;  %v239_v26 = vadd.f32 %v238_v25, %v1366_v39  ;;  %643 = vmatprep.mubr.f32.mxu1 %v235_v24 }
 0x114   :  { %v240_v27 = vpop.f32.mrf.mxu0  ;;  %644 = vmatmul.mubr.f32.gmra.mxu1 %v233_v22 }
 0x115   :  { %381 = vst [vmem:[#allocation2 + $0xc0] sm:$0xff] %v239_v26  ;;  %v241_v28 = vadd.f32 %v240_v27, %v1368_v40 }
 0x116   :  { %v244_v29 = vpop.f32.mrf.mxu0 }
 0x117   :  { %382 = vst [vmem:[#allocation2 + $0xc8] sm:$0xff] %v241_v28  ;;  %v245_v30 = vadd.f32 %v244_v29, %v1366_v39  ;;  %648 = vmatprep.mubr.f32.mxu1 %v241_v28 }
 0x118   :  { %v246_v31 = vpop.f32.mrf.mxu0  ;;  %649 = vmatmul.mubr.f32.gmra.mxu1 %v239_v26 }
 0x119   :  { %383 = vst [vmem:[#allocation2 + $0xd0] sm:$0xff] %v245_v30  ;;  %v247_v32 = vadd.f32 %v246_v31, %v1368_v40 }
 0x11a   :  { %v250_v33 = vpop.f32.mrf.mxu0 }
 0x11b   :  { %384 = vst [vmem:[#allocation2 + $0xd8] sm:$0xff] %v247_v32  ;;  %v251_v34 = vadd.f32 %v250_v33, %v1366_v39  ;;  %653 = vmatprep.mubr.f32.mxu1 %v247_v32 }
 0x11c   :  { %v252_v35 = vpop.f32.mrf.mxu0  ;;  %654 = vmatmul.mubr.f32.gmra.mxu1 %v245_v30 }
 0x11d   :  { %385 = vst [vmem:[#allocation2 + $0xe0] sm:$0xff] %v251_v34  ;;  %v253_v36 = vadd.f32 %v252_v35, %v1368_v40 }
 0x11e   :  { %v256_v37 = vpop.f32.mrf.mxu0 }
 0x11f   :  { %386 = vst [vmem:[#allocation2 + $0xe8] sm:$0xff] %v253_v36  ;;  %v257_v38 = vadd.f32 %v256_v37, %v1366_v39  ;;  %658 = vmatprep.mubr.f32.mxu1 %v253_v36 }
 0x120   :  { %v258_v41 = vpop.f32.mrf.mxu0  ;;  %659 = vmatmul.mubr.f32.gmra.mxu1 %v251_v34 }
 0x121   :  { %387 = vst [vmem:[#allocation2 + $0xf0] sm:$0xff] %v257_v38  ;;  %v259_v4 = vadd.f32 %v258_v41, %v1368_v40 }
 0x122   :  { %v262_v42 = vpop.f32.mrf.mxu0 }
 0x123   :  { %388 = vst [vmem:[#allocation2 + $0xf8] sm:$0xff] %v259_v4  ;;  %v263_v43 = vadd.f32 %v262_v42, %v1366_v39  ;;  %663 = vmatprep.mubr.f32.mxu1 %v259_v4 }
 0x124   :  { %v264_v44 = vpop.f32.mrf.mxu0  ;;  %664 = vmatmul.mubr.f32.gmra.mxu1 %v257_v38 }
 0x125   :  { %389 = vst [vmem:[#allocation2 + $0x100] sm:$0xff] %v263_v43  ;;  %v265_v45 = vadd.f32 %v264_v44, %v1368_v40  ;;  %v1437_v44 = vld [vmem:[%s1481_s4] ss:$0 sm:$0xff] }
 0x126   :  { %v268_v46 = vpop.f32.mrf.mxu0 }
 0x127   :  { %390 = vst [vmem:[#allocation2 + $0x108] sm:$0xff] %v265_v45  ;;  %v269_v47 = vadd.f32 %v268_v46, %v1366_v39  ;;  %668 = vmatprep.mubr.f32.mxu1 %v265_v45 }
 0x128   :  { %v270_v48 = vpop.f32.mrf.mxu0  ;;  %669 = vmatmul.mubr.f32.gmra.mxu1 %v263_v43 }
 0x129   :  { %391 = vst [vmem:[#allocation2 + $0x110] sm:$0xff] %v269_v47  ;;  %v271_v49 = vadd.f32 %v270_v48, %v1368_v40 }
 0x12a   :  { %v274_v50 = vpop.f32.mrf.mxu0 }
 0x12b   :  { %392 = vst [vmem:[#allocation2 + $0x118] sm:$0xff] %v271_v49  ;;  %v275_v51 = vadd.f32 %v274_v50, %v1366_v39  ;;  %673 = vmatprep.mubr.f32.mxu1 %v271_v49 }
 0x12c   :  { %v276_v52 = vpop.f32.mrf.mxu0  ;;  %674 = vmatmul.mubr.f32.gmra.mxu1 %v269_v47 }
 0x12d   :  { %393 = vst [vmem:[#allocation2 + $0x120] sm:$0xff] %v275_v51  ;;  %v277_v53 = vadd.f32 %v276_v52, %v1368_v40 }
 0x12e   :  { %v280_v54 = vpop.f32.mrf.mxu0 }
 0x12f   :  { %394 = vst [vmem:[#allocation2 + $0x128] sm:$0xff] %v277_v53  ;;  %v281_v55 = vadd.f32 %v280_v54, %v1366_v39  ;;  %678 = vmatprep.mubr.f32.mxu1 %v277_v53 }
 0x130   :  { %v282_v56 = vpop.f32.mrf.mxu0  ;;  %679 = vmatmul.mubr.f32.gmra.mxu1 %v275_v51 }
 0x131   :  { %395 = vst [vmem:[#allocation2 + $0x130] sm:$0xff] %v281_v55  ;;  %v283_v57 = vadd.f32 %v282_v56, %v1368_v40 }
 0x132   :  { %v286_v58 = vpop.f32.mrf.mxu0 }
 0x133   :  { %396 = vst [vmem:[#allocation2 + $0x138] sm:$0xff] %v283_v57  ;;  %v287_v59 = vadd.f32 %v286_v58, %v1366_v39  ;;  %683 = vmatprep.mubr.f32.mxu1 %v283_v57 }
 0x134   :  { %v288_v60 = vpop.f32.mrf.mxu0  ;;  %684 = vmatmul.mubr.f32.gmra.mxu1 %v281_v55 }
 0x135   :  { %397 = vst [vmem:[#allocation2 + $0x140] sm:$0xff] %v287_v59  ;;  %v289_v61 = vadd.f32 %v288_v60, %v1368_v40 }
 0x136   :  { %v292_v62 = vpop.f32.mrf.mxu0 }
 0x137   :  { %398 = vst [vmem:[#allocation2 + $0x148] sm:$0xff] %v289_v61  ;;  %v293_v63 = vadd.f32 %v292_v62, %v1366_v39  ;;  %688 = vmatprep.mubr.f32.mxu1 %v289_v61 }
 0x138   :  { %v294_v0 = vpop.f32.mrf.mxu0  ;;  %689 = vmatmul.mubr.f32.gmra.mxu1 %v287_v59 }
 0x139   :  { %399 = vst [vmem:[#allocation2 + $0x150] sm:$0xff] %v293_v63  ;;  %v295_v1 = vadd.f32 %v294_v0, %v1368_v40 }
 0x13a   :  { %v298_v2 = vpop.f32.mrf.mxu0 }
 0x13b   :  { %400 = vst [vmem:[#allocation2 + $0x158] sm:$0xff] %v295_v1  ;;  %v299_v3 = vadd.f32 %v298_v2, %v1366_v39  ;;  %693 = vmatprep.mubr.f32.mxu1 %v295_v1 }
 0x13c   :  { %v300_v5 = vpop.f32.mrf.mxu0  ;;  %694 = vmatmul.mubr.f32.gmra.mxu1 %v293_v63 }
 0x13d   :  { %401 = vst [vmem:[#allocation2 + $0x160] sm:$0xff] %v299_v3  ;;  %v301_v6 = vadd.f32 %v300_v5, %v1368_v40 }
 0x13e   :  { %v304_v7 = vpop.f32.mrf.mxu0 }
 0x13f   :  { %402 = vst [vmem:[#allocation2 + $0x168] sm:$0xff] %v301_v6  ;;  %v305_v8 = vadd.f32 %v304_v7, %v1366_v39  ;;  %698 = vmatprep.mubr.f32.mxu1 %v301_v6 }
 0x140   :  { %v306_v9 = vpop.f32.mrf.mxu0  ;;  %699 = vmatmul.mubr.f32.gmra.mxu1 %v299_v3 }
 0x141   :  { %403 = vst [vmem:[#allocation2 + $0x170] sm:$0xff] %v305_v8  ;;  %v307_v10 = vadd.f32 %v306_v9, %v1368_v40 }
 0x142   :  { %v310_v11 = vpop.f32.mrf.mxu0 }
 0x143   :  { %404 = vst [vmem:[#allocation2 + $0x178] sm:$0xff] %v307_v10  ;;  %v311_v12 = vadd.f32 %v310_v11, %v1366_v39  ;;  %703 = vmatprep.mubr.f32.mxu1 %v307_v10 }
 0x144   :  { %v312_v13 = vpop.f32.mrf.mxu0  ;;  %704 = vmatmul.mubr.f32.gmra.mxu1 %v305_v8 }
 0x145   :  { %405 = vst [vmem:[#allocation2 + $0x180] sm:$0xff] %v311_v12  ;;  %v313_v14 = vadd.f32 %v312_v13, %v1368_v40 }
 0x146   :  { %v316_v15 = vpop.f32.mrf.mxu0 }
 0x147   :  { %406 = vst [vmem:[#allocation2 + $0x188] sm:$0xff] %v313_v14  ;;  %v317_v16 = vadd.f32 %v316_v15, %v1366_v39  ;;  %708 = vmatprep.mubr.f32.mxu1 %v313_v14 }
 0x148   :  { %v318_v17 = vpop.f32.mrf.mxu0  ;;  %709 = vmatmul.mubr.f32.gmra.mxu1 %v311_v12 }
 0x149   :  { %407 = vst [vmem:[#allocation2 + $0x190] sm:$0xff] %v317_v16  ;;  %v319_v18 = vadd.f32 %v318_v17, %v1368_v40 }
 0x14a   :  { %v322_v19 = vpop.f32.mrf.mxu0 }
 0x14b   :  { %408 = vst [vmem:[#allocation2 + $0x198] sm:$0xff] %v319_v18  ;;  %v323_v20 = vadd.f32 %v322_v19, %v1366_v39  ;;  %713 = vmatprep.mubr.f32.mxu1 %v319_v18 }
 0x14c   :  { %v324_v21 = vpop.f32.mrf.mxu0  ;;  %714 = vmatmul.mubr.f32.gmra.mxu1 %v317_v16 }
 0x14d   :  { %409 = vst [vmem:[#allocation2 + $0x1a0] sm:$0xff] %v323_v20  ;;  %v325_v22 = vadd.f32 %v324_v21, %v1368_v40 }
 0x14e   :  { %v328_v23 = vpop.f32.mrf.mxu0 }
 0x14f   :  { %410 = vst [vmem:[#allocation2 + $0x1a8] sm:$0xff] %v325_v22  ;;  %v329_v24 = vadd.f32 %v328_v23, %v1366_v39  ;;  %718 = vmatprep.mubr.f32.mxu1 %v325_v22 }
 0x150   :  { %v330_v25 = vpop.f32.mrf.mxu0  ;;  %719 = vmatmul.mubr.f32.gmra.mxu1 %v323_v20 }
 0x151   :  { %411 = vst [vmem:[#allocation2 + $0x1b0] sm:$0xff] %v329_v24  ;;  %v331_v26 = vadd.f32 %v330_v25, %v1368_v40 }
 0x152   :  { %v334_v27 = vpop.f32.mrf.mxu0 }
 0x153   :  { %412 = vst [vmem:[#allocation2 + $0x1b8] sm:$0xff] %v331_v26  ;;  %v335_v28 = vadd.f32 %v334_v27, %v1366_v39  ;;  %723 = vmatprep.mubr.f32.mxu1 %v331_v26 }
 0x154   :  { %v336_v29 = vpop.f32.mrf.mxu0  ;;  %724 = vmatmul.mubr.f32.gmra.mxu1 %v329_v24 }
 0x155   :  { %413 = vst [vmem:[#allocation2 + $0x1c0] sm:$0xff] %v335_v28  ;;  %v337_v30 = vadd.f32 %v336_v29, %v1368_v40 }
 0x156   :  { %v340_v31 = vpop.f32.mrf.mxu0 }
 0x157   :  { %414 = vst [vmem:[#allocation2 + $0x1c8] sm:$0xff] %v337_v30  ;;  %v341_v32 = vadd.f32 %v340_v31, %v1366_v39  ;;  %728 = vmatprep.mubr.f32.mxu1 %v337_v30 }
 0x158   :  { %v342_v33 = vpop.f32.mrf.mxu0  ;;  %729 = vmatmul.mubr.f32.gmra.mxu1 %v335_v28 }
 0x159   :  { %415 = vst [vmem:[#allocation2 + $0x1d0] sm:$0xff] %v341_v32  ;;  %v343_v34 = vadd.f32 %v342_v33, %v1368_v40 }
 0x15a   :  { %v346_v35 = vpop.f32.mrf.mxu0 }
 0x15b   :  { %416 = vst [vmem:[#allocation2 + $0x1d8] sm:$0xff] %v343_v34  ;;  %v347_v36 = vadd.f32 %v346_v35, %v1366_v39  ;;  %733 = vmatprep.mubr.f32.mxu1 %v343_v34 }
 0x15c   :  { %v348_v37 = vpop.f32.mrf.mxu0  ;;  %734 = vmatmul.mubr.f32.gmra.mxu1 %v341_v32 }
 0x15d   :  { %417 = vst [vmem:[#allocation2 + $0x1e0] sm:$0xff] %v347_v36  ;;  %v349_v38 = vadd.f32 %v348_v37, %v1368_v40 }
 0x15e   :  { %v352_v41 = vpop.f32.mrf.mxu0 }
 0x15f   :  { %418 = vst [vmem:[#allocation2 + $0x1e8] sm:$0xff] %v349_v38  ;;  %v353_v4 = vadd.f32 %v352_v41, %v1366_v39  ;;  %738 = vmatprep.mubr.f32.mxu1 %v349_v38 }
 0x160   :  { %v354_v42 = vpop.f32.mrf.mxu0  ;;  %739 = vmatmul.mubr.f32.gmra.mxu1 %v347_v36 }
 0x161   :  { %419 = vst [vmem:[#allocation2 + $0x1f0] sm:$0xff] %v353_v4  ;;  %v355_v43 = vadd.f32 %v354_v42, %v1368_v40 }
 0x163   :  { %420 = vst [vmem:[#allocation2 + $0x1f8] sm:$0xff] %v355_v43  ;;  %743 = vmatprep.mubr.f32.mxu1 %v355_v43 }
 0x164   :  { %744 = vmatmul.mubr.f32.gmra.mxu1 %v353_v4 }
 0x1a8   :  { %v590_v45 = vpop.f32.mrf.mxu0 }
 0x1a9   :  { %v591_v39 = vadd.f32 %v1437_v44, %v590_v45 }
 0x1aa   :  { %896 = shalt.err (!%p893_p4)
}
 0x1ab   :  { %s931_s1 = smov 256   ;;  %s932_s19 = smov 16   ;;  %v592_v40 = vpop.f32.mrf.mxu0  ;;  %749 = vst [vmem:[#allocation4] sm:$0xff] %v591_v39 }
 0x1ac   :  { %792 = dma.vmem_to_hbm [thread:$0]  %s787_s17, 8192, %s1482_s5, [#allocation3], %s931_s1, %s931_s1, %s932_s19  }
 0x1ad   :  { %v595_v46 = vpop.f32.mrf.mxu0  ;;  %s933_s4 = smov [#allocation4]  }
 0x1ae   :  { %v596_v47 = vadd.f32 %v1437_v44, %v595_v46  ;;  %s798_s5 = sshll.u32 %s933_s4, 4  ;;  %s799_s5 = int_to_ptr.vmem [resolvable:$true] %s798_s5 }
 0x1af   :  { %v597_v48 = vpop.f32.mrf.mxu0  ;;  %s905_s22 = scalar_lea.vmem %s799_s5, 4096  ;;  %p910_p6 = scmp.lt.s32.totalorder %s799_s5, %s799_s5 }
 0x1b0   :  { %750 = vst [vmem:[#allocation4 + $0x8] sm:$0xff] %v596_v47  ;;  %p906_p5 = scmp.ne.s32.totalorder %s799_s5, %s905_s22  ;;  %p911_p7 = scmp.lt.s32.totalorder %s905_s22, %s905_s22 }
 0x1b1   :  { %v600_v49 = vpop.f32.mrf.mxu0 }
 0x1b2   :  { %v601_v50 = vadd.f32 %v1437_v44, %v600_v49  ;;  %p912_p8 = por %p911_p7, %p910_p6 }
 0x1b3   :  { %v602_v51 = vpop.f32.mrf.mxu0 }
 0x1b4   :  { %751 = vst [vmem:[#allocation4 + $0x10] sm:$0xff] %v601_v50  ;;  %p913_p9 = pnand %p912_p8, %p906_p5 }
 0x1b5   :  { %v605_v52 = vpop.f32.mrf.mxu0 }
 0x1b6   :  { %v606_v53 = vadd.f32 %v1437_v44, %v605_v52 }
 0x1b7   :  { %v607_v54 = vpop.f32.mrf.mxu0 }
 0x1b8   :  { %752 = vst [vmem:[#allocation4 + $0x18] sm:$0xff] %v606_v53  ;;  %v610_v55 = vpop.f32.mrf.mxu1 }
 0x1b9   :  { %v611_v56 = vadd.f32 %v1437_v44, %v610_v55 }
 0x1ba   :  { %v612_v57 = vpop.f32.mrf.mxu1 }
 0x1bb   :  { %753 = vst [vmem:[#allocation4 + $0x20] sm:$0xff] %v611_v56 }
 0x1bc   :  { %v615_v58 = vpop.f32.mrf.mxu1 }
 0x1bd   :  { %v616_v59 = vadd.f32 %v1437_v44, %v615_v58 }
 0x1be   :  { %v617_v60 = vpop.f32.mrf.mxu1 }
 0x1bf   :  { %754 = vst [vmem:[#allocation4 + $0x28] sm:$0xff] %v616_v59 }
 0x1c0   :  { %v620_v61 = vpop.f32.mrf.mxu1 }
 0x1c1   :  { %v621_v62 = vadd.f32 %v1437_v44, %v620_v61 }
 0x1c2   :  { %v622_v63 = vpop.f32.mrf.mxu1 }
 0x1c3   :  { %755 = vst [vmem:[#allocation4 + $0x30] sm:$0xff] %v621_v62 }
 0x1c4   :  { %v625_v0 = vpop.f32.mrf.mxu1 }
 0x1c5   :  { %v626_v1 = vadd.f32 %v1437_v44, %v625_v0 }
 0x1c6   :  { %v627_v2 = vpop.f32.mrf.mxu1 }
 0x1c7   :  { %756 = vst [vmem:[#allocation4 + $0x38] sm:$0xff] %v626_v1 }
 0x1c8   :  { %v630_v3 = vpop.f32.mrf.mxu1 }
 0x1c9   :  { %v631_v5 = vadd.f32 %v1437_v44, %v630_v3 }
 0x1ca   :  { %v632_v6 = vpop.f32.mrf.mxu1 }
 0x1cb   :  { %757 = vst [vmem:[#allocation4 + $0x40] sm:$0xff] %v631_v5 }
 0x1cc   :  { %v635_v7 = vpop.f32.mrf.mxu1 }
 0x1cd   :  { %v636_v8 = vadd.f32 %v1437_v44, %v635_v7 }
 0x1ce   :  { %v637_v9 = vpop.f32.mrf.mxu1 }
 0x1cf   :  { %758 = vst [vmem:[#allocation4 + $0x48] sm:$0xff] %v636_v8 }
 0x1d0   :  { %v640_v10 = vpop.f32.mrf.mxu1 }
 0x1d1   :  { %v641_v11 = vadd.f32 %v1437_v44, %v640_v10 }
 0x1d2   :  { %v642_v12 = vpop.f32.mrf.mxu1 }
 0x1d3   :  { %759 = vst [vmem:[#allocation4 + $0x50] sm:$0xff] %v641_v11 }
 0x1d4   :  { %v645_v13 = vpop.f32.mrf.mxu1 }
 0x1d5   :  { %v646_v14 = vadd.f32 %v1437_v44, %v645_v13 }
 0x1d6   :  { %v647_v15 = vpop.f32.mrf.mxu1 }
 0x1d7   :  { %760 = vst [vmem:[#allocation4 + $0x58] sm:$0xff] %v646_v14 }
 0x1d8   :  { %v650_v16 = vpop.f32.mrf.mxu1 }
 0x1d9   :  { %v651_v17 = vadd.f32 %v1437_v44, %v650_v16 }
 0x1da   :  { %v652_v18 = vpop.f32.mrf.mxu1 }
 0x1db   :  { %761 = vst [vmem:[#allocation4 + $0x60] sm:$0xff] %v651_v17 }
 0x1dc   :  { %v655_v19 = vpop.f32.mrf.mxu1 }
 0x1dd   :  { %v656_v20 = vadd.f32 %v1437_v44, %v655_v19 }
 0x1de   :  { %v657_v21 = vpop.f32.mrf.mxu1 }
 0x1df   :  { %762 = vst [vmem:[#allocation4 + $0x68] sm:$0xff] %v656_v20 }
 0x1e0   :  { %v660_v22 = vpop.f32.mrf.mxu1 }
 0x1e1   :  { %v661_v23 = vadd.f32 %v1437_v44, %v660_v22 }
 0x1e2   :  { %v662_v24 = vpop.f32.mrf.mxu1 }
 0x1e3   :  { %763 = vst [vmem:[#allocation4 + $0x70] sm:$0xff] %v661_v23 }
 0x1e4   :  { %v665_v25 = vpop.f32.mrf.mxu1 }
 0x1e5   :  { %v666_v26 = vadd.f32 %v1437_v44, %v665_v25 }
 0x1e6   :  { %v667_v27 = vpop.f32.mrf.mxu1 }
 0x1e7   :  { %764 = vst [vmem:[#allocation4 + $0x78] sm:$0xff] %v666_v26 }
 0x1e8   :  { %v670_v28 = vpop.f32.mrf.mxu1 }
 0x1e9   :  { %v671_v29 = vadd.f32 %v1437_v44, %v670_v28 }
 0x1ea   :  { %v672_v30 = vpop.f32.mrf.mxu1 }
 0x1eb   :  { %765 = vst [vmem:[#allocation4 + $0x80] sm:$0xff] %v671_v29 }
 0x1ec   :  { %v675_v31 = vpop.f32.mrf.mxu1 }
 0x1ed   :  { %v676_v32 = vadd.f32 %v1437_v44, %v675_v31 }
 0x1ee   :  { %v677_v33 = vpop.f32.mrf.mxu1 }
 0x1ef   :  { %766 = vst [vmem:[#allocation4 + $0x88] sm:$0xff] %v676_v32 }
 0x1f0   :  { %v680_v34 = vpop.f32.mrf.mxu1 }
 0x1f1   :  { %v681_v35 = vadd.f32 %v1437_v44, %v680_v34 }
 0x1f2   :  { %v682_v36 = vpop.f32.mrf.mxu1 }
 0x1f3   :  { %767 = vst [vmem:[#allocation4 + $0x90] sm:$0xff] %v681_v35 }
 0x1f4   :  { %v685_v37 = vpop.f32.mrf.mxu1 }
 0x1f5   :  { %v686_v38 = vadd.f32 %v1437_v44, %v685_v37 }
 0x1f6   :  { %v687_v41 = vpop.f32.mrf.mxu1 }
 0x1f7   :  { %768 = vst [vmem:[#allocation4 + $0x98] sm:$0xff] %v686_v38 }
 0x1f8   :  { %v690_v4 = vpop.f32.mrf.mxu1 }
 0x1f9   :  { %v691_v42 = vadd.f32 %v1437_v44, %v690_v4 }
 0x1fa   :  { %v692_v43 = vpop.f32.mrf.mxu1 }
 0x1fb   :  { %769 = vst [vmem:[#allocation4 + $0xa0] sm:$0xff] %v691_v42 }
 0x1fc   :  { %v695_v45 = vpop.f32.mrf.mxu1 }
 0x1fd   :  { %v696_v39 = vadd.f32 %v1437_v44, %v695_v45 }
 0x1fe   :  { %v697_v40 = vpop.f32.mrf.mxu1 }
 0x1ff   :  { %770 = vst [vmem:[#allocation4 + $0xa8] sm:$0xff] %v696_v39 }
 0x200   :  { %v700_v46 = vpop.f32.mrf.mxu1 }
 0x201   :  { %v701_v47 = vadd.f32 %v1437_v44, %v700_v46 }
 0x202   :  { %v702_v48 = vpop.f32.mrf.mxu1 }
 0x203   :  { %771 = vst [vmem:[#allocation4 + $0xb0] sm:$0xff] %v701_v47 }
 0x204   :  { %v705_v49 = vpop.f32.mrf.mxu1 }
 0x205   :  { %v706_v50 = vadd.f32 %v1437_v44, %v705_v49 }
 0x206   :  { %v707_v51 = vpop.f32.mrf.mxu1 }
 0x207   :  { %772 = vst [vmem:[#allocation4 + $0xb8] sm:$0xff] %v706_v50 }
 0x208   :  { %v710_v52 = vpop.f32.mrf.mxu1 }
 0x209   :  { %v711_v53 = vadd.f32 %v1437_v44, %v710_v52 }
 0x20a   :  { %v712_v54 = vpop.f32.mrf.mxu1 }
 0x20b   :  { %773 = vst [vmem:[#allocation4 + $0xc0] sm:$0xff] %v711_v53 }
 0x20c   :  { %v715_v55 = vpop.f32.mrf.mxu1 }
 0x20d   :  { %v716_v56 = vadd.f32 %v1437_v44, %v715_v55 }
 0x20e   :  { %v717_v57 = vpop.f32.mrf.mxu1 }
 0x20f   :  { %774 = vst [vmem:[#allocation4 + $0xc8] sm:$0xff] %v716_v56 }
 0x210   :  { %v720_v58 = vpop.f32.mrf.mxu1 }
 0x211   :  { %v721_v59 = vadd.f32 %v1437_v44, %v720_v58 }
 0x212   :  { %v722_v60 = vpop.f32.mrf.mxu1 }
 0x213   :  { %775 = vst [vmem:[#allocation4 + $0xd0] sm:$0xff] %v721_v59 }
 0x214   :  { %v725_v61 = vpop.f32.mrf.mxu1 }
 0x215   :  { %v726_v62 = vadd.f32 %v1437_v44, %v725_v61 }
 0x216   :  { %v727_v63 = vpop.f32.mrf.mxu1 }
 0x217   :  { %776 = vst [vmem:[#allocation4 + $0xd8] sm:$0xff] %v726_v62 }
 0x218   :  { %v730_v0 = vpop.f32.mrf.mxu1 }
 0x219   :  { %v731_v1 = vadd.f32 %v1437_v44, %v730_v0 }
 0x21a   :  { %v732_v2 = vpop.f32.mrf.mxu1 }
 0x21b   :  { %777 = vst [vmem:[#allocation4 + $0xe0] sm:$0xff] %v731_v1 }
 0x21c   :  { %v735_v3 = vpop.f32.mrf.mxu1 }
 0x21d   :  { %v736_v5 = vadd.f32 %v1437_v44, %v735_v3 }
 0x21e   :  { %v737_v6 = vpop.f32.mrf.mxu1 }
 0x21f   :  { %778 = vst [vmem:[#allocation4 + $0xe8] sm:$0xff] %v736_v5 }
 0x220   :  { %v740_v7 = vpop.f32.mrf.mxu1 }
 0x221   :  { %v741_v8 = vadd.f32 %v1437_v44, %v740_v7 }
 0x222   :  { %v742_v9 = vpop.f32.mrf.mxu1 }
 0x223   :  { %779 = vst [vmem:[#allocation4 + $0xf0] sm:$0xff] %v741_v8 }
 0x224   :  { %v745_v10 = vpop.f32.mrf.mxu1 }
 0x225   :  { %v746_v11 = vadd.f32 %v1437_v44, %v745_v10 }
 0x226   :  { %v747_v12 = vpop.f32.mrf.mxu1 }
 0x227   :  { %780 = vst [vmem:[#allocation4 + $0xf8] sm:$0xff] %v746_v11 }
 0x228   :  { %916 = shalt.err (!%p913_p9)
}
 0x229   :  { %s934_s23 = smov 128   ;;  %s935_s24 = smov 8  }
 0x22a   :  { %804 = dma.vmem_to_hbm [thread:$0]  %s799_s5, 4096, %s1483_s6, [#allocation5], %s934_s23, %s934_s23, %s935_s24  }
 0x22b   :  { %925 = dma.done.wait [#allocation3], 8192  }
 0x22c   :  { %926 = vsyncadd [#allocation3], 4294959104 }
 0x22d   :  { %927 = dma.done.wait [#allocation5], 4096  }
 0x22e   :  { %928 = vsyncadd [#allocation5], 4294963200 }
 0x22f   :  { %811 = vsyncpa [#allocation3], 1 }
 0x230   :  { %812 = vsyncpa [#allocation5], 1 }

// kernel: _forward_impl.3
= control target key start
LH: loop header
LB: loop body
LE: loop exit
PB: predicated region body
PF: predicated region fallthrough
CT: control target
= control target key end

     0   :  { %v594_v34 = vmov 0   ;;  %s1070_s0 = inlined_call_operand.vmem [shape: f32[256,128], index: 0, kind: input, shape index: {}]   ;;  %s1071_s1 = inlined_call_operand.vmem [shape: f32[256,1], index: 1, kind: input, shape index: {}]   ;;  %s1072_s2 = inlined_call_operand.vmem [shape: f32[128,256], index: 2, kind: output, shape index: {}]  }
   0x1   :  { %v613_v0 = vld [vmem:[%s1070_s0 + $0x10] sm:$0xff]  ;;  %v618_v1 = vld [vmem:[%s1070_s0] sm:$0xff]  ;;  %v623_v2 = vld [vmem:[%s1070_s0 + $0x18] sm:$0xff]  ;;  %528 = vset.pattern.permute.xlu0 %v594_v34  ;;  %529 = vset.pattern.permute.xlu1 %v594_v34 }
   0x2   :  { %v45_v3 = vmul.f32 %v613_v0, %v613_v0  ;;  %v43_v4 = vmul.f32 %v618_v1, %v618_v1  ;;  %v632_v5 = vld [vmem:[%s1070_s0 + $0x8] sm:$0xff]  ;;  %v46_v6 = vmul.f32 %v623_v2, %v623_v2  ;;  %v646_v9 = vld [vmem:[%s1070_s0 + $0x20] sm:$0xff]  ;;  %v655_v12 = vld [vmem:[%s1070_s0 + $0x38] sm:$0xff] }
   0x3   :  { %v44_v7 = vmul.f32 %v632_v5, %v632_v5  ;;  %v641_v8 = vld [vmem:[%s1070_s0 + $0x28] sm:$0xff]  ;;  %v47_v11 = vmul.f32 %v646_v9, %v646_v9  ;;  %v660_v13 = vld [vmem:[%s1070_s0 + $0x30] sm:$0xff]  ;;  %v50_v14 = vmul.f32 %v655_v12, %v655_v12  ;;  %v674_v17 = vld [vmem:[%s1070_s0 + $0x40] sm:$0xff] }
   0x4   :  { %79 = vadd.xlane.f32.xlu1 %v45_v3  ;;  %75 = vadd.xlane.f32.xlu0 %v43_v4  ;;  %v48_v10 = vmul.f32 %v641_v8, %v641_v8  ;;  %v49_v15 = vmul.f32 %v660_v13, %v660_v13  ;;  %v669_v16 = vld [vmem:[%s1070_s0 + $0x48] sm:$0xff]  ;;  %v51_v19 = vmul.f32 %v674_v17, %v674_v17  ;;  %v683_v20 = vld [vmem:[%s1070_s0 + $0x58] sm:$0xff]  ;;  %v688_v21 = vld [vmem:[%s1070_s0 + $0x50] sm:$0xff] }
   0x5   :  { %v52_v18 = vmul.f32 %v669_v16, %v669_v16  ;;  %v54_v22 = vmul.f32 %v683_v20, %v683_v20  ;;  %v53_v23 = vmul.f32 %v688_v21, %v688_v21  ;;  %v697_v24 = vld [vmem:[%s1070_s0 + $0x68] sm:$0xff]  ;;  %v702_v25 = vld [vmem:[%s1070_s0 + $0x60] sm:$0xff]  ;;  %v711_v28 = vld [vmem:[%s1070_s0 + $0x78] sm:$0xff] }
   0x6   :  { %v56_v26 = vmul.f32 %v697_v24, %v697_v24  ;;  %v55_v27 = vmul.f32 %v702_v25, %v702_v25  ;;  %v716_v29 = vld [vmem:[%s1070_s0 + $0x70] sm:$0xff]  ;;  %v58_v30 = vmul.f32 %v711_v28, %v711_v28  ;;  %v725_v32 = vld [vmem:[%s1070_s0 + $0x88] sm:$0xff]  ;;  %v730_v33 = vld [vmem:[%s1070_s0 + $0x80] sm:$0xff] }
   0x7   :  { %v57_v31 = vmul.f32 %v716_v29, %v716_v29  ;;  %v60_v35 = vmul.f32 %v725_v32, %v725_v32  ;;  %v59_v36 = vmul.f32 %v730_v33, %v730_v33  ;;  %v739_v37 = vld [vmem:[%s1070_s0 + $0x98] sm:$0xff]  ;;  %v744_v38 = vld [vmem:[%s1070_s0 + $0x90] sm:$0xff]  ;;  %v753_v41 = vld [vmem:[%s1070_s0 + $0xa8] sm:$0xff] }
   0x8   :  { %81 = vadd.xlane.f32.xlu1 %v46_v6  ;;  %77 = vadd.xlane.f32.xlu0 %v44_v7  ;;  %v62_v39 = vmul.f32 %v739_v37, %v739_v37  ;;  %v61_v40 = vmul.f32 %v744_v38, %v744_v38  ;;  %v758_v42 = vld [vmem:[%s1070_s0 + $0xa0] sm:$0xff]  ;;  %v64_v43 = vmul.f32 %v753_v41, %v753_v41  ;;  %v767_v45 = vld [vmem:[%s1070_s0 + $0xb8] sm:$0xff]  ;;  %v772_v46 = vld [vmem:[%s1070_s0 + $0xb0] sm:$0xff] }
   0x9   :  { %v63_v44 = vmul.f32 %v758_v42, %v758_v42  ;;  %v66_v47 = vmul.f32 %v767_v45, %v767_v45  ;;  %v65_v48 = vmul.f32 %v772_v46, %v772_v46  ;;  %v781_v49 = vld [vmem:[%s1070_s0 + $0xc8] sm:$0xff]  ;;  %v786_v50 = vld [vmem:[%s1070_s0 + $0xc0] sm:$0xff]  ;;  %v795_v53 = vld [vmem:[%s1070_s0 + $0xd8] sm:$0xff] }
   0xa   :  { %v68_v51 = vmul.f32 %v781_v49, %v781_v49  ;;  %v67_v52 = vmul.f32 %v786_v50, %v786_v50  ;;  %v800_v54 = vld [vmem:[%s1070_s0 + $0xd0] sm:$0xff]  ;;  %v70_v55 = vmul.f32 %v795_v53, %v795_v53  ;;  %v809_v57 = vld [vmem:[%s1070_s0 + $0xe0] sm:$0xff]  ;;  %v814_v58 = vld [vmem:[%s1070_s0 + $0xe8] sm:$0xff] }
   0xb   :  { %v69_v56 = vmul.f32 %v800_v54, %v800_v54  ;;  %v71_v59 = vmul.f32 %v809_v57, %v809_v57  ;;  %v72_v60 = vmul.f32 %v814_v58, %v814_v58  ;;  %v823_v61 = vld [vmem:[%s1070_s0 + $0xf0] sm:$0xff]  ;;  %v828_v62 = vld [vmem:[%s1070_s0 + $0xf8] sm:$0xff] }
   0xc   :  { %85 = vadd.xlane.f32.xlu1 %v48_v10  ;;  %83 = vadd.xlane.f32.xlu0 %v47_v11  ;;  %v73_v63 = vmul.f32 %v823_v61, %v823_v61  ;;  %v74_v3 = vmul.f32 %v828_v62, %v828_v62 }
  0x10   :  { %89 = vadd.xlane.f32.xlu1 %v50_v14  ;;  %87 = vadd.xlane.f32.xlu0 %v49_v15 }
  0x14   :  { %93 = vadd.xlane.f32.xlu1 %v52_v18  ;;  %91 = vadd.xlane.f32.xlu0 %v51_v19  ;;  %v171_v19 = vld [vmem:[%s1071_s1] sm:$0xff] }
  0x18   :  { %97 = vadd.xlane.f32.xlu1 %v54_v22  ;;  %95 = vadd.xlane.f32.xlu0 %v53_v23 }
  0x1c   :  { %101 = vadd.xlane.f32.xlu1 %v56_v26  ;;  %99 = vadd.xlane.f32.xlu0 %v55_v27 }
  0x20   :  { %105 = vadd.xlane.f32.xlu1 %v58_v30  ;;  %103 = vadd.xlane.f32.xlu0 %v57_v31  ;;  %v172_v30 = vld [vmem:[%s1071_s1 + $0x8] sm:$0xff] }
  0x24   :  { %109 = vadd.xlane.f32.xlu1 %v60_v35  ;;  %107 = vadd.xlane.f32.xlu0 %v59_v36  ;;  %v173_v35 = vld [vmem:[%s1071_s1 + $0x10] sm:$0xff] }
  0x28   :  { %113 = vadd.xlane.f32.xlu1 %v62_v39  ;;  %111 = vadd.xlane.f32.xlu0 %v61_v40 }
  0x2c   :  { %117 = vadd.xlane.f32.xlu1 %v64_v43  ;;  %115 = vadd.xlane.f32.xlu0 %v63_v44 }
  0x30   :  { %121 = vadd.xlane.f32.xlu1 %v66_v47  ;;  %119 = vadd.xlane.f32.xlu0 %v65_v48  ;;  %v174_v47 = vld [vmem:[%s1071_s1 + $0x18] sm:$0xff] }
  0x34   :  { %125 = vadd.xlane.f32.xlu1 %v68_v51  ;;  %123 = vadd.xlane.f32.xlu0 %v67_v52 }
  0x38   :  { %129 = vadd.xlane.f32.xlu1 %v70_v55  ;;  %127 = vadd.xlane.f32.xlu0 %v69_v56  ;;  %v175_v56 = vld [vmem:[%s1071_s1 + $0x20] sm:$0xff] }
  0x3c   :  { %131 = vadd.xlane.f32.xlu0 %v71_v59  ;;  %133 = vadd.xlane.f32.xlu1 %v72_v60 }
  0x40   :  { %135 = vadd.xlane.f32.xlu0 %v73_v63  ;;  %137 = vadd.xlane.f32.xlu1 %v74_v3  ;;  %v180_v63 = vld [vmem:[%s1071_s1 + $0x48] sm:$0xff] }
  0x8d   :  { %v80_v4 = vpop.xlane.xlu1 %79  ;;  %v76_v6 = vpop.xlane.xlu0 %75 }
  0x8e   :  { %530 = vrsqrt.f32 %v76_v6 }
  0x8f   :  { %532 = vrsqrt.f32 %v80_v4 }
  0x91   :  { %v82_v7 = vpop.xlane.xlu1 %81  ;;  %v78_v10 = vpop.xlane.xlu0 %77 }
  0x92   :  { %534 = vrsqrt.f32 %v78_v10 }
  0x93   :  { %536 = vrsqrt.f32 %v82_v7  ;;  %v176_v7 = vld [vmem:[%s1071_s1 + $0x28] sm:$0xff] }
  0x95   :  { %v86_v11 = vpop.xlane.xlu1 %85  ;;  %v84_v14 = vpop.xlane.xlu0 %83 }
  0x96   :  { %538 = vrsqrt.f32 %v84_v14 }
  0x99   :  { %v90_v15 = vpop.xlane.xlu1 %89  ;;  %v88_v18 = vpop.xlane.xlu0 %87 }
  0x9b   :  { %v531_v22 = vpop.eup %530 }
  0x9c   :  { %v203_v27 = vmul.f32 %v531_v22, %v171_v19  ;;  %v533_v31 = vpop.eup %532 }
  0x9d   :  { %v94_v23 = vpop.xlane.xlu1 %93  ;;  %v92_v26 = vpop.xlane.xlu0 %91  ;;  %v205_v43 = vmul.f32 %v533_v31, %v173_v35 }
  0x9e   :  { %540 = vrsqrt.f32 %v94_v23  ;;  %237 = vperm.xlu0 %528, %v203_v27  }
  0x9f   :  { %542 = vrsqrt.f32 %v86_v11  ;;  %v535_v34 = vpop.eup %534 }
  0xa0   :  { %v204_v40 = vmul.f32 %v535_v34, %v172_v30  ;;  %v537_v44 = vpop.eup %536 }
  0xa1   :  { %v98_v36 = vpop.xlane.xlu1 %97  ;;  %v96_v39 = vpop.xlane.xlu0 %95  ;;  %v206_v52 = vmul.f32 %v537_v44, %v174_v47  ;;  %v188_v47 = vld [vmem:[%s1071_s1 + $0x88] sm:$0xff] }
  0xa2   :  { %544 = vrsqrt.f32 %v98_v36  ;;  %242 = vperm.xlu1 %529, %v204_v40  }
  0xa3   :  { %546 = vrsqrt.f32 %v88_v18  ;;  %v539_v55 = vpop.eup %538 }
  0xa4   :  { %548 = vrsqrt.f32 %v90_v15  ;;  %v207_v4 = vmul.f32 %v539_v55, %v175_v56  ;;  %v182_v15 = vld [vmem:[%s1071_s1 + $0x58] sm:$0xff]  ;;  %v179_v55 = vld [vmem:[%s1071_s1 + $0x40] sm:$0xff] }
  0xa5   :  { %v846_v48 = vpop.xlane.xlu1 %101  ;;  %v848_v51 = vpop.xlane.xlu0 %99  ;;  %550 = vrsqrt.f32 %v92_v26  ;;  %v177_v26 = vld [vmem:[%s1071_s1 + $0x30] sm:$0xff] }
  0xa6   :  { %247 = vperm.xlu1 %529, %v205_v43  }
  0xa9   :  { %v853_v59 = vpop.xlane.xlu1 %105  ;;  %v855_v60 = vpop.xlane.xlu0 %103 }
  0xaa   :  { %252 = vperm.xlu1 %529, %v206_v52  }
  0xab   :  { %v541_v3 = vpop.eup %540 }
  0xac   :  { %v543_v6 = vpop.eup %542  ;;  %v212_v10 = vmul.f32 %v541_v3, %v180_v63 }
  0xad   :  { %v110_v11 = vpop.xlane.xlu1 %109  ;;  %v108_v14 = vpop.xlane.xlu0 %107  ;;  %v208_v19 = vmul.f32 %v543_v6, %v176_v7  ;;  %v190_v7 = vld [vmem:[%s1071_s1 + $0x98] sm:$0xff] }
  0xae   :  { %552 = vrsqrt.f32 %v110_v11  ;;  %282 = vperm.xlu0 %528, %v212_v10   ;;  %257 = vperm.xlu1 %529, %v207_v4   ;;  %v181_v11 = vld [vmem:[%s1071_s1 + $0x50] sm:$0xff] }
  0xaf   :  { %v545_v18 = vpop.eup %544  ;;  %554 = vrsqrt.f32 %v96_v39  ;;  %v178_v39 = vld [vmem:[%s1071_s1 + $0x38] sm:$0xff] }
  0xb0   :  { %v214_v22 = vmul.f32 %v545_v18, %v182_v15  ;;  %v547_v30 = vpop.eup %546 }
  0xb1   :  { %v114_v23 = vpop.xlane.xlu1 %113  ;;  %v112_v27 = vpop.xlane.xlu0 %111  ;;  %v209_v35 = vmul.f32 %v547_v30, %v177_v26  ;;  %v192_v30 = vld [vmem:[%s1071_s1 + $0xa8] sm:$0xff] }
  0xb2   :  { %556 = vrsqrt.f32 %v114_v23  ;;  %292 = vperm.xlu0 %528, %v214_v22   ;;  %262 = vperm.xlu1 %529, %v208_v19   ;;  %v549_v36 = vpop.eup %548  ;;  %v187_v19 = vld [vmem:[%s1071_s1 + $0x80] sm:$0xff] }
  0xb3   :  { %558 = vrsqrt.f32 %v108_v14  ;;  %v210_v44 = vmul.f32 %v549_v36, %v178_v39  ;;  %v551_v52 = vpop.eup %550  ;;  %v189_v36 = vld [vmem:[%s1071_s1 + $0x90] sm:$0xff] }
  0xb4   :  { %v211_v6 = vmul.f32 %v551_v52, %v179_v55 }
  0xb5   :  { %v118_v31 = vpop.xlane.xlu1 %117  ;;  %v116_v34 = vpop.xlane.xlu0 %115 }
  0xb6   :  { %560 = vrsqrt.f32 %v118_v31  ;;  %267 = vperm.xlu1 %529, %v209_v35  }
  0xb7   :  { %562 = vrsqrt.f32 %v112_v27 }
  0xb9   :  { %v122_v40 = vpop.xlane.xlu1 %121  ;;  %v120_v43 = vpop.xlane.xlu0 %119 }
  0xba   :  { %564 = vrsqrt.f32 %v122_v40  ;;  %272 = vperm.xlu1 %529, %v210_v44  }
  0xbb   :  { %v553_v56 = vpop.eup %552  ;;  %566 = vrsqrt.f32 %v116_v34 }
  0xbc   :  { %v220_v63 = vmul.f32 %v553_v56, %v188_v47  ;;  %v555_v10 = vpop.eup %554  ;;  %v191_v56 = vld [vmem:[%s1071_s1 + $0xa0] sm:$0xff] }
  0xbd   :  { %v126_v3 = vpop.xlane.xlu1 %125  ;;  %v124_v4 = vpop.xlane.xlu0 %123  ;;  %v213_v27 = vmul.f32 %v555_v10, %v181_v11 }
  0xbe   :  { %568 = vrsqrt.f32 %v126_v3  ;;  %322 = vperm.xlu0 %528, %v220_v63   ;;  %277 = vperm.xlu1 %529, %v211_v6   ;;  %v196_v3 = vld [vmem:[%s1071_s1 + $0xc8] sm:$0xff] }
  0xbf   :  { %v557_v14 = vpop.eup %556  ;;  %570 = vrsqrt.f32 %v120_v43  ;;  %v194_v43 = vld [vmem:[%s1071_s1 + $0xb8] sm:$0xff] }
  0xc0   :  { %v559_v15 = vpop.eup %558  ;;  %v222_v18 = vmul.f32 %v557_v14, %v190_v7  ;;  %v193_v14 = vld [vmem:[%s1071_s1 + $0xb0] sm:$0xff] }
  0xc1   :  { %v130_v22 = vpop.xlane.xlu1 %129  ;;  %v128_v23 = vpop.xlane.xlu0 %127  ;;  %v219_v31 = vmul.f32 %v559_v15, %v187_v19  ;;  %v198_v15 = vld [vmem:[%s1071_s1 + $0xd8] sm:$0xff] }
  0xc2   :  { %572 = vrsqrt.f32 %v130_v22  ;;  %332 = vperm.xlu0 %528, %v222_v18   ;;  %287 = vperm.xlu1 %529, %v213_v27   ;;  %v195_v27 = vld [vmem:[%s1071_s1 + $0xc0] sm:$0xff] }
  0xc3   :  { %v561_v26 = vpop.eup %560  ;;  %574 = vrsqrt.f32 %v124_v4 }
  0xc4   :  { %v563_v34 = vpop.eup %562  ;;  %v224_v35 = vmul.f32 %v561_v26, %v192_v30  ;;  %576 = vrsqrt.f32 %v128_v23 }
  0xc5   :  { %v132_v39 = vpop.xlane.xlu0 %131  ;;  %v134_v40 = vpop.xlane.xlu1 %133  ;;  %v221_v47 = vmul.f32 %v563_v34, %v189_v36  ;;  %v200_v34 = vld [vmem:[%s1071_s1 + $0xe8] sm:$0xff] }
  0xc6   :  { %578 = vrsqrt.f32 %v132_v39  ;;  %342 = vperm.xlu0 %528, %v224_v35   ;;  %317 = vperm.xlu1 %529, %v219_v31   ;;  %v197_v39 = vld [vmem:[%s1071_s1 + $0xd0] sm:$0xff] }
  0xc7   :  { %v565_v44 = vpop.eup %564  ;;  %580 = vrsqrt.f32 %v134_v40 }
  0xc8   :  { %v567_v52 = vpop.eup %566  ;;  %v226_v55 = vmul.f32 %v565_v44, %v194_v43  ;;  %v201_v44 = vld [vmem:[%s1071_s1 + $0xf0] sm:$0xff] }
  0xc9   :  { %v136_v63 = vpop.xlane.xlu0 %135  ;;  %v223_v6 = vmul.f32 %v567_v52, %v191_v56  ;;  %v138_v7 = vpop.xlane.xlu1 %137  ;;  %v183_v52 = vld [vmem:[%s1071_s1 + $0x60] sm:$0xff] }
  0xca   :  { %352 = vperm.xlu0 %528, %v226_v55   ;;  %582 = vrsqrt.f32 %v136_v63  ;;  %327 = vperm.xlu1 %529, %v221_v47  }
  0xcb   :  { %v569_v4 = vpop.eup %568  ;;  %584 = vrsqrt.f32 %v848_v51  ;;  %v199_v51 = vld [vmem:[%s1071_s1 + $0xe0] sm:$0xff] }
  0xcc   :  { %v571_v10 = vpop.eup %570  ;;  %v228_v11 = vmul.f32 %v569_v4, %v196_v3  ;;  %586 = vrsqrt.f32 %v138_v7 }
  0xcd   :  { %v225_v19 = vmul.f32 %v571_v10, %v193_v14  ;;  %588 = vrsqrt.f32 %v846_v48  ;;  %v185_v10 = vld [vmem:[%s1071_s1 + $0x70] sm:$0xff] }
  0xce   :  { %362 = vperm.xlu0 %528, %v228_v11   ;;  %337 = vperm.xlu1 %529, %v223_v6   ;;  %590 = vrsqrt.f32 %v855_v60  ;;  %v202_v60 = vld [vmem:[%s1071_s1 + $0xf8] sm:$0xff] }
  0xcf   :  { %v573_v18 = vpop.eup %572  ;;  %592 = vrsqrt.f32 %v853_v59  ;;  %v184_v59 = vld [vmem:[%s1071_s1 + $0x68] sm:$0xff] }
  0xd0   :  { %v575_v22 = vpop.eup %574  ;;  %v230_v23 = vmul.f32 %v573_v18, %v198_v15  ;;  %v186_v15 = vld [vmem:[%s1071_s1 + $0x78] sm:$0xff] }
  0xd1   :  { %v577_v30 = vpop.eup %576  ;;  %v227_v31 = vmul.f32 %v575_v22, %v195_v27 }
  0xd2   :  { %372 = vperm.xlu0 %528, %v230_v23   ;;  %347 = vperm.xlu1 %529, %v225_v19   ;;  %v229_v43 = vmul.f32 %v577_v30, %v197_v39 }
  0xd3   :  { %v579_v26 = vpop.eup %578 }
  0xd4   :  { %v581_v35 = vpop.eup %580  ;;  %v231_v36 = vmul.f32 %v579_v26, %v199_v51 }
  0xd5   :  { %v232_v48 = vmul.f32 %v581_v35, %v200_v34 }
  0xd6   :  { %377 = vperm.xlu0 %528, %v231_v36   ;;  %357 = vperm.xlu1 %529, %v227_v31  }
  0xd7   :  { %v583_v40 = vpop.eup %582 }
  0xd8   :  { %v585_v47 = vpop.eup %584  ;;  %v233_v55 = vmul.f32 %v583_v40, %v201_v44 }
  0xd9   :  { %v587_v56 = vpop.eup %586  ;;  %v215_v63 = vmul.f32 %v585_v47, %v183_v52 }
  0xda   :  { %382 = vperm.xlu0 %528, %v232_v48   ;;  %367 = vperm.xlu1 %529, %v229_v43   ;;  %v589_v3 = vpop.eup %588  ;;  %v234_v4 = vmul.f32 %v587_v56, %v202_v60 }
  0xdb   :  { %v216_v6 = vmul.f32 %v589_v3, %v184_v59  ;;  %v591_v7 = vpop.eup %590 }
  0xdc   :  { %v217_v11 = vmul.f32 %v591_v7, %v185_v10  ;;  %v593_v14 = vpop.eup %592 }
  0xdd   :  { %v218_v18 = vmul.f32 %v593_v14, %v186_v15 }
  0xde   :  { %387 = vperm.xlu0 %528, %v233_v55   ;;  %297 = vperm.xlu1 %529, %v215_v63  }
  0xe2   :  { %392 = vperm.xlu0 %528, %v234_v4   ;;  %302 = vperm.xlu1 %529, %v216_v6  }
  0xe6   :  { %307 = vperm.xlu1 %529, %v217_v11  }
  0xea   :  { %312 = vperm.xlu1 %529, %v218_v18  }
 0x119   :  { %v238_v19 = vpop.permute.xlu0 %237 }
 0x11a   :  { %v395_v22 = vmul.f32 %v238_v19, %v618_v1 }
 0x11c   :  { %427 = vxpose.xlu1.b32.start [1/16] %v395_v22, 128 }
 0x11d   :  { %v243_v23 = vpop.permute.xlu1 %242 }
 0x11e   :  { %v396_v27 = vmul.f32 %v243_v23, %v632_v5 }
 0x120   :  { %428 = vxpose.xlu1.b32.cont [2/16] %v396_v27, 128 }
 0x121   :  { %v248_v51 = vpop.permute.xlu1 %247 }
 0x122   :  { %v397_v30 = vmul.f32 %v248_v51, %v613_v0 }
 0x124   :  { %429 = vxpose.xlu1.b32.cont [3/16] %v397_v30, 128 }
 0x125   :  { %v253_v26 = vpop.permute.xlu1 %252 }
 0x126   :  { %v398_v31 = vmul.f32 %v253_v26, %v623_v2 }
 0x128   :  { %430 = vxpose.xlu1.b32.cont [4/16] %v398_v31, 128 }
 0x129   :  { %v258_v34 = vpop.permute.xlu1 %257  ;;  %v283_v40 = vpop.permute.xlu0 %282 }
 0x12a   :  { %v399_v35 = vmul.f32 %v258_v34, %v646_v9  ;;  %v404_v47 = vmul.f32 %v283_v40, %v669_v16 }
 0x12c   :  { %431 = vxpose.xlu1.b32.cont [5/16] %v399_v35, 128 }
 0x12d   :  { %v263_v36 = vpop.permute.xlu1 %262  ;;  %v293_v44 = vpop.permute.xlu0 %292 }
 0x12e   :  { %v400_v1 = vmul.f32 %v263_v36, %v641_v8  ;;  %v406_v56 = vmul.f32 %v293_v44, %v683_v20 }
 0x130   :  { %432 = vxpose.xlu1.b32.cont [6/16] %v400_v1, 128 }
 0x131   :  { %v268_v39 = vpop.permute.xlu1 %267 }
 0x132   :  { %v401_v5 = vmul.f32 %v268_v39, %v660_v13 }
 0x134   :  { %433 = vxpose.xlu1.b32.cont [7/16] %v401_v5, 128 }
 0x135   :  { %v273_v48 = vpop.permute.xlu1 %272 }
 0x136   :  { %v402_v0 = vmul.f32 %v273_v48, %v655_v12 }
 0x138   :  { %434 = vxpose.xlu1.b32.cont [8/16] %v402_v0, 128 }
 0x139   :  { %v278_v43 = vpop.permute.xlu1 %277  ;;  %v323_v55 = vpop.permute.xlu0 %322 }
 0x13a   :  { %v403_v2 = vmul.f32 %v278_v43, %v674_v17  ;;  %v412_v60 = vmul.f32 %v323_v55, %v725_v32 }
 0x13c   :  { %435 = vxpose.xlu1.b32.cont [9/16] %v403_v2, 128 }
 0x13d   :  { %v288_v9 = vpop.permute.xlu1 %287  ;;  %v333_v16 = vpop.permute.xlu0 %332 }
 0x13e   :  { %v405_v52 = vmul.f32 %v288_v9, %v688_v21  ;;  %v414_v21 = vmul.f32 %v333_v16, %v739_v37 }
 0x140   :  { %436 = vxpose.xlu1.b32.cont [10/16] %v404_v47, 128 }
 0x141   :  { %v318_v8 = vpop.permute.xlu1 %317 }
 0x142   :  { %v411_v13 = vmul.f32 %v318_v8, %v730_v33  ;;  %v343_v33 = vpop.permute.xlu0 %342 }
 0x143   :  { %v416_v20 = vmul.f32 %v343_v33, %v753_v41 }
 0x144   :  { %459 = vxpose.xlu0.b32.start [1/16] %v411_v13, 128  ;;  %437 = vxpose.xlu1.b32.cont [11/16] %v405_v52, 128 }
 0x145   :  { %v328_v12 = vpop.permute.xlu1 %327 }
 0x146   :  { %v413_v63 = vmul.f32 %v328_v12, %v744_v38  ;;  %v353_v32 = vpop.permute.xlu0 %352 }
 0x147   :  { %v418_v14 = vmul.f32 %v353_v32, %v767_v45 }
 0x148   :  { %438 = vxpose.xlu1.b32.cont [12/16] %v406_v56, 128  ;;  %460 = vxpose.xlu0.b32.cont [2/16] %v412_v60, 128 }
 0x149   :  { %v338_v17 = vpop.permute.xlu1 %337 }
 0x14a   :  { %v415_v4 = vmul.f32 %v338_v17, %v758_v42  ;;  %v363_v11 = vpop.permute.xlu0 %362 }
 0x14c   :  { %461 = vxpose.xlu0.b32.cont [3/16] %v413_v63, 128 }
 0x14d   :  { %v348_v3 = vpop.permute.xlu1 %347 }
 0x14e   :  { %v417_v10 = vmul.f32 %v348_v3, %v772_v46  ;;  %v373_v19 = vpop.permute.xlu0 %372 }
 0x14f   :  { %v422_v23 = vmul.f32 %v373_v19, %v795_v53 }
 0x150   :  { %462 = vxpose.xlu0.b32.cont [4/16] %v414_v21, 128 }
 0x151   :  { %v358_v59 = vpop.permute.xlu1 %357 }
 0x152   :  { %v419_v41 = vmul.f32 %v358_v59, %v786_v50  ;;  %v378_v45 = vpop.permute.xlu0 %377 }
 0x154   :  { %463 = vxpose.xlu0.b32.cont [5/16] %v415_v4, 128 }
 0x155   :  { %v368_v6 = vpop.permute.xlu1 %367 }
 0x156   :  { %v383_v27 = vpop.permute.xlu0 %382 }
 0x157   :  { %v424_v51 = vmul.f32 %v383_v27, %v814_v58 }
 0x158   :  { %464 = vxpose.xlu0.b32.cont [6/16] %v416_v20, 128 }
 0x159   :  { %v298_v7 = vpop.permute.xlu1 %297 }
 0x15a   :  { %v407_v38 = vmul.f32 %v298_v7, %v702_v25  ;;  %v420_v25 = vmul.f32 %v363_v11, %v781_v49  ;;  %v388_v50 = vpop.permute.xlu0 %387 }
 0x15b   :  { %v425_v49 = vmul.f32 %v388_v50, %v823_v61 }
 0x15c   :  { %439 = vxpose.xlu1.b32.cont [13/16] %v407_v38, 128  ;;  %465 = vxpose.xlu0.b32.cont [7/16] %v417_v10, 128 }
 0x15d   :  { %v303_v37 = vpop.permute.xlu1 %302 }
 0x15e   :  { %v408_v15 = vmul.f32 %v303_v37, %v697_v24  ;;  %v421_v24 = vmul.f32 %v368_v6, %v800_v54 }
 0x160   :  { %440 = vxpose.xlu1.b32.cont [14/16] %v408_v15, 128  ;;  %466 = vxpose.xlu0.b32.cont [8/16] %v418_v14, 128 }
 0x161   :  { %v308_v42 = vpop.permute.xlu1 %307 }
 0x162   :  { %v409_v18 = vmul.f32 %v308_v42, %v716_v29  ;;  %v423_v29 = vmul.f32 %v378_v45, %v809_v57 }
 0x164   :  { %441 = vxpose.xlu1.b32.cont [15/16] %v409_v18, 128  ;;  %467 = vxpose.xlu0.b32.cont [9/16] %v419_v41, 128 }
 0x165   :  { %v313_v46 = vpop.permute.xlu1 %312 }
 0x166   :  { %v410_v22 = vmul.f32 %v313_v46, %v711_v28  ;;  %v393_v28 = vpop.permute.xlu0 %392 }
 0x167   :  { %v426_v30 = vmul.f32 %v393_v28, %v828_v62 }
 0x168   :  { %442 = vxpose.xlu1.b32.end [16/16] %v410_v22, 128  ;;  %468 = vxpose.xlu0.b32.cont [10/16] %v420_v25, 128 }
 0x16c   :  { %469 = vxpose.xlu0.b32.cont [11/16] %v421_v24, 128 }
 0x170   :  { %470 = vxpose.xlu0.b32.cont [12/16] %v422_v23, 128 }
 0x174   :  { %471 = vxpose.xlu0.b32.cont [13/16] %v423_v29, 128 }
 0x178   :  { %472 = vxpose.xlu0.b32.cont [14/16] %v424_v51, 128 }
 0x17c   :  { %473 = vxpose.xlu0.b32.cont [15/16] %v425_v49, 128 }
 0x180   :  { %474 = vxpose.xlu0.b32.end [16/16] %v426_v30, 128 }
 0x1a8   :  { %v443_v54 = vpop.trf.xlu1 }
 0x1a9   :  { %491 = vst [vmem:[%s1072_s2] sm:$0xff] %v443_v54 }
 0x1ac   :  { %v444_v53 = vpop.trf.xlu1 }
 0x1ad   :  { %493 = vst [vmem:[%s1072_s2 + $0x10] sm:$0xff] %v444_v53 }
 0x1b0   :  { %v445_v57 = vpop.trf.xlu1 }
 0x1b1   :  { %495 = vst [vmem:[%s1072_s2 + $0x20] sm:$0xff] %v445_v57 }
 0x1b4   :  { %v446_v58 = vpop.trf.xlu1 }
 0x1b5   :  { %497 = vst [vmem:[%s1072_s2 + $0x30] sm:$0xff] %v446_v58 }
 0x1b8   :  { %v447_v61 = vpop.trf.xlu1 }
 0x1b9   :  { %499 = vst [vmem:[%s1072_s2 + $0x40] sm:$0xff] %v447_v61 }
 0x1bc   :  { %v448_v62 = vpop.trf.xlu1 }
 0x1bd   :  { %501 = vst [vmem:[%s1072_s2 + $0x50] sm:$0xff] %v448_v62 }
 0x1c0   :  { %v475_v26 = vpop.trf.xlu0  ;;  %v449_v31 = vpop.trf.xlu1 }
 0x1c1   :  { %492 = vst [vmem:[%s1072_s2 + $0x8] sm:$0xff] %v475_v26  ;;  %503 = vst [vmem:[%s1072_s2 + $0x60] sm:$0xff] %v449_v31 }
 0x1c4   :  { %v476_v34 = vpop.trf.xlu0  ;;  %v450_v35 = vpop.trf.xlu1 }
 0x1c5   :  { %494 = vst [vmem:[%s1072_s2 + $0x18] sm:$0xff] %v476_v34  ;;  %505 = vst [vmem:[%s1072_s2 + $0x70] sm:$0xff] %v450_v35 }
 0x1c8   :  { %v477_v36 = vpop.trf.xlu0  ;;  %v451_v1 = vpop.trf.xlu1 }
 0x1c9   :  { %496 = vst [vmem:[%s1072_s2 + $0x28] sm:$0xff] %v477_v36  ;;  %507 = vst [vmem:[%s1072_s2 + $0x80] sm:$0xff] %v451_v1 }
 0x1cc   :  { %v478_v39 = vpop.trf.xlu0  ;;  %v452_v5 = vpop.trf.xlu1 }
 0x1cd   :  { %498 = vst [vmem:[%s1072_s2 + $0x38] sm:$0xff] %v478_v39  ;;  %509 = vst [vmem:[%s1072_s2 + $0x90] sm:$0xff] %v452_v5 }
 0x1d0   :  { %v479_v48 = vpop.trf.xlu0  ;;  %v453_v0 = vpop.trf.xlu1 }
 0x1d1   :  { %500 = vst [vmem:[%s1072_s2 + $0x48] sm:$0xff] %v479_v48  ;;  %511 = vst [vmem:[%s1072_s2 + $0xa0] sm:$0xff] %v453_v0 }
 0x1d4   :  { %v480_v40 = vpop.trf.xlu0  ;;  %v454_v43 = vpop.trf.xlu1 }
 0x1d5   :  { %502 = vst [vmem:[%s1072_s2 + $0x58] sm:$0xff] %v480_v40  ;;  %513 = vst [vmem:[%s1072_s2 + $0xb0] sm:$0xff] %v454_v43 }
 0x1d8   :  { %v481_v2 = vpop.trf.xlu0  ;;  %v455_v44 = vpop.trf.xlu1 }
 0x1d9   :  { %504 = vst [vmem:[%s1072_s2 + $0x68] sm:$0xff] %v481_v2  ;;  %515 = vst [vmem:[%s1072_s2 + $0xc0] sm:$0xff] %v455_v44 }
 0x1dc   :  { %v482_v9 = vpop.trf.xlu0  ;;  %v456_v47 = vpop.trf.xlu1 }
 0x1dd   :  { %506 = vst [vmem:[%s1072_s2 + $0x78] sm:$0xff] %v482_v9  ;;  %517 = vst [vmem:[%s1072_s2 + $0xd0] sm:$0xff] %v456_v47 }
 0x1e0   :  { %v483_v8 = vpop.trf.xlu0  ;;  %v457_v52 = vpop.trf.xlu1 }
 0x1e1   :  { %508 = vst [vmem:[%s1072_s2 + $0x88] sm:$0xff] %v483_v8  ;;  %519 = vst [vmem:[%s1072_s2 + $0xe0] sm:$0xff] %v457_v52 }
 0x1e4   :  { %v484_v13 = vpop.trf.xlu0  ;;  %v458_v55 = vpop.trf.xlu1 }
 0x1e5   :  { %510 = vst [vmem:[%s1072_s2 + $0x98] sm:$0xff] %v484_v13  ;;  %521 = vst [vmem:[%s1072_s2 + $0xf0] sm:$0xff] %v458_v55 }
 0x1e8   :  { %v485_v12 = vpop.trf.xlu0 }
 0x1e9   :  { %512 = vst [vmem:[%s1072_s2 + $0xa8] sm:$0xff] %v485_v12 }
 0x1ec   :  { %v486_v56 = vpop.trf.xlu0 }
 0x1ed   :  { %514 = vst [vmem:[%s1072_s2 + $0xb8] sm:$0xff] %v486_v56 }
 0x1f0   :  { %v487_v60 = vpop.trf.xlu0 }
 0x1f1   :  { %516 = vst [vmem:[%s1072_s2 + $0xc8] sm:$0xff] %v487_v60 }
 0x1f4   :  { %v488_v17 = vpop.trf.xlu0 }
 0x1f5   :  { %518 = vst [vmem:[%s1072_s2 + $0xd8] sm:$0xff] %v488_v17 }
 0x1f8   :  { %v489_v63 = vpop.trf.xlu0 }
 0x1f9   :  { %520 = vst [vmem:[%s1072_s2 + $0xe8] sm:$0xff] %v489_v63 }
 0x1fc   :  { %v490_v16 = vpop.trf.xlu0 }
 0x1fd   :  { %522 = vst [vmem:[%s1072_s2 + $0xf8] sm:$0xff] %v490_v16 }

</bundles_post_ra>
